<compile_context>
chip_gen: v6e
topology: v6e:2x2x1
jax: 0.10.0
libtpu: 0.0.40
codegen_flags: <defaults>
</compile_context>

<pallas_src>
import functools

import jax
import jax.numpy as jnp
from jax.experimental import pallas as pl
from jax.experimental.pallas import tpu as pltpu

LANES = 128  # channel pad target: lane width / MXU-friendly K and N


# ----------------------------------------------------------------------------
# Kernels
# ----------------------------------------------------------------------------
def _accumulate_conv_taps(x_ref, w_ref, acc_ref, *, H, W, C):
    """3x3 conv (stride 1) on a spatially padded tile.

    x_ref : [1, H+2, W+2, C]  bf16 (zero halo, zero channel pad)
    w_ref : [9, C, C]         bf16 (tap-major: di*3+dj)
    acc_ref: [H*W, C]         f32 VMEM scratch (accumulator)
    """
    acc_ref[...] = jnp.zeros_like(acc_ref)
    # Load once, slice in f32 (native (8,128) layout handles the +-1/+-2
    # sublane-offset shifts cleanly), cast each tap back to bf16 for the MXU.
    x = x_ref[0].astype(jnp.float32)                      # [H+2, W+2, C]
    for di in range(3):
        for dj in range(3):
            tap = x[di:di + H, dj:dj + W, :]              # [H, W, C]
            tap = tap.reshape(H * W, C).astype(jnp.bfloat16)
            acc_ref[...] += jnp.dot(tap, w_ref[di * 3 + dj],
                                    preferred_element_type=jnp.float32)


def conv3x3_bias_relu_kernel(x_ref, w_ref, b_ref, o_ref, acc_ref, *, H, W, C):
    """o = relu(conv3x3(x) + b), one image per grid step."""
    _accumulate_conv_taps(x_ref, w_ref, acc_ref, H=H, W=W, C=C)
    y = jnp.maximum(acc_ref[...] + b_ref[...], 0.0)        # f32 epilogue
    o_ref[...] = y.reshape(1, H, W, C).astype(o_ref.dtype)


def conv_res_gap_mlp_kernel(x_ref, r_ref, wc_ref, bc_ref,
                            w1_ref, b1_ref, w2_ref, b2_ref,
                            w3_ref, b3_ref, wo_ref, bo_ref,
                            o_ref, acc_ref, *, H, W, C):
    """Fused tail: relu(conv3x3(x)+b+residual) -> GAP -> 3x(FC+ReLU) -> FC."""
    _accumulate_conv_taps(x_ref, wc_ref, acc_ref, H=H, W=W, C=C)
    res = r_ref[0].reshape(H * W, C).astype(jnp.float32)
    y = jnp.maximum(acc_ref[...] + bc_ref[...] + res, 0.0)      # [H*W, C] f32

    # Global average pool over spatial positions (f32).
    feat = jnp.mean(y, axis=0, keepdims=True)                    # [1, C]

    # MLP head: run 8 identical rows so all matmuls are (8,128)x(128,128).
    h = jnp.broadcast_to(feat, (8, C)).astype(jnp.bfloat16)
    h = jnp.maximum(jnp.dot(h, w1_ref[...], preferred_element_type=jnp.float32)
                    + b1_ref[...], 0.0).astype(jnp.bfloat16)
    h = jnp.maximum(jnp.dot(h, w2_ref[...], preferred_element_type=jnp.float32)
                    + b2_ref[...], 0.0).astype(jnp.bfloat16)
    h = jnp.maximum(jnp.dot(h, w3_ref[...], preferred_element_type=jnp.float32)
                    + b3_ref[...], 0.0).astype(jnp.bfloat16)
    out = (jnp.dot(h, wo_ref[...], preferred_element_type=jnp.float32)
           + bo_ref[...])                                        # [8, C] f32
    o_ref[...] = out[0:1, :].reshape(1, 1, C)


# ----------------------------------------------------------------------------
# Wrappers
# ----------------------------------------------------------------------------
def _conv_cost(B, H, W, C, extra_bytes=0, extra_flops=0):
    flops = 2 * B * 9 * H * W * C * C + extra_flops
    bytes_acc = (B * (H + 2) * (W + 2) * C * 2       # x (bf16)
                 + 9 * C * C * 2                     # conv weights (bf16)
                 + C * 4                             # bias (f32)
                 + B * H * W * C * 2                 # out (bf16)
                 + extra_bytes)
    return pl.CostEstimate(flops=int(flops), transcendentals=0,
                           bytes_accessed=int(bytes_acc))


def conv3x3_relu(xp, w, bias):
    """xp: [B, H+2, W+2, C] bf16 -> [B, H, W, C] bf16."""
    B, Hp, Wp, C = xp.shape
    H, W = Hp - 2, Wp - 2
    kernel = functools.partial(conv3x3_bias_relu_kernel, H=H, W=W, C=C)
    return pl.pallas_call(
        kernel,
        out_shape=jax.ShapeDtypeStruct((B, H, W, C), jnp.bfloat16),
        grid=(B,),
        in_specs=[
            pl.BlockSpec((1, H + 2, W + 2, C), lambda b: (b, 0, 0, 0)),
            pl.BlockSpec((9, C, C), lambda b: (0, 0, 0)),
            pl.BlockSpec((1, C), lambda b: (0, 0)),
        ],
        out_specs=pl.BlockSpec((1, H, W, C), lambda b: (b, 0, 0, 0)),
        scratch_shapes=[pltpu.VMEM((H * W, C), jnp.float32)],
        compiler_params=pltpu.CompilerParams(
            dimension_semantics=("parallel",)),
        cost_estimate=_conv_cost(B, H, W, C),
    )(xp, w, bias)


def conv_res_gap_mlp(xp, residual, params):
    """Fused final conv + residual + GAP + MLP head. Returns [B, 1, C] f32."""
    B, Hp, Wp, C = xp.shape
    H, W = Hp - 2, Wp - 2
    kernel = functools.partial(conv_res_gap_mlp_kernel, H=H, W=W, C=C)
    w_spec = pl.BlockSpec((C, C), lambda b: (0, 0))
    b_spec = pl.BlockSpec((1, C), lambda b: (0, 0))
    extra_bytes = B * H * W * C * 2 + 4 * C * C * 2 + 5 * C * 4
    extra_flops = B * 8 * 4 * 2 * C * C
    return pl.pallas_call(
        kernel,
        out_shape=jax.ShapeDtypeStruct((B, 1, C), jnp.float32),
        grid=(B,),
        in_specs=[
            pl.BlockSpec((1, H + 2, W + 2, C), lambda b: (b, 0, 0, 0)),  # x
            pl.BlockSpec((1, H, W, C), lambda b: (b, 0, 0, 0)),          # res
            pl.BlockSpec((9, C, C), lambda b: (0, 0, 0)),                # conv w
            b_spec,                                                      # conv b
            w_spec, b_spec,                                              # fc1
            w_spec, b_spec,                                              # fc2
            w_spec, b_spec,                                              # fc3
            w_spec, b_spec,                                              # classifier
        ],
        out_specs=pl.BlockSpec((1, 1, C), lambda b: (b, 0, 0)),
        scratch_shapes=[pltpu.VMEM((H * W, C), jnp.float32)],
        compiler_params=pltpu.CompilerParams(
            dimension_semantics=("parallel",)),
        cost_estimate=_conv_cost(B, H, W, C, extra_bytes, extra_flops),
    )(xp, residual,
      params["blk2_w"], params["blk2_b"],
      params["fc1_w"], params["fc1_b"],
      params["fc2_w"], params["fc2_b"],
      params["fc3_w"], params["fc3_b"],
      params["cls_w"], params["cls_b"])


# ----------------------------------------------------------------------------
# Parameter init (deterministic, synthetic; padded to 128 lanes with zeros)
# ----------------------------------------------------------------------------
def init_params(key, cin, n_outputs, num_classes):
    keys = jax.random.split(key, 8)
    C = LANES

    def he(k, shape, fan_in):
        return jax.random.normal(k, shape, jnp.float32) * (2.0 / fan_in) ** 0.5

    def pad_conv(w):                           # [3,3,ci,co] -> [9,C,C] bf16
        ci, co = w.shape[2], w.shape[3]
        w = w.reshape(9, ci, co)
        w = jnp.pad(w, ((0, 0), (0, C - ci), (0, C - co)))
        return w.astype(jnp.bfloat16)

    def pad_fc(w):                             # [din,dout] -> [C,C] bf16
        din, dout = w.shape
        return jnp.pad(w, ((0, C - din), (0, C - dout))).astype(jnp.bfloat16)

    def pad_b(n):                              # zeros -> [1,C] f32
        return jnp.zeros((1, C), jnp.float32)

    p = {}
    p["stem_w"] = pad_conv(he(keys[0], (3, 3, cin, n_outputs), 9 * cin))
    p["stem_b"] = pad_b(n_outputs)
    p["blk1_w"] = pad_conv(he(keys[1], (3, 3, n_outputs, n_outputs), 9 * n_outputs))
    p["blk1_b"] = pad_b(n_outputs)
    p["blk2_w"] = pad_conv(he(keys[2], (3, 3, n_outputs, n_outputs), 9 * n_outputs))
    p["blk2_b"] = pad_b(n_outputs)
    p["fc1_w"] = pad_fc(he(keys[3], (n_outputs, n_outputs), n_outputs))
    p["fc1_b"] = pad_b(n_outputs)
    p["fc2_w"] = pad_fc(he(keys[4], (n_outputs, n_outputs), n_outputs))
    p["fc2_b"] = pad_b(n_outputs)
    p["fc3_w"] = pad_fc(he(keys[5], (n_outputs, n_outputs), n_outputs))
    p["fc3_b"] = pad_b(n_outputs)
    p["cls_w"] = pad_fc(he(keys[6], (n_outputs, num_classes), n_outputs))
    p["cls_b"] = pad_b(num_classes)
    return p


# ----------------------------------------------------------------------------
# Forward: network = featurizer -> middle_fc_layers -> classifier
# ----------------------------------------------------------------------------
def share_erm_forward(params, x_nchw, num_classes):
    C = LANES
    # NCHW -> NHWC, channel pad to 128 lanes, bf16 for HBM traffic.
    x = jnp.transpose(x_nchw, (0, 2, 3, 1)).astype(jnp.float32)
    B, H, W, cin = x.shape
    x = jnp.pad(x, ((0, 0), (0, 0), (0, 0), (0, C - cin))).astype(jnp.bfloat16)

    def spad(t):  # zero halo for the 3x3 convs
        return jnp.pad(t, ((0, 0), (1, 1), (1, 1), (0, 0)))

    # featurizer (small ResNet-style): stem -> residual block -> GAP
    h0 = conv3x3_relu(spad(x), params["stem_w"], params["stem_b"])   # [B,H,W,C]
    h1 = conv3x3_relu(spad(h0), params["blk1_w"], params["blk1_b"])  # [B,H,W,C]
    # fused: conv + residual(h0) + ReLU + GAP + middle_fc_layers + classifier
    logits_pad = conv_res_gap_mlp(spad(h1), h0, params)              # [B,1,C] f32
    return logits_pad[:, 0, :num_classes]


if __name__ == "__main__":
    B, Cin, H, W = 2, 4, 16, 16
    N_OUTPUTS = 32       # featurizer.n_outputs (synthetic, small)
    NUM_CLASSES = 8

    key = jax.random.PRNGKey(0)
    kx, kp = jax.random.split(key)
    x = jax.random.normal(kx, (B, Cin, H, W), jnp.float32)   # NCHW like PyTorch
    params = init_params(kp, Cin, N_OUTPUTS, NUM_CLASSES)

    fwd = jax.jit(functools.partial(share_erm_forward, num_classes=NUM_CLASSES))
    logits = fwd(params, x)
    logits = jax.block_until_ready(logits)

    assert logits.shape == (B, NUM_CLASSES)
    assert bool(jnp.all(jnp.isfinite(logits)))
    print("KERNEL_OK")
</pallas_src>

<mosaic_0001>
module attributes {stable_mosaic.version = 11 : i64} {
  func.func @conv3x3_bias_relu_kernel(%arg0: i32, %arg1: memref<1x18x18x128xbf16, #tpu.memory_space<vmem>>, %arg2: memref<9x128x128xbf16, #tpu.memory_space<vmem>>, %arg3: memref<1x128xf32, #tpu.memory_space<vmem>>, %arg4: memref<1x16x16x128xbf16, #tpu.memory_space<vmem>>, %arg5: memref<256x128xf32, #tpu.memory_space<vmem>>) attributes {dimension_semantics = [#tpu.dimension_semantics<parallel>], iteration_bounds = array<i64: 2>, scalar_prefetch = 0 : i64, scratch_operands = 1 : i64, tpu.core_type = #tpu.core_type<tc>, window_params = [{transform_indices = @transform_0, window_bounds = array<i64: 1, 18, 18, 128>}, {pipeline_mode = #tpu.pipeline_mode<synchronous>, transform_indices = @transform_1, window_bounds = array<i64: 9, 128, 128>}, {pipeline_mode = #tpu.pipeline_mode<synchronous>, transform_indices = @transform_2, window_bounds = array<i64: 1, 128>}, {transform_indices = @transform_3, window_bounds = array<i64: 1, 16, 16, 128>}]} {
    %cst = arith.constant 0.000000e+00 : f32
    %0 = vector.broadcast %cst : f32 to vector<256x128xf32>
    %c0 = arith.constant 0 : index
    %c0_0 = arith.constant 0 : index
    %1 = vector.load %arg5[%c0, %c0_0] : memref<256x128xf32, #tpu.memory_space<vmem>>, vector<256x128xf32>
    tpu.vector_store %arg5[%c0, %c0_0], %0 {strides = array<i32>} : memref<256x128xf32, #tpu.memory_space<vmem>>, vector<256x128xf32>,
    %c0_1 = arith.constant 0 : index
    %c0_2 = arith.constant 0 : index
    %c0_3 = arith.constant 0 : index
    %c0_4 = arith.constant 0 : index
    %2 = vector.load %arg1[%c0_1, %c0_2, %c0_3, %c0_4] : memref<1x18x18x128xbf16, #tpu.memory_space<vmem>>, vector<1x18x18x128xbf16>
    %3 = vector.shape_cast %2 : vector<1x18x18x128xbf16> to vector<18x18x128xbf16>
    %4 = arith.extf %3 : vector<18x18x128xbf16> to vector<18x18x128xf32>
    %5 = vector.extract_strided_slice %4 {offsets = [0, 0, 0], sizes = [16, 16, 128], strides = [1, 1, 1]} : vector<18x18x128xf32> to vector<16x16x128xf32>
    %6 = vector.shape_cast %5 : vector<16x16x128xf32> to vector<256x128xf32>
    %7 = arith.truncf %6 : vector<256x128xf32> to vector<256x128xbf16>
    %c0_5 = arith.constant 0 : index
    %c0_6 = arith.constant 0 : index
    %8 = vector.load %arg5[%c0_5, %c0_6] : memref<256x128xf32, #tpu.memory_space<vmem>>, vector<256x128xf32>
    %c0_7 = arith.constant 0 : index
    %c0_8 = arith.constant 0 : index
    %c0_9 = arith.constant 0 : index
    %9 = vector.load %arg2[%c0_7, %c0_8, %c0_9] : memref<9x128x128xbf16, #tpu.memory_space<vmem>>, vector<1x128x128xbf16>
    %10 = vector.shape_cast %9 : vector<1x128x128xbf16> to vector<128x128xbf16>
    %cst_10 = arith.constant dense<0.000000e+00> : vector<256x128xf32>
    %11 = tpu.matmul %7, %10, %cst_10 {dimension_numbers = #tpu.dot_dimension_numbers<[1], [0], [0], [1], [0, 0, 1, 1], [], []>} : vector<256x128xbf16>, vector<128x128xbf16>, vector<256x128xf32> -> vector<256x128xf32>
    %12 = arith.addf %8, %11 : vector<256x128xf32>
    %c0_11 = arith.constant 0 : index
    %c0_12 = arith.constant 0 : index
    %13 = vector.load %arg5[%c0_11, %c0_12] : memref<256x128xf32, #tpu.memory_space<vmem>>, vector<256x128xf32>
    tpu.vector_store %arg5[%c0_11, %c0_12], %12 {strides = array<i32>} : memref<256x128xf32, #tpu.memory_space<vmem>>, vector<256x128xf32>,
    %14 = vector.extract_strided_slice %4 {offsets = [0, 1, 0], sizes = [16, 16, 128], strides = [1, 1, 1]} : vector<18x18x128xf32> to vector<16x16x128xf32>
    %15 = vector.shape_cast %14 : vector<16x16x128xf32> to vector<256x128xf32>
    %16 = arith.truncf %15 : vector<256x128xf32> to vector<256x128xbf16>
    %c0_13 = arith.constant 0 : index
    %c0_14 = arith.constant 0 : index
    %17 = vector.load %arg5[%c0_13, %c0_14] : memref<256x128xf32, #tpu.memory_space<vmem>>, vector<256x128xf32>
    %c1 = arith.constant 1 : index
    %c0_15 = arith.constant 0 : index
    %c0_16 = arith.constant 0 : index
    %18 = vector.load %arg2[%c1, %c0_15, %c0_16] : memref<9x128x128xbf16, #tpu.memory_space<vmem>>, vector<1x128x128xbf16>
    %19 = vector.shape_cast %18 : vector<1x128x128xbf16> to vector<128x128xbf16>
    %cst_17 = arith.constant dense<0.000000e+00> : vector<256x128xf32>
    %20 = tpu.matmul %16, %19, %cst_17 {dimension_numbers = #tpu.dot_dimension_numbers<[1], [0], [0], [1], [0, 0, 1, 1], [], []>} : vector<256x128xbf16>, vector<128x128xbf16>, vector<256x128xf32> -> vector<256x128xf32>
    %21 = arith.addf %17, %20 : vector<256x128xf32>
    %c0_18 = arith.constant 0 : index
    %c0_19 = arith.constant 0 : index
    %22 = vector.load %arg5[%c0_18, %c0_19] : memref<256x128xf32, #tpu.memory_space<vmem>>, vector<256x128xf32>
    tpu.vector_store %arg5[%c0_18, %c0_19], %21 {strides = array<i32>} : memref<256x128xf32, #tpu.memory_space<vmem>>, vector<256x128xf32>,
    %23 = vector.extract_strided_slice %4 {offsets = [0, 2, 0], sizes = [16, 16, 128], strides = [1, 1, 1]} : vector<18x18x128xf32> to vector<16x16x128xf32>
    %24 = vector.shape_cast %23 : vector<16x16x128xf32> to vector<256x128xf32>
    %25 = arith.truncf %24 : vector<256x128xf32> to vector<256x128xbf16>
    %c0_20 = arith.constant 0 : index
    %c0_21 = arith.constant 0 : index
    %26 = vector.load %arg5[%c0_20, %c0_21] : memref<256x128xf32, #tpu.memory_space<vmem>>, vector<256x128xf32>
    %c2 = arith.constant 2 : index
    %c0_22 = arith.constant 0 : index
    %c0_23 = arith.constant 0 : index
    %27 = vector.load %arg2[%c2, %c0_22, %c0_23] : memref<9x128x128xbf16, #tpu.memory_space<vmem>>, vector<1x128x128xbf16>
    %28 = vector.shape_cast %27 : vector<1x128x128xbf16> to vector<128x128xbf16>
    %cst_24 = arith.constant dense<0.000000e+00> : vector<256x128xf32>
    %29 = tpu.matmul %25, %28, %cst_24 {dimension_numbers = #tpu.dot_dimension_numbers<[1], [0], [0], [1], [0, 0, 1, 1], [], []>} : vector<256x128xbf16>, vector<128x128xbf16>, vector<256x128xf32> -> vector<256x128xf32>
    %30 = arith.addf %26, %29 : vector<256x128xf32>
    %c0_25 = arith.constant 0 : index
    %c0_26 = arith.constant 0 : index
    %31 = vector.load %arg5[%c0_25, %c0_26] : memref<256x128xf32, #tpu.memory_space<vmem>>, vector<256x128xf32>
    tpu.vector_store %arg5[%c0_25, %c0_26], %30 {strides = array<i32>} : memref<256x128xf32, #tpu.memory_space<vmem>>, vector<256x128xf32>,
    %32 = vector.extract_strided_slice %4 {offsets = [1, 0, 0], sizes = [16, 16, 128], strides = [1, 1, 1]} : vector<18x18x128xf32> to vector<16x16x128xf32>
    %33 = vector.shape_cast %32 : vector<16x16x128xf32> to vector<256x128xf32>
    %34 = arith.truncf %33 : vector<256x128xf32> to vector<256x128xbf16>
    %c0_27 = arith.constant 0 : index
    %c0_28 = arith.constant 0 : index
    %35 = vector.load %arg5[%c0_27, %c0_28] : memref<256x128xf32, #tpu.memory_space<vmem>>, vector<256x128xf32>
    %c3 = arith.constant 3 : index
    %c0_29 = arith.constant 0 : index
    %c0_30 = arith.constant 0 : index
    %36 = vector.load %arg2[%c3, %c0_29, %c0_30] : memref<9x128x128xbf16, #tpu.memory_space<vmem>>, vector<1x128x128xbf16>
    %37 = vector.shape_cast %36 : vector<1x128x128xbf16> to vector<128x128xbf16>
    %cst_31 = arith.constant dense<0.000000e+00> : vector<256x128xf32>
    %38 = tpu.matmul %34, %37, %cst_31 {dimension_numbers = #tpu.dot_dimension_numbers<[1], [0], [0], [1], [0, 0, 1, 1], [], []>} : vector<256x128xbf16>, vector<128x128xbf16>, vector<256x128xf32> -> vector<256x128xf32>
    %39 = arith.addf %35, %38 : vector<256x128xf32>
    %c0_32 = arith.constant 0 : index
    %c0_33 = arith.constant 0 : index
    %40 = vector.load %arg5[%c0_32, %c0_33] : memref<256x128xf32, #tpu.memory_space<vmem>>, vector<256x128xf32>
    tpu.vector_store %arg5[%c0_32, %c0_33], %39 {strides = array<i32>} : memref<256x128xf32, #tpu.memory_space<vmem>>, vector<256x128xf32>,
    %41 = vector.extract_strided_slice %4 {offsets = [1, 1, 0], sizes = [16, 16, 128], strides = [1, 1, 1]} : vector<18x18x128xf32> to vector<16x16x128xf32>
    %42 = vector.shape_cast %41 : vector<16x16x128xf32> to vector<256x128xf32>
    %43 = arith.truncf %42 : vector<256x128xf32> to vector<256x128xbf16>
    %c0_34 = arith.constant 0 : index
    %c0_35 = arith.constant 0 : index
    %44 = vector.load %arg5[%c0_34, %c0_35] : memref<256x128xf32, #tpu.memory_space<vmem>>, vector<256x128xf32>
    %c4 = arith.constant 4 : index
    %c0_36 = arith.constant 0 : index
    %c0_37 = arith.constant 0 : index
    %45 = vector.load %arg2[%c4, %c0_36, %c0_37] : memref<9x128x128xbf16, #tpu.memory_space<vmem>>, vector<1x128x128xbf16>
    %46 = vector.shape_cast %45 : vector<1x128x128xbf16> to vector<128x128xbf16>
    %cst_38 = arith.constant dense<0.000000e+00> : vector<256x128xf32>
    %47 = tpu.matmul %43, %46, %cst_38 {dimension_numbers = #tpu.dot_dimension_numbers<[1], [0], [0], [1], [0, 0, 1, 1], [], []>} : vector<256x128xbf16>, vector<128x128xbf16>, vector<256x128xf32> -> vector<256x128xf32>
    %48 = arith.addf %44, %47 : vector<256x128xf32>
    %c0_39 = arith.constant 0 : index
    %c0_40 = arith.constant 0 : index
    %49 = vector.load %arg5[%c0_39, %c0_40] : memref<256x128xf32, #tpu.memory_space<vmem>>, vector<256x128xf32>
    tpu.vector_store %arg5[%c0_39, %c0_40], %48 {strides = array<i32>} : memref<256x128xf32, #tpu.memory_space<vmem>>, vector<256x128xf32>,
    %50 = vector.extract_strided_slice %4 {offsets = [1, 2, 0], sizes = [16, 16, 128], strides = [1, 1, 1]} : vector<18x18x128xf32> to vector<16x16x128xf32>
    %51 = vector.shape_cast %50 : vector<16x16x128xf32> to vector<256x128xf32>
    %52 = arith.truncf %51 : vector<256x128xf32> to vector<256x128xbf16>
    %c0_41 = arith.constant 0 : index
    %c0_42 = arith.constant 0 : index
    %53 = vector.load %arg5[%c0_41, %c0_42] : memref<256x128xf32, #tpu.memory_space<vmem>>, vector<256x128xf32>
    %c5 = arith.constant 5 : index
    %c0_43 = arith.constant 0 : index
    %c0_44 = arith.constant 0 : index
    %54 = vector.load %arg2[%c5, %c0_43, %c0_44] : memref<9x128x128xbf16, #tpu.memory_space<vmem>>, vector<1x128x128xbf16>
    %55 = vector.shape_cast %54 : vector<1x128x128xbf16> to vector<128x128xbf16>
    %cst_45 = arith.constant dense<0.000000e+00> : vector<256x128xf32>
    %56 = tpu.matmul %52, %55, %cst_45 {dimension_numbers = #tpu.dot_dimension_numbers<[1], [0], [0], [1], [0, 0, 1, 1], [], []>} : vector<256x128xbf16>, vector<128x128xbf16>, vector<256x128xf32> -> vector<256x128xf32>
    %57 = arith.addf %53, %56 : vector<256x128xf32>
    %c0_46 = arith.constant 0 : index
    %c0_47 = arith.constant 0 : index
    %58 = vector.load %arg5[%c0_46, %c0_47] : memref<256x128xf32, #tpu.memory_space<vmem>>, vector<256x128xf32>
    tpu.vector_store %arg5[%c0_46, %c0_47], %57 {strides = array<i32>} : memref<256x128xf32, #tpu.memory_space<vmem>>, vector<256x128xf32>,
    %59 = vector.extract_strided_slice %4 {offsets = [2, 0, 0], sizes = [16, 16, 128], strides = [1, 1, 1]} : vector<18x18x128xf32> to vector<16x16x128xf32>
    %60 = vector.shape_cast %59 : vector<16x16x128xf32> to vector<256x128xf32>
    %61 = arith.truncf %60 : vector<256x128xf32> to vector<256x128xbf16>
    %c0_48 = arith.constant 0 : index
    %c0_49 = arith.constant 0 : index
    %62 = vector.load %arg5[%c0_48, %c0_49] : memref<256x128xf32, #tpu.memory_space<vmem>>, vector<256x128xf32>
    %c6 = arith.constant 6 : index
    %c0_50 = arith.constant 0 : index
    %c0_51 = arith.constant 0 : index
    %63 = vector.load %arg2[%c6, %c0_50, %c0_51] : memref<9x128x128xbf16, #tpu.memory_space<vmem>>, vector<1x128x128xbf16>
    %64 = vector.shape_cast %63 : vector<1x128x128xbf16> to vector<128x128xbf16>
    %cst_52 = arith.constant dense<0.000000e+00> : vector<256x128xf32>
    %65 = tpu.matmul %61, %64, %cst_52 {dimension_numbers = #tpu.dot_dimension_numbers<[1], [0], [0], [1], [0, 0, 1, 1], [], []>} : vector<256x128xbf16>, vector<128x128xbf16>, vector<256x128xf32> -> vector<256x128xf32>
    %66 = arith.addf %62, %65 : vector<256x128xf32>
    %c0_53 = arith.constant 0 : index
    %c0_54 = arith.constant 0 : index
    %67 = vector.load %arg5[%c0_53, %c0_54] : memref<256x128xf32, #tpu.memory_space<vmem>>, vector<256x128xf32>
    tpu.vector_store %arg5[%c0_53, %c0_54], %66 {strides = array<i32>} : memref<256x128xf32, #tpu.memory_space<vmem>>, vector<256x128xf32>,
    %68 = vector.extract_strided_slice %4 {offsets = [2, 1, 0], sizes = [16, 16, 128], strides = [1, 1, 1]} : vector<18x18x128xf32> to vector<16x16x128xf32>
    %69 = vector.shape_cast %68 : vector<16x16x128xf32> to vector<256x128xf32>
    %70 = arith.truncf %69 : vector<256x128xf32> to vector<256x128xbf16>
    %c0_55 = arith.constant 0 : index
    %c0_56 = arith.constant 0 : index
    %71 = vector.load %arg5[%c0_55, %c0_56] : memref<256x128xf32, #tpu.memory_space<vmem>>, vector<256x128xf32>
    %c7 = arith.constant 7 : index
    %c0_57 = arith.constant 0 : index
    %c0_58 = arith.constant 0 : index
    %72 = vector.load %arg2[%c7, %c0_57, %c0_58] : memref<9x128x128xbf16, #tpu.memory_space<vmem>>, vector<1x128x128xbf16>
    %73 = vector.shape_cast %72 : vector<1x128x128xbf16> to vector<128x128xbf16>
    %cst_59 = arith.constant dense<0.000000e+00> : vector<256x128xf32>
    %74 = tpu.matmul %70, %73, %cst_59 {dimension_numbers = #tpu.dot_dimension_numbers<[1], [0], [0], [1], [0, 0, 1, 1], [], []>} : vector<256x128xbf16>, vector<128x128xbf16>, vector<256x128xf32> -> vector<256x128xf32>
    %75 = arith.addf %71, %74 : vector<256x128xf32>
    %c0_60 = arith.constant 0 : index
    %c0_61 = arith.constant 0 : index
    %76 = vector.load %arg5[%c0_60, %c0_61] : memref<256x128xf32, #tpu.memory_space<vmem>>, vector<256x128xf32>
    tpu.vector_store %arg5[%c0_60, %c0_61], %75 {strides = array<i32>} : memref<256x128xf32, #tpu.memory_space<vmem>>, vector<256x128xf32>,
    %77 = vector.extract_strided_slice %4 {offsets = [2, 2, 0], sizes = [16, 16, 128], strides = [1, 1, 1]} : vector<18x18x128xf32> to vector<16x16x128xf32>
    %78 = vector.shape_cast %77 : vector<16x16x128xf32> to vector<256x128xf32>
    %79 = arith.truncf %78 : vector<256x128xf32> to vector<256x128xbf16>
    %c0_62 = arith.constant 0 : index
    %c0_63 = arith.constant 0 : index
    %80 = vector.load %arg5[%c0_62, %c0_63] : memref<256x128xf32, #tpu.memory_space<vmem>>, vector<256x128xf32>
    %c8 = arith.constant 8 : index
    %c0_64 = arith.constant 0 : index
    %c0_65 = arith.constant 0 : index
    %81 = vector.load %arg2[%c8, %c0_64, %c0_65] : memref<9x128x128xbf16, #tpu.memory_space<vmem>>, vector<1x128x128xbf16>
    %82 = vector.shape_cast %81 : vector<1x128x128xbf16> to vector<128x128xbf16>
    %cst_66 = arith.constant dense<0.000000e+00> : vector<256x128xf32>
    %83 = tpu.matmul %79, %82, %cst_66 {dimension_numbers = #tpu.dot_dimension_numbers<[1], [0], [0], [1], [0, 0, 1, 1], [], []>} : vector<256x128xbf16>, vector<128x128xbf16>, vector<256x128xf32> -> vector<256x128xf32>
    %84 = arith.addf %80, %83 : vector<256x128xf32>
    %c0_67 = arith.constant 0 : index
    %c0_68 = arith.constant 0 : index
    %85 = vector.load %arg5[%c0_67, %c0_68] : memref<256x128xf32, #tpu.memory_space<vmem>>, vector<256x128xf32>
    tpu.vector_store %arg5[%c0_67, %c0_68], %84 {strides = array<i32>} : memref<256x128xf32, #tpu.memory_space<vmem>>, vector<256x128xf32>,
    %c0_69 = arith.constant 0 : index
    %c0_70 = arith.constant 0 : index
    %86 = vector.load %arg5[%c0_69, %c0_70] : memref<256x128xf32, #tpu.memory_space<vmem>>, vector<256x128xf32>
    %c0_71 = arith.constant 0 : index
    %c0_72 = arith.constant 0 : index
    %87 = vector.load %arg3[%c0_71, %c0_72] : memref<1x128xf32, #tpu.memory_space<vmem>>, vector<1x128xf32>
    %88 = vector.broadcast %87 : vector<1x128xf32> to vector<256x128xf32>
    %89 = arith.addf %86, %88 : vector<256x128xf32>
    %cst_73 = arith.constant 0.000000e+00 : f32
    %90 = vector.broadcast %cst_73 : f32 to vector<256x128xf32>
    %91 = arith.maximumf %89, %90 : vector<256x128xf32>
    %92 = vector.shape_cast %91 : vector<256x128xf32> to vector<1x16x16x128xf32>
    %93 = arith.truncf %92 : vector<1x16x16x128xf32> to vector<1x16x16x128xbf16>
    %c0_74 = arith.constant 0 : index
    %c0_75 = arith.constant 0 : index
    %c0_76 = arith.constant 0 : index
    %c0_77 = arith.constant 0 : index
    %94 = vector.load %arg4[%c0_74, %c0_75, %c0_76, %c0_77] : memref<1x16x16x128xbf16, #tpu.memory_space<vmem>>, vector<1x16x16x128xbf16>
    tpu.vector_store %arg4[%c0_74, %c0_75, %c0_76, %c0_77], %93 {strides = array<i32>} : memref<1x16x16x128xbf16, #tpu.memory_space<vmem>>, vector<1x16x16x128xbf16>,
    return
  }
  func.func @transform_0(%arg0: i32) -> (i32, i32, i32, i32) {
    %c0_i32 = arith.constant 0 : i32
    %c0_i32_0 = arith.constant 0 : i32
    %c0_i32_1 = arith.constant 0 : i32
    %c0_i32_2 = arith.constant 0 : i32
    return %arg0, %c0_i32, %c0_i32_0, %c0_i32_1 : i32, i32, i32, i32
  }
  func.func @transform_1(%arg0: i32) -> (i32, i32, i32) {
    %c0_i32 = arith.constant 0 : i32
    %c0_i32_0 = arith.constant 0 : i32
    %c0_i32_1 = arith.constant 0 : i32
    %c0_i32_2 = arith.constant 0 : i32
    return %c0_i32, %c0_i32_0, %c0_i32_1 : i32, i32, i32
  }
  func.func @transform_2(%arg0: i32) -> (i32, i32) {
    %c0_i32 = arith.constant 0 : i32
    %c0_i32_0 = arith.constant 0 : i32
    %c0_i32_1 = arith.constant 0 : i32
    return %c0_i32, %c0_i32_0 : i32, i32
  }
  func.func @transform_3(%arg0: i32) -> (i32, i32, i32, i32) {
    %c0_i32 = arith.constant 0 : i32
    %c0_i32_0 = arith.constant 0 : i32
    %c0_i32_1 = arith.constant 0 : i32
    %c0_i32_2 = arith.constant 0 : i32
    return %arg0, %c0_i32, %c0_i32_0, %c0_i32_1 : i32, i32, i32, i32
  }
}

module attributes {stable_mosaic.version = 11 : i64} {
  func.func @conv_res_gap_mlp_kernel(%arg0: i32, %arg1: memref<1x18x18x128xbf16, #tpu.memory_space<vmem>>, %arg2: memref<1x16x16x128xbf16, #tpu.memory_space<vmem>>, %arg3: memref<9x128x128xbf16, #tpu.memory_space<vmem>>, %arg4: memref<1x128xf32, #tpu.memory_space<vmem>>, %arg5: memref<128x128xbf16, #tpu.memory_space<vmem>>, %arg6: memref<1x128xf32, #tpu.memory_space<vmem>>, %arg7: memref<128x128xbf16, #tpu.memory_space<vmem>>, %arg8: memref<1x128xf32, #tpu.memory_space<vmem>>, %arg9: memref<128x128xbf16, #tpu.memory_space<vmem>>, %arg10: memref<1x128xf32, #tpu.memory_space<vmem>>, %arg11: memref<128x128xbf16, #tpu.memory_space<vmem>>, %arg12: memref<1x128xf32, #tpu.memory_space<vmem>>, %arg13: memref<1x1x128xf32, #tpu.memory_space<vmem>>, %arg14: memref<256x128xf32, #tpu.memory_space<vmem>>) attributes {dimension_semantics = [#tpu.dimension_semantics<parallel>], iteration_bounds = array<i64: 2>, scalar_prefetch = 0 : i64, scratch_operands = 1 : i64, tpu.core_type = #tpu.core_type<tc>, window_params = [{transform_indices = @transform_0, window_bounds = array<i64: 1, 18, 18, 128>}, {transform_indices = @transform_1, window_bounds = array<i64: 1, 16, 16, 128>}, {pipeline_mode = #tpu.pipeline_mode<synchronous>, transform_indices = @transform_2, window_bounds = array<i64: 9, 128, 128>}, {pipeline_mode = #tpu.pipeline_mode<synchronous>, transform_indices = @transform_3, window_bounds = array<i64: 1, 128>}, {pipeline_mode = #tpu.pipeline_mode<synchronous>, transform_indices = @transform_4, window_bounds = array<i64: 128, 128>}, {pipeline_mode = #tpu.pipeline_mode<synchronous>, transform_indices = @transform_5, window_bounds = array<i64: 1, 128>}, {pipeline_mode = #tpu.pipeline_mode<synchronous>, transform_indices = @transform_6, window_bounds = array<i64: 128, 128>}, {pipeline_mode = #tpu.pipeline_mode<synchronous>, transform_indices = @transform_7, window_bounds = array<i64: 1, 128>}, {pipeline_mode = #tpu.pipeline_mode<synchronous>, transform_indices = @transform_8, window_bounds = array<i64: 128, 128>}, {pipeline_mode = #tpu.pipeline_mode<synchronous>, transform_indices = @transform_9, window_bounds = array<i64: 1, 128>}, {pipeline_mode = #tpu.pipeline_mode<synchronous>, transform_indices = @transform_10, window_bounds = array<i64: 128, 128>}, {pipeline_mode = #tpu.pipeline_mode<synchronous>, transform_indices = @transform_11, window_bounds = array<i64: 1, 128>}, {transform_indices = @transform_12, window_bounds = array<i64: 1, 1, 128>}]} {
    %cst = arith.constant 0.000000e+00 : f32
    %0 = vector.broadcast %cst : f32 to vector<256x128xf32>
    %c0 = arith.constant 0 : index
    %c0_0 = arith.constant 0 : index
    %1 = vector.load %arg14[%c0, %c0_0] : memref<256x128xf32, #tpu.memory_space<vmem>>, vector<256x128xf32>
    tpu.vector_store %arg14[%c0, %c0_0], %0 {strides = array<i32>} : memref<256x128xf32, #tpu.memory_space<vmem>>, vector<256x128xf32>,
    %c0_1 = arith.constant 0 : index
    %c0_2 = arith.constant 0 : index
    %c0_3 = arith.constant 0 : index
    %c0_4 = arith.constant 0 : index
    %2 = vector.load %arg1[%c0_1, %c0_2, %c0_3, %c0_4] : memref<1x18x18x128xbf16, #tpu.memory_space<vmem>>, vector<1x18x18x128xbf16>
    %3 = vector.shape_cast %2 : vector<1x18x18x128xbf16> to vector<18x18x128xbf16>
    %4 = arith.extf %3 : vector<18x18x128xbf16> to vector<18x18x128xf32>
    %5 = vector.extract_strided_slice %4 {offsets = [0, 0, 0], sizes = [16, 16, 128], strides = [1, 1, 1]} : vector<18x18x128xf32> to vector<16x16x128xf32>
    %6 = vector.shape_cast %5 : vector<16x16x128xf32> to vector<256x128xf32>
    %7 = arith.truncf %6 : vector<256x128xf32> to vector<256x128xbf16>
    %c0_5 = arith.constant 0 : index
    %c0_6 = arith.constant 0 : index
    %8 = vector.load %arg14[%c0_5, %c0_6] : memref<256x128xf32, #tpu.memory_space<vmem>>, vector<256x128xf32>
    %c0_7 = arith.constant 0 : index
    %c0_8 = arith.constant 0 : index
    %c0_9 = arith.constant 0 : index
    %9 = vector.load %arg3[%c0_7, %c0_8, %c0_9] : memref<9x128x128xbf16, #tpu.memory_space<vmem>>, vector<1x128x128xbf16>
    %10 = vector.shape_cast %9 : vector<1x128x128xbf16> to vector<128x128xbf16>
    %cst_10 = arith.constant dense<0.000000e+00> : vector<256x128xf32>
    %11 = tpu.matmul %7, %10, %cst_10 {dimension_numbers = #tpu.dot_dimension_numbers<[1], [0], [0], [1], [0, 0, 1, 1], [], []>} : vector<256x128xbf16>, vector<128x128xbf16>, vector<256x128xf32> -> vector<256x128xf32>
    %12 = arith.addf %8, %11 : vector<256x128xf32>
    %c0_11 = arith.constant 0 : index
    %c0_12 = arith.constant 0 : index
    %13 = vector.load %arg14[%c0_11, %c0_12] : memref<256x128xf32, #tpu.memory_space<vmem>>, vector<256x128xf32>
    tpu.vector_store %arg14[%c0_11, %c0_12], %12 {strides = array<i32>} : memref<256x128xf32, #tpu.memory_space<vmem>>, vector<256x128xf32>,
    %14 = vector.extract_strided_slice %4 {offsets = [0, 1, 0], sizes = [16, 16, 128], strides = [1, 1, 1]} : vector<18x18x128xf32> to vector<16x16x128xf32>
    %15 = vector.shape_cast %14 : vector<16x16x128xf32> to vector<256x128xf32>
    %16 = arith.truncf %15 : vector<256x128xf32> to vector<256x128xbf16>
    %c0_13 = arith.constant 0 : index
    %c0_14 = arith.constant 0 : index
    %17 = vector.load %arg14[%c0_13, %c0_14] : memref<256x128xf32, #tpu.memory_space<vmem>>, vector<256x128xf32>
    %c1 = arith.constant 1 : index
    %c0_15 = arith.constant 0 : index
    %c0_16 = arith.constant 0 : index
    %18 = vector.load %arg3[%c1, %c0_15, %c0_16] : memref<9x128x128xbf16, #tpu.memory_space<vmem>>, vector<1x128x128xbf16>
    %19 = vector.shape_cast %18 : vector<1x128x128xbf16> to vector<128x128xbf16>
    %cst_17 = arith.constant dense<0.000000e+00> : vector<256x128xf32>
    %20 = tpu.matmul %16, %19, %cst_17 {dimension_numbers = #tpu.dot_dimension_numbers<[1], [0], [0], [1], [0, 0, 1, 1], [], []>} : vector<256x128xbf16>, vector<128x128xbf16>, vector<256x128xf32> -> vector<256x128xf32>
    %21 = arith.addf %17, %20 : vector<256x128xf32>
    %c0_18 = arith.constant 0 : index
    %c0_19 = arith.constant 0 : index
    %22 = vector.load %arg14[%c0_18, %c0_19] : memref<256x128xf32, #tpu.memory_space<vmem>>, vector<256x128xf32>
    tpu.vector_store %arg14[%c0_18, %c0_19], %21 {strides = array<i32>} : memref<256x128xf32, #tpu.memory_space<vmem>>, vector<256x128xf32>,
    %23 = vector.extract_strided_slice %4 {offsets = [0, 2, 0], sizes = [16, 16, 128], strides = [1, 1, 1]} : vector<18x18x128xf32> to vector<16x16x128xf32>
    %24 = vector.shape_cast %23 : vector<16x16x128xf32> to vector<256x128xf32>
    %25 = arith.truncf %24 : vector<256x128xf32> to vector<256x128xbf16>
    %c0_20 = arith.constant 0 : index
    %c0_21 = arith.constant 0 : index
    %26 = vector.load %arg14[%c0_20, %c0_21] : memref<256x128xf32, #tpu.memory_space<vmem>>, vector<256x128xf32>
    %c2 = arith.constant 2 : index
    %c0_22 = arith.constant 0 : index
    %c0_23 = arith.constant 0 : index
    %27 = vector.load %arg3[%c2, %c0_22, %c0_23] : memref<9x128x128xbf16, #tpu.memory_space<vmem>>, vector<1x128x128xbf16>
    %28 = vector.shape_cast %27 : vector<1x128x128xbf16> to vector<128x128xbf16>
    %cst_24 = arith.constant dense<0.000000e+00> : vector<256x128xf32>
    %29 = tpu.matmul %25, %28, %cst_24 {dimension_numbers = #tpu.dot_dimension_numbers<[1], [0], [0], [1], [0, 0, 1, 1], [], []>} : vector<256x128xbf16>, vector<128x128xbf16>, vector<256x128xf32> -> vector<256x128xf32>
    %30 = arith.addf %26, %29 : vector<256x128xf32>
    %c0_25 = arith.constant 0 : index
    %c0_26 = arith.constant 0 : index
    %31 = vector.load %arg14[%c0_25, %c0_26] : memref<256x128xf32, #tpu.memory_space<vmem>>, vector<256x128xf32>
    tpu.vector_store %arg14[%c0_25, %c0_26], %30 {strides = array<i32>} : memref<256x128xf32, #tpu.memory_space<vmem>>, vector<256x128xf32>,
    %32 = vector.extract_strided_slice %4 {offsets = [1, 0, 0], sizes = [16, 16, 128], strides = [1, 1, 1]} : vector<18x18x128xf32> to vector<16x16x128xf32>
    %33 = vector.shape_cast %32 : vector<16x16x128xf32> to vector<256x128xf32>
    %34 = arith.truncf %33 : vector<256x128xf32> to vector<256x128xbf16>
    %c0_27 = arith.constant 0 : index
    %c0_28 = arith.constant 0 : index
    %35 = vector.load %arg14[%c0_27, %c0_28] : memref<256x128xf32, #tpu.memory_space<vmem>>, vector<256x128xf32>
    %c3 = arith.constant 3 : index
    %c0_29 = arith.constant 0 : index
    %c0_30 = arith.constant 0 : index
    %36 = vector.load %arg3[%c3, %c0_29, %c0_30] : memref<9x128x128xbf16, #tpu.memory_space<vmem>>, vector<1x128x128xbf16>
    %37 = vector.shape_cast %36 : vector<1x128x128xbf16> to vector<128x128xbf16>
    %cst_31 = arith.constant dense<0.000000e+00> : vector<256x128xf32>
    %38 = tpu.matmul %34, %37, %cst_31 {dimension_numbers = #tpu.dot_dimension_numbers<[1], [0], [0], [1], [0, 0, 1, 1], [], []>} : vector<256x128xbf16>, vector<128x128xbf16>, vector<256x128xf32> -> vector<256x128xf32>
    %39 = arith.addf %35, %38 : vector<256x128xf32>
    %c0_32 = arith.constant 0 : index
    %c0_33 = arith.constant 0 : index
    %40 = vector.load %arg14[%c0_32, %c0_33] : memref<256x128xf32, #tpu.memory_space<vmem>>, vector<256x128xf32>
    tpu.vector_store %arg14[%c0_32, %c0_33], %39 {strides = array<i32>} : memref<256x128xf32, #tpu.memory_space<vmem>>, vector<256x128xf32>,
    %41 = vector.extract_strided_slice %4 {offsets = [1, 1, 0], sizes = [16, 16, 128], strides = [1, 1, 1]} : vector<18x18x128xf32> to vector<16x16x128xf32>
    %42 = vector.shape_cast %41 : vector<16x16x128xf32> to vector<256x128xf32>
    %43 = arith.truncf %42 : vector<256x128xf32> to vector<256x128xbf16>
    %c0_34 = arith.constant 0 : index
    %c0_35 = arith.constant 0 : index
    %44 = vector.load %arg14[%c0_34, %c0_35] : memref<256x128xf32, #tpu.memory_space<vmem>>, vector<256x128xf32>
    %c4 = arith.constant 4 : index
    %c0_36 = arith.constant 0 : index
    %c0_37 = arith.constant 0 : index
    %45 = vector.load %arg3[%c4, %c0_36, %c0_37] : memref<9x128x128xbf16, #tpu.memory_space<vmem>>, vector<1x128x128xbf16>
    %46 = vector.shape_cast %45 : vector<1x128x128xbf16> to vector<128x128xbf16>
    %cst_38 = arith.constant dense<0.000000e+00> : vector<256x128xf32>
    %47 = tpu.matmul %43, %46, %cst_38 {dimension_numbers = #tpu.dot_dimension_numbers<[1], [0], [0], [1], [0, 0, 1, 1], [], []>} : vector<256x128xbf16>, vector<128x128xbf16>, vector<256x128xf32> -> vector<256x128xf32>
    %48 = arith.addf %44, %47 : vector<256x128xf32>
    %c0_39 = arith.constant 0 : index
    %c0_40 = arith.constant 0 : index
    %49 = vector.load %arg14[%c0_39, %c0_40] : memref<256x128xf32, #tpu.memory_space<vmem>>, vector<256x128xf32>
    tpu.vector_store %arg14[%c0_39, %c0_40], %48 {strides = array<i32>} : memref<256x128xf32, #tpu.memory_space<vmem>>, vector<256x128xf32>,
    %50 = vector.extract_strided_slice %4 {offsets = [1, 2, 0], sizes = [16, 16, 128], strides = [1, 1, 1]} : vector<18x18x128xf32> to vector<16x16x128xf32>
    %51 = vector.shape_cast %50 : vector<16x16x128xf32> to vector<256x128xf32>
    %52 = arith.truncf %51 : vector<256x128xf32> to vector<256x128xbf16>
    %c0_41 = arith.constant 0 : index
    %c0_42 = arith.constant 0 : index
    %53 = vector.load %arg14[%c0_41, %c0_42] : memref<256x128xf32, #tpu.memory_space<vmem>>, vector<256x128xf32>
    %c5 = arith.constant 5 : index
    %c0_43 = arith.constant 0 : index
    %c0_44 = arith.constant 0 : index
    %54 = vector.load %arg3[%c5, %c0_43, %c0_44] : memref<9x128x128xbf16, #tpu.memory_space<vmem>>, vector<1x128x128xbf16>
    %55 = vector.shape_cast %54 : vector<1x128x128xbf16> to vector<128x128xbf16>
    %cst_45 = arith.constant dense<0.000000e+00> : vector<256x128xf32>
    %56 = tpu.matmul %52, %55, %cst_45 {dimension_numbers = #tpu.dot_dimension_numbers<[1], [0], [0], [1], [0, 0, 1, 1], [], []>} : vector<256x128xbf16>, vector<128x128xbf16>, vector<256x128xf32> -> vector<256x128xf32>
    %57 = arith.addf %53, %56 : vector<256x128xf32>
    %c0_46 = arith.constant 0 : index
    %c0_47 = arith.constant 0 : index
    %58 = vector.load %arg14[%c0_46, %c0_47] : memref<256x128xf32, #tpu.memory_space<vmem>>, vector<256x128xf32>
    tpu.vector_store %arg14[%c0_46, %c0_47], %57 {strides = array<i32>} : memref<256x128xf32, #tpu.memory_space<vmem>>, vector<256x128xf32>,
    %59 = vector.extract_strided_slice %4 {offsets = [2, 0, 0], sizes = [16, 16, 128], strides = [1, 1, 1]} : vector<18x18x128xf32> to vector<16x16x128xf32>
    %60 = vector.shape_cast %59 : vector<16x16x128xf32> to vector<256x128xf32>
    %61 = arith.truncf %60 : vector<256x128xf32> to vector<256x128xbf16>
    %c0_48 = arith.constant 0 : index
    %c0_49 = arith.constant 0 : index
    %62 = vector.load %arg14[%c0_48, %c0_49] : memref<256x128xf32, #tpu.memory_space<vmem>>, vector<256x128xf32>
    %c6 = arith.constant 6 : index
    %c0_50 = arith.constant 0 : index
    %c0_51 = arith.constant 0 : index
    %63 = vector.load %arg3[%c6, %c0_50, %c0_51] : memref<9x128x128xbf16, #tpu.memory_space<vmem>>, vector<1x128x128xbf16>
    %64 = vector.shape_cast %63 : vector<1x128x128xbf16> to vector<128x128xbf16>
    %cst_52 = arith.constant dense<0.000000e+00> : vector<256x128xf32>
    %65 = tpu.matmul %61, %64, %cst_52 {dimension_numbers = #tpu.dot_dimension_numbers<[1], [0], [0], [1], [0, 0, 1, 1], [], []>} : vector<256x128xbf16>, vector<128x128xbf16>, vector<256x128xf32> -> vector<256x128xf32>
    %66 = arith.addf %62, %65 : vector<256x128xf32>
    %c0_53 = arith.constant 0 : index
    %c0_54 = arith.constant 0 : index
    %67 = vector.load %arg14[%c0_53, %c0_54] : memref<256x128xf32, #tpu.memory_space<vmem>>, vector<256x128xf32>
    tpu.vector_store %arg14[%c0_53, %c0_54], %66 {strides = array<i32>} : memref<256x128xf32, #tpu.memory_space<vmem>>, vector<256x128xf32>,
    %68 = vector.extract_strided_slice %4 {offsets = [2, 1, 0], sizes = [16, 16, 128], strides = [1, 1, 1]} : vector<18x18x128xf32> to vector<16x16x128xf32>
    %69 = vector.shape_cast %68 : vector<16x16x128xf32> to vector<256x128xf32>
    %70 = arith.truncf %69 : vector<256x128xf32> to vector<256x128xbf16>
    %c0_55 = arith.constant 0 : index
    %c0_56 = arith.constant 0 : index
    %71 = vector.load %arg14[%c0_55, %c0_56] : memref<256x128xf32, #tpu.memory_space<vmem>>, vector<256x128xf32>
    %c7 = arith.constant 7 : index
    %c0_57 = arith.constant 0 : index
    %c0_58 = arith.constant 0 : index
    %72 = vector.load %arg3[%c7, %c0_57, %c0_58] : memref<9x128x128xbf16, #tpu.memory_space<vmem>>, vector<1x128x128xbf16>
    %73 = vector.shape_cast %72 : vector<1x128x128xbf16> to vector<128x128xbf16>
    %cst_59 = arith.constant dense<0.000000e+00> : vector<256x128xf32>
    %74 = tpu.matmul %70, %73, %cst_59 {dimension_numbers = #tpu.dot_dimension_numbers<[1], [0], [0], [1], [0, 0, 1, 1], [], []>} : vector<256x128xbf16>, vector<128x128xbf16>, vector<256x128xf32> -> vector<256x128xf32>
    %75 = arith.addf %71, %74 : vector<256x128xf32>
    %c0_60 = arith.constant 0 : index
    %c0_61 = arith.constant 0 : index
    %76 = vector.load %arg14[%c0_60, %c0_61] : memref<256x128xf32, #tpu.memory_space<vmem>>, vector<256x128xf32>
    tpu.vector_store %arg14[%c0_60, %c0_61], %75 {strides = array<i32>} : memref<256x128xf32, #tpu.memory_space<vmem>>, vector<256x128xf32>,
    %77 = vector.extract_strided_slice %4 {offsets = [2, 2, 0], sizes = [16, 16, 128], strides = [1, 1, 1]} : vector<18x18x128xf32> to vector<16x16x128xf32>
    %78 = vector.shape_cast %77 : vector<16x16x128xf32> to vector<256x128xf32>
    %79 = arith.truncf %78 : vector<256x128xf32> to vector<256x128xbf16>
    %c0_62 = arith.constant 0 : index
    %c0_63 = arith.constant 0 : index
    %80 = vector.load %arg14[%c0_62, %c0_63] : memref<256x128xf32, #tpu.memory_space<vmem>>, vector<256x128xf32>
    %c8 = arith.constant 8 : index
    %c0_64 = arith.constant 0 : index
    %c0_65 = arith.constant 0 : index
    %81 = vector.load %arg3[%c8, %c0_64, %c0_65] : memref<9x128x128xbf16, #tpu.memory_space<vmem>>, vector<1x128x128xbf16>
    %82 = vector.shape_cast %81 : vector<1x128x128xbf16> to vector<128x128xbf16>
    %cst_66 = arith.constant dense<0.000000e+00> : vector<256x128xf32>
    %83 = tpu.matmul %79, %82, %cst_66 {dimension_numbers = #tpu.dot_dimension_numbers<[1], [0], [0], [1], [0, 0, 1, 1], [], []>} : vector<256x128xbf16>, vector<128x128xbf16>, vector<256x128xf32> -> vector<256x128xf32>
    %84 = arith.addf %80, %83 : vector<256x128xf32>
    %c0_67 = arith.constant 0 : index
    %c0_68 = arith.constant 0 : index
    %85 = vector.load %arg14[%c0_67, %c0_68] : memref<256x128xf32, #tpu.memory_space<vmem>>, vector<256x128xf32>
    tpu.vector_store %arg14[%c0_67, %c0_68], %84 {strides = array<i32>} : memref<256x128xf32, #tpu.memory_space<vmem>>, vector<256x128xf32>,
    %c0_69 = arith.constant 0 : index
    %c0_70 = arith.constant 0 : index
    %c0_71 = arith.constant 0 : index
    %c0_72 = arith.constant 0 : index
    %86 = vector.load %arg2[%c0_69, %c0_70, %c0_71, %c0_72] : memref<1x16x16x128xbf16, #tpu.memory_space<vmem>>, vector<1x16x16x128xbf16>
    %87 = vector.shape_cast %86 : vector<1x16x16x128xbf16> to vector<16x16x128xbf16>
    %88 = vector.shape_cast %87 : vector<16x16x128xbf16> to vector<256x128xbf16>
    %89 = arith.extf %88 : vector<256x128xbf16> to vector<256x128xf32>
    %c0_73 = arith.constant 0 : index
    %c0_74 = arith.constant 0 : index
    %90 = vector.load %arg14[%c0_73, %c0_74] : memref<256x128xf32, #tpu.memory_space<vmem>>, vector<256x128xf32>
    %c0_75 = arith.constant 0 : index
    %c0_76 = arith.constant 0 : index
    %91 = vector.load %arg4[%c0_75, %c0_76] : memref<1x128xf32, #tpu.memory_space<vmem>>, vector<1x128xf32>
    %92 = vector.broadcast %91 : vector<1x128xf32> to vector<256x128xf32>
    %93 = arith.addf %90, %92 : vector<256x128xf32>
    %94 = arith.addf %93, %89 : vector<256x128xf32>
    %cst_77 = arith.constant 0.000000e+00 : f32
    %95 = vector.broadcast %cst_77 : f32 to vector<256x128xf32>
    %96 = arith.maximumf %94, %95 : vector<256x128xf32>
    %cst_78 = arith.constant dense<0.000000e+00> : vector<128xf32>
    %97 = vector.multi_reduction <add>, %96, %cst_78 [0] : vector<256x128xf32> to vector<128xf32>
    %98 = vector.shape_cast %97 : vector<128xf32> to vector<1x128xf32>
    %cst_79 = arith.constant 2.560000e+02 : f32
    %99 = vector.broadcast %cst_79 : f32 to vector<1x128xf32>
    %100 = arith.divf %98, %99 : vector<1x128xf32>
    %101 = vector.shape_cast %100 : vector<1x128xf32> to vector<1x128xf32>
    %102 = vector.broadcast %101 : vector<1x128xf32> to vector<8x128xf32>
    %103 = arith.truncf %102 : vector<8x128xf32> to vector<8x128xbf16>
    %c0_80 = arith.constant 0 : index
    %c0_81 = arith.constant 0 : index
    %104 = vector.load %arg5[%c0_80, %c0_81] : memref<128x128xbf16, #tpu.memory_space<vmem>>, vector<128x128xbf16>
    %cst_82 = arith.constant dense<0.000000e+00> : vector<8x128xf32>
    %105 = tpu.matmul %103, %104, %cst_82 {dimension_numbers = #tpu.dot_dimension_numbers<[1], [0], [0], [1], [0, 0, 1, 1], [], []>} : vector<8x128xbf16>, vector<128x128xbf16>, vector<8x128xf32> -> vector<8x128xf32>
    %c0_83 = arith.constant 0 : index
    %c0_84 = arith.constant 0 : index
    %106 = vector.load %arg6[%c0_83, %c0_84] : memref<1x128xf32, #tpu.memory_space<vmem>>, vector<1x128xf32>
    %107 = vector.broadcast %106 : vector<1x128xf32> to vector<8x128xf32>
    %108 = arith.addf %105, %107 : vector<8x128xf32>
    %cst_85 = arith.constant 0.000000e+00 : f32
    %109 = vector.broadcast %cst_85 : f32 to vector<8x128xf32>
    %110 = arith.maximumf %108, %109 : vector<8x128xf32>
    %111 = arith.truncf %110 : vector<8x128xf32> to vector<8x128xbf16>
    %c0_86 = arith.constant 0 : index
    %c0_87 = arith.constant 0 : index
    %112 = vector.load %arg7[%c0_86, %c0_87] : memref<128x128xbf16, #tpu.memory_space<vmem>>, vector<128x128xbf16>
    %cst_88 = arith.constant dense<0.000000e+00> : vector<8x128xf32>
    %113 = tpu.matmul %111, %112, %cst_88 {dimension_numbers = #tpu.dot_dimension_numbers<[1], [0], [0], [1], [0, 0, 1, 1], [], []>} : vector<8x128xbf16>, vector<128x128xbf16>, vector<8x128xf32> -> vector<8x128xf32>
    %c0_89 = arith.constant 0 : index
    %c0_90 = arith.constant 0 : index
    %114 = vector.load %arg8[%c0_89, %c0_90] : memref<1x128xf32, #tpu.memory_space<vmem>>, vector<1x128xf32>
    %115 = vector.broadcast %114 : vector<1x128xf32> to vector<8x128xf32>
    %116 = arith.addf %113, %115 : vector<8x128xf32>
    %cst_91 = arith.constant 0.000000e+00 : f32
    %117 = vector.broadcast %cst_91 : f32 to vector<8x128xf32>
    %118 = arith.maximumf %116, %117 : vector<8x128xf32>
    %119 = arith.truncf %118 : vector<8x128xf32> to vector<8x128xbf16>
    %c0_92 = arith.constant 0 : index
    %c0_93 = arith.constant 0 : index
    %120 = vector.load %arg9[%c0_92, %c0_93] : memref<128x128xbf16, #tpu.memory_space<vmem>>, vector<128x128xbf16>
    %cst_94 = arith.constant dense<0.000000e+00> : vector<8x128xf32>
    %121 = tpu.matmul %119, %120, %cst_94 {dimension_numbers = #tpu.dot_dimension_numbers<[1], [0], [0], [1], [0, 0, 1, 1], [], []>} : vector<8x128xbf16>, vector<128x128xbf16>, vector<8x128xf32> -> vector<8x128xf32>
    %c0_95 = arith.constant 0 : index
    %c0_96 = arith.constant 0 : index
    %122 = vector.load %arg10[%c0_95, %c0_96] : memref<1x128xf32, #tpu.memory_space<vmem>>, vector<1x128xf32>
    %123 = vector.broadcast %122 : vector<1x128xf32> to vector<8x128xf32>
    %124 = arith.addf %121, %123 : vector<8x128xf32>
    %cst_97 = arith.constant 0.000000e+00 : f32
    %125 = vector.broadcast %cst_97 : f32 to vector<8x128xf32>
    %126 = arith.maximumf %124, %125 : vector<8x128xf32>
    %127 = arith.truncf %126 : vector<8x128xf32> to vector<8x128xbf16>
    %c0_98 = arith.constant 0 : index
    %c0_99 = arith.constant 0 : index
    %128 = vector.load %arg11[%c0_98, %c0_99] : memref<128x128xbf16, #tpu.memory_space<vmem>>, vector<128x128xbf16>
    %cst_100 = arith.constant dense<0.000000e+00> : vector<8x128xf32>
    %129 = tpu.matmul %127, %128, %cst_100 {dimension_numbers = #tpu.dot_dimension_numbers<[1], [0], [0], [1], [0, 0, 1, 1], [], []>} : vector<8x128xbf16>, vector<128x128xbf16>, vector<8x128xf32> -> vector<8x128xf32>
    %c0_101 = arith.constant 0 : index
    %c0_102 = arith.constant 0 : index
    %130 = vector.load %arg12[%c0_101, %c0_102] : memref<1x128xf32, #tpu.memory_space<vmem>>, vector<1x128xf32>
    %131 = vector.broadcast %130 : vector<1x128xf32> to vector<8x128xf32>
    %132 = arith.addf %129, %131 : vector<8x128xf32>
    %133 = vector.extract_strided_slice %132 {offsets = [0, 0], sizes = [1, 128], strides = [1, 1]} : vector<8x128xf32> to vector<1x128xf32>
    %134 = vector.shape_cast %133 : vector<1x128xf32> to vector<1x1x128xf32>
    %c0_103 = arith.constant 0 : index
    %c0_104 = arith.constant 0 : index
    %c0_105 = arith.constant 0 : index
    %135 = vector.load %arg13[%c0_103, %c0_104, %c0_105] : memref<1x1x128xf32, #tpu.memory_space<vmem>>, vector<1x1x128xf32>
    tpu.vector_store %arg13[%c0_103, %c0_104, %c0_105], %134 {strides = array<i32>} : memref<1x1x128xf32, #tpu.memory_space<vmem>>, vector<1x1x128xf32>,
    return
  }
  func.func @transform_0(%arg0: i32) -> (i32, i32, i32, i32) {
    %c0_i32 = arith.constant 0 : i32
    %c0_i32_0 = arith.constant 0 : i32
    %c0_i32_1 = arith.constant 0 : i32
    %c0_i32_2 = arith.constant 0 : i32
    return %arg0, %c0_i32, %c0_i32_0, %c0_i32_1 : i32, i32, i32, i32
  }
  func.func @transform_1(%arg0: i32) -> (i32, i32, i32, i32) {
    %c0_i32 = arith.constant 0 : i32
    %c0_i32_0 = arith.constant 0 : i32
    %c0_i32_1 = arith.constant 0 : i32
    %c0_i32_2 = arith.constant 0 : i32
    return %arg0, %c0_i32, %c0_i32_0, %c0_i32_1 : i32, i32, i32, i32
  }
  func.func @transform_2(%arg0: i32) -> (i32, i32, i32) {
    %c0_i32 = arith.constant 0 : i32
    %c0_i32_0 = arith.constant 0 : i32
    %c0_i32_1 = arith.constant 0 : i32
    %c0_i32_2 = arith.constant 0 : i32
    return %c0_i32, %c0_i32_0, %c0_i32_1 : i32, i32, i32
  }
  func.func @transform_3(%arg0: i32) -> (i32, i32) {
    %c0_i32 = arith.constant 0 : i32
    %c0_i32_0 = arith.constant 0 : i32
    %c0_i32_1 = arith.constant 0 : i32
    return %c0_i32, %c0_i32_0 : i32, i32
  }
  func.func @transform_4(%arg0: i32) -> (i32, i32) {
    %c0_i32 = arith.constant 0 : i32
    %c0_i32_0 = arith.constant 0 : i32
    %c0_i32_1 = arith.constant 0 : i32
    return %c0_i32, %c0_i32_0 : i32, i32
  }
  func.func @transform_5(%arg0: i32) -> (i32, i32) {
    %c0_i32 = arith.constant 0 : i32
    %c0_i32_0 = arith.constant 0 : i32
    %c0_i32_1 = arith.constant 0 : i32
    return %c0_i32, %c0_i32_0 : i32, i32
  }
  func.func @transform_6(%arg0: i32) -> (i32, i32) {
    %c0_i32 = arith.constant 0 : i32
    %c0_i32_0 = arith.constant 0 : i32
    %c0_i32_1 = arith.constant 0 : i32
    return %c0_i32, %c0_i32_0 : i32, i32
  }
  func.func @transform_7(%arg0: i32) -> (i32, i32) {
    %c0_i32 = arith.constant 0 : i32
    %c0_i32_0 = arith.constant 0 : i32
    %c0_i32_1 = arith.constant 0 : i32
    return %c0_i32, %c0_i32_0 : i32, i32
  }
  func.func @transform_8(%arg0: i32) -> (i32, i32) {
    %c0_i32 = arith.constant 0 : i32
    %c0_i32_0 = arith.constant 0 : i32
    %c0_i32_1 = arith.constant 0 : i32
    return %c0_i32, %c0_i32_0 : i32, i32
  }
  func.func @transform_9(%arg0: i32) -> (i32, i32) {
    %c0_i32 = arith.constant 0 : i32
    %c0_i32_0 = arith.constant 0 : i32
    %c0_i32_1 = arith.constant 0 : i32
    return %c0_i32, %c0_i32_0 : i32, i32
  }
  func.func @transform_10(%arg0: i32) -> (i32, i32) {
    %c0_i32 = arith.constant 0 : i32
    %c0_i32_0 = arith.constant 0 : i32
    %c0_i32_1 = arith.constant 0 : i32
    return %c0_i32, %c0_i32_0 : i32, i32
  }
  func.func @transform_11(%arg0: i32) -> (i32, i32) {
    %c0_i32 = arith.constant 0 : i32
    %c0_i32_0 = arith.constant 0 : i32
    %c0_i32_1 = arith.constant 0 : i32
    return %c0_i32, %c0_i32_0 : i32, i32
  }
  func.func @transform_12(%arg0: i32) -> (i32, i32, i32) {
    %c0_i32 = arith.constant 0 : i32
    %c0_i32_0 = arith.constant 0 : i32
    %c0_i32_1 = arith.constant 0 : i32
    return %arg0, %c0_i32, %c0_i32_0 : i32, i32, i32
  }
}

</mosaic_0001>

<bundles_post_ra>
// kernel: share_erm_forward.3
= control target key start
LH: loop header
LB: loop body
LE: loop exit
PB: predicated region body
PF: predicated region fallthrough
CT: control target
= control target key end

     0   :  { %s5087_s12 = smov 0   ;;  %s6336_s0 = inlined_call_operand.vmem [shape: bf16[2,18,18,128], index: 0, kind: input, shape index: {}]   ;;  %s6337_s1 = inlined_call_operand.vmem [shape: bf16[9,128,128], index: 1, kind: input, shape index: {}]   ;;  %s6338_s2 = inlined_call_operand.vmem [shape: f32[1,128], index: 2, kind: input, shape index: {}]   ;;  %s6339_s3 = inlined_call_operand.vmem [shape: bf16[2,16,16,128], index: 3, kind: output, shape index: {}]  }
   0x1 LB: > { %s3889_s13 = sadd.s32 4294967295, %s5065_s12   ;;  %p3893_p0 = scmp.ge.s32.totalorder %s5065_s12, 1  ;;  %s5065_s12 = sphi %s5087_s12, %s13_s12  }
   0x2   : > { %p137_p1 = scmp.lt.s32.totalorder %s5065_s12, 3 }
   0x4   : > { %p138_p2 = pnand %p3893_p0, %p137_p1 }
   0x6   : > { %141 = sbr.rel (%p138_p2) target bundleno = 534 (0x216), region = 32 }
   0xb   : > { %v4951_v0 = vld [vmem:[%s6337_s1 + $0x38] sm:$0xff]   ;;  %p161_p3 = scmp.lt.s32.totalorder %s3889_s13, 1  ;;  %v4952_v1 = vld [vmem:[%s6337_s1 + $0x30] sm:$0xff]   ;;  %v4953_v2 = vld [vmem:[%s6337_s1 + $0x28] sm:$0xff]   ;;  %vm697_vm0 = vcmask 1046528   ;;  %vm1148_vm1 = vcmask 1045504  }
   0xc   : > { %4494 = vmatprep.subr.bf16.mxu0 %v4951_v0  ;;  %4926 = vmatprep.subr.bf16.mxu1 %v4951_v0  ;;  %v4954_v3 = vld [vmem:[%s6337_s1 + $0x20] sm:$0xff]   ;;  %v4955_v6 = vld [vmem:[%s6337_s1 + $0x18] sm:$0xff]   ;;  %v4956_v7 = vld [vmem:[%s6337_s1 + $0x10] sm:$0xff]  }
   0xd   : > { %s6411_s13 = smov (!%p161_p3, %s3889_s13), 1  ;;  %4495 = vmatpush3.bf16.msra.mxu0 %v4951_v0  ;;  %4934 = vmatpush3.bf16.msra.mxu1 %v4951_v0  ;;  %v4957_v8 = vld [vmem:[%s6337_s1 + $0x8] sm:$0xff]   ;;  %v4958_v9 = vld [vmem:[%s6337_s1] sm:$0xff]   ;;  %v4963_v15 = vld [vmem:[%s6337_s1 + $0x78] sm:$0xff]  }
   0xe   : > { %4496 = vmatprep.subr.bf16.mxu0 %v4952_v1  ;;  %4927 = vmatprep.subr.bf16.mxu1 %v4952_v1  ;;  %s4942_s20 = smul.u32 216, %s6411_s13  ;;  %v4964_v16 = vld [vmem:[%s6337_s1 + $0xb8] sm:$0xff]   ;;  %v4965_v28 = vld [vmem:[%s6337_s1 + $0x70] sm:$0xff]   ;;  %v4971_v40 = vld [vmem:[%s6337_s1 + $0x68] sm:$0xff]   ;;  %s4150_s18 = sshll.u32 %s6411_s13, 7 }
   0xf   : > { %v4966_v29 = vld [vmem:[%s6337_s1 + $0xb0] sm:$0xff]   ;;  %v4972_v41 = vld [vmem:[%s6337_s1 + $0xa8] sm:$0xff]   ;;  %v4973_v53 = vld [vmem:[%s6337_s1 + $0x60] sm:$0xff]   ;;  %s6239_s13 = scalar_lea.vmem %s6339_s3, %s4150_s18 }
  0x10   : > { %s5110_s23 = scalar_lea.vmem %s6336_s0, %s4942_s20  ;;  %v4974_v56 = vld [vmem:[%s6337_s1 + $0xa0] sm:$0xff]  }
  0x11   : > { %4497 = vmatpush3.bf16.msra.mxu0 %v4952_v1  ;;  %4935 = vmatpush3.bf16.msra.mxu1 %v4952_v1  ;;  %v204_v4 = vld [vmem:[%s5110_s23] sm:$0xff]   ;;  %v5133_v12 = vld [vmem:[%s5110_s23 + $0xc] sm:$0xff]   ;;  %v209_v19 = vld [vmem:[%s5110_s23 + $0x14] sm:$0x1] }
  0x12   : > { %4498 = vmatprep.subr.bf16.mxu0 %v4953_v2  ;;  %4928 = vmatprep.subr.bf16.mxu1 %v4953_v2  ;;  %v5117_v5 = vld [vmem:[%s5110_s23 + $0x60] sm:$0xff]   ;;  %v258_v10 = vunpack.c.l.bf16 %v204_v4  ;;  %v259_v11 = vunpack.c.h.bf16 %v204_v4  ;;  %v5136_v13 = vld [vmem:[%s5110_s23 + $0x6c] sm:$0xff]   ;;  %v5150_v20 = vld [vmem:[%s5110_s23 + $0x18] sm:$0xff]   ;;  %v261_v24 = vunpack.c.l.bf16 %v5133_v12  ;;  %v262_v25 = vunpack.c.h.bf16 %v5133_v12 }
  0x13   : > { %6352 = vst [vmem:[#allocation3_spill] sm:$0xff] %v5117_v5  ;;  %4510 = vmatprep.mubr.bf16.mxu0 %v204_v4  ;;  %4526 = vmatprep.mubr.bf16.mxu1 %v5117_v5  ;;  %6353 = vst [vmem:[#allocation4_spill] sm:$0xff] %v5136_v13  ;;  %v282_v14 = vunpack.c.l.bf16 %v5117_v5  ;;  %v283_v18 = vunpack.c.h.bf16 %v5117_v5  ;;  %v5153_v21 = vld [vmem:[%s5110_s23 + $0x78] sm:$0xff]   ;;  %v263_v31 = vunpack.c.l.bf16 %v209_v19  ;;  %v5180_v34 = vld [vmem:[%s5110_s23 + $0x24] sm:$0xff]   ;;  %v285_v38 = vunpack.c.l.bf16 %v5136_v13 }
  0x14   : > { %v5145_v17 = vrot.slane %v258_v10, 1  ;;  %6354 = vst [vmem:[#allocation5_spill] sm:$0xff] %v5153_v21  ;;  %v5155_v22 = vrot.slane %v259_v11, 1  ;;  %v5157_v23 = vrot.slane %v258_v10, 2  ;;  %v5161_v26 = vrot.slane %v259_v11, 2  ;;  %v5183_v35 = vld [vmem:[%s5110_s23 + $0x84] sm:$0xff]  }
  0x15   : > { %4499 = vmatpush3.bf16.msra.mxu0 %v4953_v2  ;;  %4936 = vmatpush3.bf16.msra.mxu1 %v4953_v2  ;;  %v5163_v27 = vrot.slane %v282_v14, 1  ;;  %v5171_v30 = vrot.slane %v283_v18, 1  ;;  %v5173_v32 = vrot.slane %v282_v14, 2  ;;  %v5175_v33 = vrot.slane %v283_v18, 2  ;;  %v5210_v48 = vld [vmem:[%s5110_s23 + $0x30] sm:$0xff]   ;;  %v5240_v61 = vld [vmem:[%s5110_s23 + $0x3c] sm:$0xff]  }
  0x16   : > { %4500 = vmatprep.subr.bf16.mxu0 %v4954_v3  ;;  %4929 = vmatprep.subr.bf16.mxu1 %v4954_v3  ;;  %v5185_v36 = vrot.slane %v261_v24, 1  ;;  %v5187_v37 = vrot.slane %v262_v25, 1  ;;  %v286_v39 = vunpack.c.h.bf16 %v5136_v13  ;;  %v5197_v42 = vrot.slane %v263_v31, 1  ;;  %v5213_v49 = vld [vmem:[%s5110_s23 + $0x90] sm:$0xff]   ;;  %v5243_v62 = vld [vmem:[%s5110_s23 + $0x9c] sm:$0xff]   ;;  %v5269_v11 = vld [vmem:[%s5110_s23 + $0xa8] sm:$0xff]  }
  0x17   : > { %v5199_v43 = vrot.slane %v261_v24, 2  ;;  %v5201_v44 = vrot.slane %v262_v25, 2  ;;  %v264_v45 = vunpack.c.l.bf16 %v5150_v20  ;;  %v5206_v46 = vrot.slane %v263_v31, 2  ;;  %v4979_v2 = vld [vmem:[%s6337_s1 + $0x58] sm:$0xff]   ;;  %v4982_v31 = vld [vmem:[%s6337_s1 + $0x90] sm:$0xff]  }
  0x18   : > { %v265_v47 = vunpack.c.h.bf16 %v5150_v20  ;;  %v5215_v50 = vrot.slane %v285_v38, 1  ;;  %v5217_v51 = vrot.slane %v286_v39, 1  ;;  %v5219_v52 = vrot.slane %v285_v38, 2  ;;  %v5293_v38 = vld [vmem:[%s5110_s23 + $0x54] sm:$0xff]  }
  0x19   : > { %4501 = vmatpush3.bf16.msra.mxu0 %v4954_v3  ;;  %4937 = vmatpush3.bf16.msra.mxu1 %v4954_v3  ;;  %v5224_v54 = vrot.slane %v286_v39, 2  ;;  %v288_v55 = vunpack.c.l.bf16 %v5153_v21  ;;  %v5230_v57 = vrot.slane %v264_v45, 1  ;;  %v289_v58 = vunpack.c.h.bf16 %v5153_v21  ;;  %v206_v3 = vld [vmem:[%s5110_s23 + $0x8] sm:$0x1]  ;;  %v5296_v39 = vld [vmem:[%s5110_s23 + $0xb4] sm:$0xff]  }
  0x1a   : > { %4502 = vmatprep.subr.bf16.mxu0 %v4955_v6  ;;  %4930 = vmatprep.subr.bf16.mxu1 %v4955_v6  ;;  %v5233_v59 = vrot.slane %v265_v47, 1  ;;  %v5235_v60 = vrot.slane %v264_v45, 2  ;;  %v5245_v63 = vrot.slane %v265_v47, 2  ;;  %v267_v0 = vunpack.c.l.bf16 %v5180_v34  ;;  %v212_v45 = vld [vmem:[%s5110_s23 + $0x20] sm:$0x1] }
  0x1b   : > { %v268_v1 = vunpack.c.h.bf16 %v5180_v34  ;;  %v5253_v4 = vrot.slane %v288_v55, 1  ;;  %v5266_v10 = vrot.slane %v288_v55, 2  ;;  %v260_v14 = vunpack.c.l.bf16 %v206_v3 }
  0x1c   : > { %v5277_v19 = vrot.slane %v267_v0, 2  ;;  %v271_v25 = vunpack.c.h.bf16 %v5210_v48  ;;  %v700_v3 = vsel %vm697_vm0, %v5145_v17, %v5155_v22  ;;  %v705_v17 = vsel %vm697_vm0, %v5185_v36, %v5187_v37 }
  0x1d   : > { %4503 = vmatpush3.bf16.msra.mxu0 %v4955_v6  ;;  %4938 = vmatpush3.bf16.msra.mxu1 %v4955_v6  ;;  %v270_v6 = vunpack.c.l.bf16 %v5210_v48  ;;  %v5275_v18 = vrot.slane %v268_v1, 1  ;;  %v5279_v24 = vrot.slane %v268_v1, 2  ;;  %v266_v1 = vunpack.c.l.bf16 %v212_v45  ;;  %v4990_v45 = vld [vmem:[%s6337_s1 + $0x80] sm:$0xff]  }
  0x1e   : > { %4504 = vmatprep.subr.bf16.mxu0 %v4956_v7  ;;  %4931 = vmatprep.subr.bf16.mxu1 %v4956_v7  ;;  %v5304_v55 = vrot.slane %v271_v25, 1 }
  0x1f   : > { %v5299_v47 = vrot.slane %v270_v6, 2 }
  0x21   : > { %4505 = vmatpush3.bf16.msra.mxu0 %v4956_v7  ;;  %4939 = vmatpush3.bf16.msra.mxu1 %v4956_v7  ;;  %v4980_v7 = vld [vmem:[%s6337_s1 + $0x98] sm:$0xff]  }
  0x22   : > { %4506 = vmatprep.subr.bf16.mxu0 %v4957_v8  ;;  %4932 = vmatprep.subr.bf16.mxu1 %v4957_v8 }
  0x25   : > { %4507 = vmatpush3.bf16.msra.mxu0 %v4957_v8  ;;  %4940 = vmatpush3.bf16.msra.mxu1 %v4957_v8  ;;  %v5259_v8 = vrot.slane %v289_v58, 1 }
  0x26   : > { %4508 = vmatprep.subr.bf16.mxu0 %v4958_v9  ;;  %4933 = vmatprep.subr.bf16.mxu1 %v4958_v9 }
  0x29   : > { %4509 = vmatpush3.bf16.msra.mxu0 %v4958_v9  ;;  %4941 = vmatpush3.bf16.msra.mxu1 %v4958_v9  ;;  %v5264_v9 = vld [vmem:[%s5110_s23 + $0x48] sm:$0xff]  }
  0x2a   : > { %4542 = vmatprep.subr.bf16.mxu1 %v4963_v15  ;;  %4590 = vmatprep.subr.bf16.mxu0 %v4964_v16 }
  0x2c   : > { %4511 = vmatmul.mubr.bf16.vlgmr.msra.gmra.mxu0 %v5133_v12  ;;  %4527 = vmatmul.mubr.bf16.vlgmr.msra.gmra.mxu1 %v5136_v13  ;;  %v215_v13 = vld [vmem:[%s5110_s23 + $0x2c] sm:$0x1] }
  0x2d   : > { %4543 = vmatpush3.bf16.msra.mxu1 %v4963_v15  ;;  %4591 = vmatpush3.bf16.msra.mxu0 %v4964_v16  ;;  %v5271_v15 = vrot.slane %v289_v58, 2  ;;  %v5273_v16 = vrot.slane %v267_v0, 1  ;;  %v4988_v58 = vld [vmem:[%s6337_s1 + $0x88] sm:$0xff]   ;;  %v274_v0 = vunpack.c.h.bf16 %v5240_v61 }
  0x2e   : > { %4544 = vmatprep.subr.bf16.mxu1 %v4965_v28  ;;  %4592 = vmatprep.subr.bf16.mxu0 %v4966_v29 }
  0x2f   : > { %4514 = vmatprep.mubr.bf16.mxu0 %v5150_v20  ;;  %4530 = vmatprep.mubr.bf16.mxu1 %v5153_v21  ;;  %v5326_v21 = vrot.slane %v271_v25, 2  ;;  %v711_v25 = vrot.slane %v266_v1, 1  ;;  %v5345_v36 = vrot.slane %v274_v0, 1 }
  0x31   : > { %4545 = vmatpush3.bf16.msra.mxu1 %v4965_v28  ;;  %4593 = vmatpush3.bf16.msra.mxu0 %v4966_v29  ;;  %v5282_v28 = vrot.slane %v270_v6, 1  ;;  %v4981_v29 = vld [vmem:[%s6337_s1 + $0x50] sm:$0xff]  }
  0x32   : > { %4546 = vmatprep.subr.bf16.mxu1 %v4971_v40  ;;  %4594 = vmatprep.subr.bf16.mxu0 %v4972_v41 }
  0x34   : > { %4515 = vmatmul.mubr.bf16.gmra.mxu0 %v5180_v34  ;;  %4531 = vmatmul.mubr.bf16.gmra.mxu1 %v5183_v35 }
  0x35   : > { %4547 = vmatpush3.bf16.msra.mxu1 %v4971_v40  ;;  %4595 = vmatpush3.bf16.msra.mxu0 %v4972_v41  ;;  %v701_v40 = vrot.slane %v260_v14, 1  ;;  %v1152_v41 = vrot.slane %v260_v14, 2 }
  0x36   : > { %4548 = vmatprep.subr.bf16.mxu1 %v4973_v53  ;;  %4596 = vmatprep.subr.bf16.mxu0 %v4974_v56 }
  0x37   : > { %4518 = vmatprep.mubr.bf16.mxu0 %v5210_v48  ;;  %4534 = vmatprep.mubr.bf16.mxu1 %v5213_v49  ;;  %v702_v6 = vsel %vm697_vm0, %v5155_v22, %v701_v40  ;;  %v1153_v14 = vsel %vm1148_vm1, %v5161_v26, %v1152_v41  ;;  %v276_v22 = vunpack.c.l.bf16 %v5264_v9  ;;  %v1162_v41 = vrot.slane %v266_v1, 2 }
  0x38   : > { %v810_v40 = vpack.c.bf16 %v702_v6, %v700_v3  ;;  %v1158_v1 = vsel %vm1148_vm1, %v5201_v44, %v5206_v46  ;;  %v5354_v6 = vrot.slane %v274_v0, 2 }
  0x39   : > { %4549 = vmatpush3.bf16.msra.mxu1 %v4973_v53  ;;  %4597 = vmatpush3.bf16.msra.mxu0 %v4974_v56  ;;  %v4987_v53 = vld [vmem:[%s6337_s1 + $0x48] sm:$0xff]   ;;  %v273_v56 = vunpack.c.l.bf16 %v5240_v61 }
  0x3a   : > { %4550 = vmatprep.subr.bf16.mxu1 %v4979_v2  ;;  %4598 = vmatprep.subr.bf16.mxu0 %v4980_v7 }
  0x3b   : > { %v5343_v5 = vrot.slane %v273_v56, 1  ;;  %v5352_v3 = vrot.slane %v273_v56, 2  ;;  %v712_v56 = vsel %vm697_vm0, %v5233_v59, %v711_v25 }
  0x3c   : > { %4519 = vmatmul.mubr.bf16.gmra.mxu0 %v5240_v61  ;;  %4535 = vmatmul.mubr.bf16.gmra.mxu1 %v5243_v62 }
  0x3d   : > { %4551 = vmatpush3.bf16.msra.mxu1 %v4979_v2  ;;  %4599 = vmatpush3.bf16.msra.mxu0 %v4980_v7  ;;  %v4989_v2 = vld [vmem:[%s6337_s1 + $0x40] sm:$0xff]   ;;  %v1151_v7 = vsel %vm1148_vm1, %v5157_v23, %v5161_v26  ;;  %v218_v23 = vld [vmem:[%s5110_s23 + $0x38] sm:$0x1] }
  0x3e   : > { %4552 = vmatprep.subr.bf16.mxu1 %v4981_v29  ;;  %4600 = vmatprep.subr.bf16.mxu0 %v4982_v31  ;;  %v1261_v26 = vpack.c.bf16 %v1153_v14, %v1151_v7  ;;  %v272_v46 = vunpack.c.l.bf16 %v218_v23  ;;  %v221_v7 = vld [vmem:[%s5110_s23 + $0x44] sm:$0x1]  ;;  %v277_v14 = vunpack.c.h.bf16 %v5264_v9 }
  0x3f   : > { %4522 = vmatprep.mubr.bf16.mxu0 %v5264_v9  ;;  %4538 = vmatprep.mubr.bf16.mxu1 %v5269_v11 }
  0x40   : > { %v721_v25 = vrot.slane %v272_v46, 1 }
  0x41   : > { %4553 = vmatpush3.bf16.msra.mxu1 %v4981_v29  ;;  %4601 = vmatpush3.bf16.msra.mxu0 %v4982_v31  ;;  %v707_v29 = vsel %vm697_vm0, %v5187_v37, %v5197_v42  ;;  %v1156_v31 = vsel %vm1148_vm1, %v5199_v43, %v5201_v44  ;;  %v4991_v37 = vld [vmem:[%s6337_s1 + $0xf8] sm:$0xff]   ;;  %v269_v43 = vunpack.c.l.bf16 %v215_v13  ;;  %v710_v44 = vsel %vm697_vm0, %v5230_v57, %v5233_v59  ;;  %v4993_v59 = vld [vmem:[%s6337_s1 + $0xf0] sm:$0xff]  }
  0x42   : > { %4554 = vmatprep.subr.bf16.mxu1 %v4987_v53  ;;  %4602 = vmatprep.subr.bf16.mxu0 %v4988_v58  ;;  %v4992_v42 = vld [vmem:[%s6337_s1 + $0x138] sm:$0xff]   ;;  %v1161_v13 = vsel %vm1148_vm1, %v5235_v60, %v5245_v63  ;;  %v5376_v0 = vpack.c.bf16 %v707_v29, %v705_v17  ;;  %v5378_v57 = vpack.c.bf16 %v1158_v1, %v1156_v31  ;;  %v4994_v60 = vld [vmem:[%s6337_s1 + $0x130] sm:$0xff]   ;;  %v275_v31 = vunpack.c.l.bf16 %v221_v7 }
  0x43   : > { %v716_v23 = vrot.slane %v269_v43, 1  ;;  %v5389_v17 = vpack.c.bf16 %v712_v56, %v710_v44  ;;  %v1166_v29 = vsel %vm1148_vm1, %v5277_v19, %v5279_v24  ;;  %v729_v1 = vrot.slane %v277_v14, 1 }
  0x44   : > { %4523 = vmatmul.mubr.bf16.gmra.mxu0 %v5293_v38  ;;  %4539 = vmatmul.mubr.bf16.gmra.mxu1 %v5296_v39  ;;  %v722_v19 = vsel %vm697_vm0, %v5304_v55, %v721_v25  ;;  %v1180_v56 = vrot.slane %v277_v14, 2  ;;  %v4997_v14 = vld [vmem:[%s6337_s1 + $0xe0] sm:$0xff]  }
  0x45   : > { %4555 = vmatpush3.bf16.msra.mxu1 %v4987_v53  ;;  %4603 = vmatpush3.bf16.msra.mxu0 %v4988_v58  ;;  %v5367_v53 = vrot.slane %v276_v22, 1  ;;  %v1163_v58 = vsel %vm1148_vm1, %v5245_v63, %v1162_v41  ;;  %v224_v63 = vld [vmem:[%s5110_s23 + $0x50] sm:$0x1]  ;;  %v715_v41 = vsel %vm697_vm0, %v5273_v16, %v5275_v18  ;;  %v4995_v16 = vld [vmem:[%s6337_s1 + $0xe8] sm:$0xff]  }
  0x46   : > { %4556 = vmatprep.subr.bf16.mxu1 %v4989_v2  ;;  %4604 = vmatprep.subr.bf16.mxu0 %v4990_v45 }
  0x47   : > { %4558 = vmatprep.mubr.bf16.mxu1 %v810_v40  ;;  %4606 = vmatprep.mubr.bf16.mxu0 %v1261_v26  ;;  %v1167_v40 = vrot.slane %v269_v43, 2  ;;  %v5391_v26 = vpack.c.bf16 %v1163_v58, %v1161_v13  ;;  %v717_v43 = vsel %vm697_vm0, %v5275_v18, %v716_v23  ;;  %v1171_v18 = vsel %vm1148_vm1, %v5299_v47, %v5326_v21 }
  0x48   : > { %v280_v13 = vunpack.c.h.bf16 %v5293_v38  ;;  %v5428_v47 = vpack.c.bf16 %v717_v43, %v715_v41 }
  0x49   : > { %4557 = vmatpush3.bf16.msra.mxu1 %v4989_v2  ;;  %4605 = vmatpush3.bf16.msra.mxu0 %v4990_v45  ;;  %v1172_v2 = vrot.slane %v272_v46, 2  ;;  %v279_v45 = vunpack.c.l.bf16 %v5293_v38  ;;  %v1168_v44 = vsel %vm1148_vm1, %v5279_v24, %v1167_v40  ;;  %v720_v46 = vsel %vm697_vm0, %v5282_v28, %v5304_v55  ;;  %v4996_v28 = vld [vmem:[%s6337_s1 + $0x128] sm:$0xff]   ;;  %v227_v55 = vld [vmem:[%s5110_s23 + $0x5c] sm:$0x1] }
  0x4a   : > { %4638 = vmatprep.subr.bf16.mxu1 %v4991_v37  ;;  %4686 = vmatprep.subr.bf16.mxu0 %v4992_v42  ;;  %v5430_v7 = vpack.c.bf16 %v1168_v44, %v1166_v29  ;;  %v5432_v23 = vpack.c.bf16 %v722_v19, %v720_v46  ;;  %v734_v41 = vrot.slane %v280_v13, 1  ;;  %v725_v29 = vsel %vm697_vm0, %v5343_v5, %v5345_v36  ;;  %v233_v5 = vld [vmem:[%s5110_s23 + $0x74] sm:$0x1] }
  0x4b   : > { %v1173_v24 = vsel %vm1148_vm1, %v5326_v21, %v1172_v2  ;;  %v733_v58 = vrot.slane %v279_v45, 1  ;;  %v726_v21 = vrot.slane %v275_v31, 1  ;;  %v230_v2 = vld [vmem:[%s5110_s23 + $0x68] sm:$0x1]  ;;  %v281_v43 = vunpack.c.l.bf16 %v227_v55 }
  0x4c   : > { %4559 = vmatmul.mubr.bf16.vlgmr.msra.gmra.mxu1 %v5376_v0  ;;  %4607 = vmatmul.mubr.bf16.vlgmr.msra.gmra.mxu0 %v5378_v57  ;;  %v5434_v40 = vpack.c.bf16 %v1173_v24, %v1171_v18  ;;  %v730_v46 = vsel %vm697_vm0, %v5367_v53, %v729_v1  ;;  %v284_v19 = vunpack.c.l.bf16 %v230_v2  ;;  %v1185_v18 = vrot.slane %v280_v13, 2 }
  0x4d   : > { %4639 = vmatpush3.bf16.msra.mxu1 %v4991_v37  ;;  %4687 = vmatpush3.bf16.msra.mxu0 %v4992_v42  ;;  %v278_v37 = vunpack.c.l.bf16 %v224_v63  ;;  %v1179_v42 = vrot.slane %v276_v22, 2  ;;  %v1177_v22 = vrot.slane %v275_v31, 2  ;;  %v727_v31 = vsel %vm697_vm0, %v5345_v36, %v726_v21  ;;  %v4999_v36 = vld [vmem:[%s6337_s1 + $0xd8] sm:$0xff]  }
  0x4e   : > { %4562 = vmatprep.mubr.bf16.mxu1 %v5389_v17  ;;  %4610 = vmatprep.mubr.bf16.mxu0 %v5391_v26  ;;  %v5469_v53 = vpack.c.bf16 %v727_v31, %v725_v29  ;;  %v736_v13 = vrot.slane %v281_v43, 1  ;;  %v735_v2 = vsel %vm697_vm0, %v733_v58, %v734_v41  ;;  %v5003_v58 = vld [vmem:[%s6337_s1 + $0xc8] sm:$0xff]  }
  0x4f   : > { %4640 = vmatprep.subr.bf16.mxu1 %v4993_v59  ;;  %4688 = vmatprep.subr.bf16.mxu0 %v4994_v60  ;;  %v731_v63 = vrot.slane %v278_v37, 1  ;;  %v1182_v25 = vrot.slane %v278_v37, 2  ;;  %v1178_v44 = vsel %vm1148_vm1, %v5354_v6, %v1177_v22  ;;  %v1192_v22 = vrot.slane %v284_v19, 2 }
  0x51   : > { %4641 = vmatpush3.bf16.msra.mxu1 %v4993_v59  ;;  %4689 = vmatpush3.bf16.msra.mxu0 %v4994_v60  ;;  %v4998_v59 = vld [vmem:[%s6337_s1 + $0x120] sm:$0xff]   ;;  %v1184_v60 = vrot.slane %v279_v45, 2  ;;  %v1176_v45 = vsel %vm1148_vm1, %v5352_v3, %v5354_v6  ;;  %v732_v24 = vsel %vm697_vm0, %v729_v1, %v731_v63  ;;  %v1181_v3 = vsel %vm1148_vm1, %v1179_v42, %v1180_v56  ;;  %v5000_v6 = vld [vmem:[%s6337_s1 + $0x118] sm:$0xff]   ;;  %v5001_v63 = vld [vmem:[%s6337_s1 + $0xd0] sm:$0xff]  }
  0x52   : > { %4642 = vmatprep.subr.bf16.mxu1 %v4995_v16  ;;  %4690 = vmatprep.subr.bf16.mxu0 %v4996_v28  ;;  %v1183_v37 = vsel %vm1148_vm1, %v1180_v56, %v1182_v25  ;;  %v5471_v55 = vpack.c.bf16 %v1178_v44, %v1176_v45  ;;  %v5473_v21 = vpack.c.bf16 %v732_v24, %v730_v46  ;;  %v741_v42 = vrot.slane %v284_v19, 1  ;;  %v236_v56 = vld [vmem:[%s5110_s23 + $0x80] sm:$0x1]  ;;  %v5002_v25 = vld [vmem:[%s6337_s1 + $0x110] sm:$0xff]  }
  0x53   : > { %v5475_v1 = vpack.c.bf16 %v1183_v37, %v1181_v3  ;;  %v1186_v29 = vsel %vm1148_vm1, %v1184_v60, %v1185_v18  ;;  %v737_v45 = vsel %vm697_vm0, %v734_v41, %v736_v13  ;;  %v5004_v60 = vld [vmem:[%s6337_s1 + $0x108] sm:$0xff]   ;;  %v1191_v41 = vsel %vm1148_vm1, %v5173_v32, %v5175_v33  ;;  %v242_v37 = vld [vmem:[%s5110_s23 + $0x98] sm:$0x1]  ;;  %v5006_v13 = vld [vmem:[%s6337_s1 + $0x100] sm:$0xff]  }
  0x54   : > { %4563 = vmatmul.mubr.bf16.gmra.mxu1 %v5428_v47  ;;  %4611 = vmatmul.mubr.bf16.gmra.mxu0 %v5430_v7  ;;  %v742_v44 = vsel %vm697_vm0, %v5171_v30, %v741_v42  ;;  %v1193_v46 = vsel %vm1148_vm1, %v5175_v33, %v1192_v22  ;;  %v5508_v19 = vpack.c.bf16 %v737_v45, %v735_v2  ;;  %v239_v32 = vld [vmem:[%s5110_s23 + $0x8c] sm:$0x1]  ;;  %v291_v33 = vunpack.c.l.bf16 %v5183_v35 }
  0x55   : > { %4566 = vmatprep.mubr.bf16.mxu1 %v5432_v23  ;;  %4614 = vmatprep.mubr.bf16.mxu0 %v5434_v40  ;;  %v745_v42 = vsel %vm697_vm0, %v5215_v50, %v5217_v51  ;;  %v1196_v22 = vsel %vm1148_vm1, %v5219_v52, %v5224_v54  ;;  %v293_v2 = vunpack.c.l.bf16 %v239_v32  ;;  %v1201_v52 = vsel %vm1148_vm1, %v5266_v10, %v5271_v15  ;;  %v245_v32 = vld [vmem:[%s5110_s23 + $0xa4] sm:$0x1] }
  0x56   : > { %4643 = vmatpush3.bf16.msra.mxu1 %v4995_v16  ;;  %4691 = vmatpush3.bf16.msra.mxu0 %v4996_v28  ;;  %v1187_v16 = vrot.slane %v281_v43, 2  ;;  %v287_v28 = vunpack.c.l.bf16 %v233_v5  ;;  %v296_v45 = vunpack.c.l.bf16 %v242_v37  ;;  %v248_v37 = vld [vmem:[%s5110_s23 + $0xb0] sm:$0x1] }
  0x57   : > { %4644 = vmatprep.subr.bf16.mxu1 %v4997_v14  ;;  %4692 = vmatprep.subr.bf16.mxu0 %v4998_v59 }
  0x58   : > { %v746_v31 = vrot.slane %v287_v28, 1  ;;  %v1197_v43 = vrot.slane %v287_v28, 2  ;;  %v295_v28 = vunpack.c.h.bf16 %v5213_v49 }
  0x5a   : > { %4645 = vmatpush3.bf16.msra.mxu1 %v4997_v14  ;;  %4693 = vmatpush3.bf16.msra.mxu0 %v4998_v59  ;;  %v1188_v14 = vsel %vm1148_vm1, %v1185_v18, %v1187_v16  ;;  %v740_v59 = vsel %vm697_vm0, %v5163_v27, %v5171_v30  ;;  %v290_v27 = vunpack.c.l.bf16 %v236_v56  ;;  %v5514_v30 = vpack.c.bf16 %v1193_v46, %v1191_v41 }
  0x5b   : > { %4646 = vmatprep.subr.bf16.mxu1 %v4999_v36  ;;  %4694 = vmatprep.subr.bf16.mxu0 %v5000_v6  ;;  %v5510_v5 = vpack.c.bf16 %v1188_v14, %v1186_v29  ;;  %v5512_v18 = vpack.c.bf16 %v742_v44, %v740_v59  ;;  %v294_v16 = vunpack.c.l.bf16 %v5213_v49  ;;  %v747_v56 = vsel %vm697_vm0, %v5217_v51, %v746_v31 }
  0x5c   : > { %4567 = vmatmul.mubr.bf16.gmra.mxu1 %v5469_v53  ;;  %4615 = vmatmul.mubr.bf16.gmra.mxu0 %v5471_v55  ;;  %v751_v24 = vrot.slane %v290_v27, 1  ;;  %v1202_v3 = vrot.slane %v290_v27, 2  ;;  %v753_v51 = vrot.slane %v291_v33, 1  ;;  %v1204_v31 = vrot.slane %v291_v33, 2 }
  0x5d   : > { %4570 = vmatprep.mubr.bf16.mxu1 %v5473_v21  ;;  %4618 = vmatprep.mubr.bf16.mxu0 %v5475_v1  ;;  %v758_v10 = vrot.slane %v294_v16, 1  ;;  %v5562_v14 = vpack.c.bf16 %v747_v56, %v745_v42  ;;  %v756_v44 = vrot.slane %v293_v2, 1  ;;  %v1207_v41 = vrot.slane %v293_v2, 2 }
  0x5e   : > { %4647 = vmatpush3.bf16.msra.mxu1 %v4999_v36  ;;  %4695 = vmatpush3.bf16.msra.mxu0 %v5000_v6  ;;  %v292_v36 = vunpack.c.h.bf16 %v5183_v35  ;;  %v5005_v6 = vld [vmem:[%s6337_s1 + $0xc0] sm:$0xff]   ;;  %v752_v50 = vsel %vm697_vm0, %v5259_v8, %v751_v24  ;;  %v1203_v29 = vsel %vm1148_vm1, %v5271_v15, %v1202_v3  ;;  %v759_v15 = vrot.slane %v295_v28, 1 }
  0x5f   : > { %4648 = vmatprep.subr.bf16.mxu1 %v5001_v63  ;;  %4696 = vmatprep.subr.bf16.mxu0 %v5002_v25  ;;  %v1209_v46 = vrot.slane %v294_v16, 2  ;;  %v1210_v27 = vrot.slane %v295_v28, 2  ;;  %v761_v24 = vrot.slane %v296_v45, 1  ;;  %v1212_v3 = vrot.slane %v296_v45, 2 }
  0x60   : > { %v297_v33 = vunpack.c.l.bf16 %v5243_v62  ;;  %v300_v42 = vunpack.c.l.bf16 %v5269_v11  ;;  %v760_v56 = vsel %vm697_vm0, %v758_v10, %v759_v15 }
  0x61   : > { %v1211_v2 = vsel %vm1148_vm1, %v1209_v46, %v1210_v27  ;;  %v251_v46 = vld [vmem:[%s5110_s23 + $0xbc] sm:$0x1] }
  0x62   : > { %4649 = vmatpush3.bf16.msra.mxu1 %v5001_v63  ;;  %4697 = vmatpush3.bf16.msra.mxu0 %v5002_v25  ;;  %v1198_v63 = vsel %vm1148_vm1, %v5224_v54, %v1197_v43  ;;  %v750_v25 = vsel %vm697_vm0, %v5253_v4, %v5259_v8  ;;  %v754_v54 = vrot.slane %v292_v36, 1  ;;  %v1205_v43 = vrot.slane %v292_v36, 2  ;;  %v5555_v4 = vld [vmem:[%s6337_s1 + $0x178] sm:$0xff]  }
  0x63   : > { %4650 = vmatprep.subr.bf16.mxu1 %v5003_v58  ;;  %4698 = vmatprep.subr.bf16.mxu0 %v5004_v60  ;;  %v5560_v8 = vld [vmem:[%s6337_s1 + $0x1b8] sm:$0xff]   ;;  %v5564_v59 = vpack.c.bf16 %v1198_v63, %v1196_v22  ;;  %v298_v36 = vunpack.c.h.bf16 %v5243_v62  ;;  %v301_v22 = vunpack.c.h.bf16 %v5269_v11  ;;  %v299_v63 = vunpack.c.l.bf16 %v245_v32 }
  0x64   : > { %4571 = vmatmul.mubr.bf16.gmra.mxu1 %v5508_v19  ;;  %4619 = vmatmul.mubr.bf16.gmra.mxu0 %v5510_v5  ;;  %v757_v16 = vsel %vm697_vm0, %v754_v54, %v756_v44  ;;  %v1208_v28 = vsel %vm1148_vm1, %v1205_v43, %v1207_v41 }
  0x65   : > { %4574 = vmatprep.mubr.bf16.mxu1 %v5512_v18  ;;  %4622 = vmatprep.mubr.bf16.mxu0 %v5514_v30  ;;  %6355 = vst [vmem:[#allocation6_spill] sm:$0xff] %v5564_v59  ;;  %v764_v45 = vrot.slane %v298_v36, 1  ;;  %v1217_v41 = vrot.slane %v299_v63, 2 }
  0x66   : > { %4651 = vmatpush3.bf16.msra.mxu1 %v5003_v58  ;;  %4699 = vmatpush3.bf16.msra.mxu0 %v5004_v60  ;;  %v5566_v58 = vpack.c.bf16 %v752_v50, %v750_v25  ;;  %v5568_v60 = vpack.c.bf16 %v1203_v29, %v1201_v52  ;;  %v762_v25 = vsel %vm697_vm0, %v759_v15, %v761_v24  ;;  %v302_v52 = vunpack.c.l.bf16 %v248_v37 }
  0x67   : > { %4652 = vmatprep.subr.bf16.mxu1 %v5005_v6  ;;  %4700 = vmatprep.subr.bf16.mxu0 %v5006_v13  ;;  %v1213_v50 = vsel %vm1148_vm1, %v1210_v27, %v1212_v3  ;;  %v763_v29 = vrot.slane %v297_v33, 1  ;;  %v5594_v10 = vpack.c.bf16 %v762_v25, %v760_v56  ;;  %v766_v15 = vrot.slane %v299_v63, 1 }
  0x68   : > { %6356 = vst [vmem:[#allocation7_spill] sm:$0xff] %v5568_v60  ;;  %v5596_v44 = vpack.c.bf16 %v1213_v50, %v1211_v2  ;;  %v1219_v24 = vrot.slane %v300_v42, 2  ;;  %v1220_v27 = vrot.slane %v301_v22, 2  ;;  %v771_v3 = vrot.slane %v302_v52, 1 }
  0x69   : > { %v1222_v32 = vrot.slane %v302_v52, 2  ;;  %v765_v37 = vsel %vm697_vm0, %v763_v29, %v764_v45 }
  0x6a   : > { %4653 = vmatpush3.bf16.msra.mxu1 %v5005_v6  ;;  %4701 = vmatpush3.bf16.msra.mxu0 %v5006_v13  ;;  %v755_v6 = vsel %vm697_vm0, %v753_v51, %v754_v54  ;;  %v1206_v13 = vsel %vm1148_vm1, %v1204_v31, %v1205_v43  ;;  %v1214_v51 = vrot.slane %v297_v33, 2  ;;  %v1215_v31 = vrot.slane %v298_v36, 2 }
  0x6b   : > { %4734 = vmatprep.subr.bf16.mxu1 %v5555_v4  ;;  %4782 = vmatprep.subr.bf16.mxu0 %v5560_v8  ;;  %v5590_v54 = vpack.c.bf16 %v757_v16, %v755_v6  ;;  %v5592_v43 = vpack.c.bf16 %v1208_v28, %v1206_v13  ;;  %v303_v33 = vunpack.c.l.bf16 %v5296_v39  ;;  %v304_v36 = vunpack.c.h.bf16 %v5296_v39 }
  0x6c   : > { %4575 = vmatmul.mubr.bf16.gmra.mxu1 %v5562_v14  ;;  %4623 = vmatmul.mubr.bf16.gmra.mxu0 %v5564_v59  ;;  %v769_v59 = vrot.slane %v301_v22, 1  ;;  %v305_v6 = vunpack.c.l.bf16 %v251_v46  ;;  %v1216_v22 = vsel %vm1148_vm1, %v1214_v51, %v1215_v31  ;;  %v1218_v13 = vsel %vm1148_vm1, %v1215_v31, %v1217_v41  ;;  %v5625_v41 = vld [vmem:[%s5110_s23 + $0xc8] sm:$0x1] }
  0x6d   : > { %4578 = vmatprep.mubr.bf16.mxu1 %v5566_v58  ;;  %4626 = vmatprep.mubr.bf16.mxu0 %v5568_v60  ;;  %v768_v60 = vrot.slane %v300_v42, 1  ;;  %v767_v42 = vsel %vm697_vm0, %v764_v45, %v766_v15  ;;  %v1221_v56 = vsel %vm1148_vm1, %v1219_v24, %v1220_v27  ;;  %v1223_v63 = vsel %vm1148_vm1, %v1220_v27, %v1222_v32  ;;  %v5618_v15 = vld [vmem:[%s5110_s23 + $0xc0] sm:$0xff]  }
  0x6e   : > { %v772_v28 = vsel %vm697_vm0, %v769_v59, %v771_v3  ;;  %v773_v25 = vrot.slane %v303_v33, 1  ;;  %v774_v2 = vrot.slane %v304_v36, 1  ;;  %v1224_v50 = vrot.slane %v303_v33, 2 }
  0x6f   : > { %v770_v16 = vsel %vm697_vm0, %v768_v60, %v769_v59  ;;  %v1225_v52 = vrot.slane %v304_v36, 2  ;;  %v5613_v29 = vpack.c.bf16 %v767_v42, %v765_v37  ;;  %v5615_v45 = vpack.c.bf16 %v1218_v13, %v1216_v22 }
  0x70   : > { %v776_v51 = vrot.slane %v305_v6, 1  ;;  %v5620_v31 = vpack.c.bf16 %v772_v28, %v770_v16  ;;  %v5622_v60 = vpack.c.bf16 %v1223_v63, %v1221_v56  ;;  %v1227_v59 = vrot.slane %v305_v6, 2  ;;  %v5009_v63 = vld [vmem:[%s6337_s1 + $0x170] sm:$0xff]  }
  0x71   : > { %v306_v46 = vunpack.c.l.bf16 %v5618_v15  ;;  %v307_v24 = vunpack.c.h.bf16 %v5618_v15  ;;  %v775_v27 = vsel %vm697_vm0, %v773_v25, %v774_v2  ;;  %v1226_v32 = vsel %vm1148_vm1, %v1224_v50, %v1225_v52  ;;  %v5010_v25 = vld [vmem:[%s6337_s1 + $0x1b0] sm:$0xff]   ;;  %v5016_v50 = vld [vmem:[%s6337_s1 + $0x198] sm:$0xff]  }
  0x72   : > { %v777_v3 = vsel %vm697_vm0, %v774_v2, %v776_v51  ;;  %v1228_v33 = vsel %vm1148_vm1, %v1225_v52, %v1227_v59  ;;  %v308_v6 = vunpack.c.l.bf16 %v5625_v41  ;;  %v5015_v2 = vld [vmem:[%s6337_s1 + $0x158] sm:$0xff]   ;;  %v5017_v52 = vld [vmem:[%s6337_s1 + $0x150] sm:$0xff]   ;;  %v5019_v59 = vld [vmem:[%s6337_s1 + $0x148] sm:$0xff]  }
  0x73   : > { %v2255_v36 = vrot.slane %v306_v46, 2  ;;  %v2256_v37 = vrot.slane %v307_v24, 2  ;;  %v5644_v22 = vpack.c.bf16 %v777_v3, %v775_v27  ;;  %v5646_v13 = vpack.c.bf16 %v1228_v33, %v1226_v32  ;;  %v5018_v51 = vld [vmem:[%s6337_s1 + $0x190] sm:$0xff]   ;;  %v5020_v27 = vld [vmem:[%s6337_s1 + $0x188] sm:$0xff]   ;;  %v5022_v3 = vld [vmem:[%s6337_s1 + $0x140] sm:$0xff]  }
  0x74   : > { %4579 = vmatmul.mubr.bf16.gmra.mxu1 %v5590_v54  ;;  %4627 = vmatmul.mubr.bf16.gmra.mxu0 %v5592_v43  ;;  %v2258_v42 = vrot.slane %v308_v6, 2  ;;  %v5023_v32 = vld [vmem:[%s6337_s1 + $0x180] sm:$0xff]   ;;  %v5026_v41 = vld [vmem:[%s6337_s1 + $0x1f0] sm:$0xff]  }
  0x75   : > { %4582 = vmatprep.mubr.bf16.mxu1 %v5594_v10  ;;  %4630 = vmatprep.mubr.bf16.mxu0 %v5596_v44  ;;  %v2257_v16 = vsel %vm1148_vm1, %v2255_v36, %v2256_v37  ;;  %v6358_v33 = vld [vmem:[#allocation3_spill] sm:$0xff]  ;;  %v6359_v36 = vld [vmem:[#allocation4_spill] sm:$0xff] }
  0x76   : > { %v2259_v28 = vsel %vm1148_vm1, %v2256_v37, %v2258_v42  ;;  %v5024_v37 = vld [vmem:[%s6337_s1 + $0x1f8] sm:$0xff]  }
  0x77   : > { %v5650_v56 = vpack.c.bf16 %v2259_v28, %v2257_v16  ;;  %v5025_v42 = vld [vmem:[%s6337_s1 + $0x238] sm:$0xff]   ;;  %v6360_v16 = vld [vmem:[#allocation5_spill] sm:$0xff]  ;;  %v1925_v28 = vrot.slane %v306_v46, 1 }
  0x78   : > { %v5027_v46 = vld [vmem:[%s6337_s1 + $0x230] sm:$0xff]  }
  0x79   : > { %6357 = vst [vmem:[#allocation8_spill] sm:$0xff] %v5650_v56 }
  0x7c   : > { %4583 = vmatmul.mubr.bf16.gmra.mxu1 %v5613_v29  ;;  %4631 = vmatmul.mubr.bf16.gmra.mxu0 %v5615_v45 }
  0x7d   : > { %4586 = vmatprep.mubr.bf16.mxu1 %v5620_v31  ;;  %4634 = vmatprep.mubr.bf16.mxu0 %v5622_v60 }
  0x84   : > { %4587 = vmatmul.mubr.bf16.gmra.mxu1 %v5644_v22  ;;  %4635 = vmatmul.mubr.bf16.gmra.mxu0 %v5646_v13 }
  0x85   : > { %4654 = vmatprep.mubr.bf16.mxu1 %v5133_v12  ;;  %4702 = vmatprep.mubr.bf16.mxu0 %v5376_v0  ;;  %v5011_v12 = vld [vmem:[%s6337_s1 + $0x168] sm:$0xff]  }
  0x86   : > { %v5012_v0 = vld [vmem:[%s6337_s1 + $0x1a8] sm:$0xff]  }
  0x8c   : > { %4655 = vmatmul.mubr.bf16.vlgmr.msra.gmra.mxu1 %v5150_v20  ;;  %4703 = vmatmul.mubr.bf16.vlgmr.msra.gmra.mxu0 %v5389_v17 }
  0x8d   : > { %4735 = vmatpush3.bf16.msra.mxu1 %v5555_v4  ;;  %4783 = vmatpush3.bf16.msra.mxu0 %v5560_v8  ;;  %v5013_v4 = vld [vmem:[%s6337_s1 + $0x160] sm:$0xff]  }
  0x8e   : > { %4658 = vmatprep.mubr.bf16.mxu1 %v5180_v34  ;;  %4706 = vmatprep.mubr.bf16.mxu0 %v5428_v47  ;;  %v5014_v8 = vld [vmem:[%s6337_s1 + $0x1a0] sm:$0xff]  }
  0x8f   : > { %4736 = vmatprep.subr.bf16.mxu1 %v5009_v63  ;;  %4784 = vmatprep.subr.bf16.mxu0 %v5010_v25 }
  0x91   : > { %4737 = vmatpush3.bf16.msra.mxu1 %v5009_v63  ;;  %4785 = vmatpush3.bf16.msra.mxu0 %v5010_v25  ;;  %v1926_v63 = vrot.slane %v307_v24, 1  ;;  %v1928_v25 = vrot.slane %v308_v6, 1  ;;  %v5032_v24 = vld [vmem:[%s6337_s1 + $0x1d8] sm:$0xff]  }
  0x92   : > { %4738 = vmatprep.subr.bf16.mxu1 %v5011_v12  ;;  %4786 = vmatprep.subr.bf16.mxu0 %v5012_v0  ;;  %v5033_v6 = vld [vmem:[%s6337_s1 + $0x218] sm:$0xff]  }
  0x94   : > { %4659 = vmatmul.mubr.bf16.gmra.mxu1 %v5210_v48  ;;  %4707 = vmatmul.mubr.bf16.gmra.mxu0 %v5432_v23 }
  0x95   : > { %4662 = vmatprep.mubr.bf16.mxu1 %v5240_v61  ;;  %4710 = vmatprep.mubr.bf16.mxu0 %v5469_v53 }
  0x96   : > { %4739 = vmatpush3.bf16.msra.mxu1 %v5011_v12  ;;  %4787 = vmatpush3.bf16.msra.mxu0 %v5012_v0  ;;  %v1927_v12 = vsel %vm697_vm0, %v1925_v28, %v1926_v63  ;;  %v1929_v0 = vsel %vm697_vm0, %v1926_v63, %v1928_v25 }
  0x97   : > { %4740 = vmatprep.subr.bf16.mxu1 %v5013_v4  ;;  %4788 = vmatprep.subr.bf16.mxu0 %v5014_v8 }
  0x9a   : > { %4741 = vmatpush3.bf16.msra.mxu1 %v5013_v4  ;;  %4789 = vmatpush3.bf16.msra.mxu0 %v5014_v8  ;;  %v5742_v4 = vpack.c.bf16 %v1929_v0, %v1927_v12  ;;  %v5036_v8 = vld [vmem:[%s6337_s1 + $0x1c8] sm:$0xff]  }
  0x9b   : > { %4742 = vmatprep.subr.bf16.mxu1 %v5015_v2  ;;  %4790 = vmatprep.subr.bf16.mxu0 %v5016_v50 }
  0x9c   : > { %4663 = vmatmul.mubr.bf16.gmra.mxu1 %v5264_v9  ;;  %4711 = vmatmul.mubr.bf16.gmra.mxu0 %v5473_v21  ;;  %6361 = vst [vmem:[#allocation3_spill] sm:$0xff] %v5742_v4 }
  0x9d   : > { %4666 = vmatprep.mubr.bf16.mxu1 %v5293_v38  ;;  %4714 = vmatprep.mubr.bf16.mxu0 %v5508_v19 }
  0x9e   : > { %4743 = vmatpush3.bf16.msra.mxu1 %v5015_v2  ;;  %4791 = vmatpush3.bf16.msra.mxu0 %v5016_v50  ;;  %v5037_v2 = vld [vmem:[%s6337_s1 + $0x208] sm:$0xff]   ;;  %v5040_v50 = vld [vmem:[%s6337_s1 + $0x200] sm:$0xff]  }
  0x9f   : > { %4744 = vmatprep.subr.bf16.mxu1 %v5017_v52  ;;  %4792 = vmatprep.subr.bf16.mxu0 %v5018_v51 }
  0xa2   : > { %4745 = vmatpush3.bf16.msra.mxu1 %v5017_v52  ;;  %4793 = vmatpush3.bf16.msra.mxu0 %v5018_v51  ;;  %v6362_v52 = vld [vmem:[#allocation6_spill] sm:$0xff] }
  0xa3   : > { %4746 = vmatprep.subr.bf16.mxu1 %v5019_v59  ;;  %4794 = vmatprep.subr.bf16.mxu0 %v5020_v27 }
  0xa4   : > { %4667 = vmatmul.mubr.bf16.gmra.mxu1 %v6358_v33  ;;  %4715 = vmatmul.mubr.bf16.gmra.mxu0 %v5512_v18 }
  0xa5   : > { %4670 = vmatprep.mubr.bf16.mxu1 %v6359_v36  ;;  %4718 = vmatprep.mubr.bf16.mxu0 %v5562_v14 }
  0xa6   : > { %4747 = vmatpush3.bf16.msra.mxu1 %v5019_v59  ;;  %4795 = vmatpush3.bf16.msra.mxu0 %v5020_v27  ;;  %v6363_v27 = vld [vmem:[#allocation7_spill] sm:$0xff] }
  0xa7   : > { %4748 = vmatprep.subr.bf16.mxu1 %v5022_v3  ;;  %4796 = vmatprep.subr.bf16.mxu0 %v5023_v32 }
  0xaa   : > { %4749 = vmatpush3.bf16.msra.mxu1 %v5022_v3  ;;  %4797 = vmatpush3.bf16.msra.mxu0 %v5023_v32 }
  0xab   : > { %4830 = vmatprep.subr.bf16.mxu1 %v5024_v37  ;;  %4878 = vmatprep.subr.bf16.mxu0 %v5025_v42 }
  0xac   : > { %4671 = vmatmul.mubr.bf16.gmra.mxu1 %v6360_v16  ;;  %4719 = vmatmul.mubr.bf16.gmra.mxu0 %v5566_v58 }
  0xad   : > { %4674 = vmatprep.mubr.bf16.mxu1 %v5183_v35  ;;  %4722 = vmatprep.mubr.bf16.mxu0 %v5590_v54 }
  0xb4   : > { %4675 = vmatmul.mubr.bf16.gmra.mxu1 %v5213_v49  ;;  %4723 = vmatmul.mubr.bf16.gmra.mxu0 %v5594_v10 }
  0xb5   : > { %4678 = vmatprep.mubr.bf16.mxu1 %v5243_v62  ;;  %4726 = vmatprep.mubr.bf16.mxu0 %v5613_v29 }
  0xbc   : > { %4679 = vmatmul.mubr.bf16.gmra.mxu1 %v5269_v11  ;;  %4727 = vmatmul.mubr.bf16.gmra.mxu0 %v5620_v31 }
  0xbd   : > { %4682 = vmatprep.mubr.bf16.mxu1 %v5296_v39  ;;  %4730 = vmatprep.mubr.bf16.mxu0 %v5644_v22 }
  0xc4   : > { %4683 = vmatmul.mubr.bf16.gmra.mxu1 %v5618_v15  ;;  %4731 = vmatmul.mubr.bf16.gmra.mxu0 %v5742_v4 }
  0xc5   : > { %4750 = vmatprep.mubr.bf16.mxu1 %v5378_v57  ;;  %4798 = vmatprep.mubr.bf16.mxu0 %v5150_v20  ;;  %v5028_v20 = vld [vmem:[%s6337_s1 + $0x1e8] sm:$0xff]  }
  0xc6   : > { %v5029_v57 = vld [vmem:[%s6337_s1 + $0x228] sm:$0xff]  }
  0xcc   : > { %4751 = vmatmul.mubr.bf16.vlgmr.msra.gmra.mxu1 %v5391_v26  ;;  %4799 = vmatmul.mubr.bf16.vlgmr.msra.gmra.mxu0 %v5180_v34  ;;  %v5030_v34 = vld [vmem:[%s6337_s1 + $0x1e0] sm:$0xff]  }
  0xcd   : > { %4831 = vmatpush3.bf16.msra.mxu1 %v5024_v37  ;;  %4879 = vmatpush3.bf16.msra.mxu0 %v5025_v42 }
  0xce   : > { %4754 = vmatprep.mubr.bf16.mxu1 %v5430_v7  ;;  %4802 = vmatprep.mubr.bf16.mxu0 %v5210_v48  ;;  %v5031_v48 = vld [vmem:[%s6337_s1 + $0x220] sm:$0xff]  }
  0xcf   : > { %4832 = vmatprep.subr.bf16.mxu1 %v5026_v41  ;;  %4880 = vmatprep.subr.bf16.mxu0 %v5027_v46 }
  0xd1   : > { %4833 = vmatpush3.bf16.msra.mxu1 %v5026_v41  ;;  %4881 = vmatpush3.bf16.msra.mxu0 %v5027_v46 }
  0xd2   : > { %4834 = vmatprep.subr.bf16.mxu1 %v5028_v20  ;;  %4882 = vmatprep.subr.bf16.mxu0 %v5029_v57 }
  0xd4   : > { %4755 = vmatmul.mubr.bf16.gmra.mxu1 %v5434_v40  ;;  %4803 = vmatmul.mubr.bf16.gmra.mxu0 %v5240_v61  ;;  %v5034_v61 = vld [vmem:[%s6337_s1 + $0x1d0] sm:$0xff]  }
  0xd5   : > { %4758 = vmatprep.mubr.bf16.mxu1 %v5471_v55  ;;  %4806 = vmatprep.mubr.bf16.mxu0 %v5264_v9  ;;  %v5035_v9 = vld [vmem:[%s6337_s1 + $0x210] sm:$0xff]  }
  0xd6   : > { %4835 = vmatpush3.bf16.msra.mxu1 %v5028_v20  ;;  %4883 = vmatpush3.bf16.msra.mxu0 %v5029_v57 }
  0xd7   : > { %4836 = vmatprep.subr.bf16.mxu1 %v5030_v34  ;;  %4884 = vmatprep.subr.bf16.mxu0 %v5031_v48 }
  0xda   : > { %4837 = vmatpush3.bf16.msra.mxu1 %v5030_v34  ;;  %4885 = vmatpush3.bf16.msra.mxu0 %v5031_v48 }
  0xdb   : > { %4838 = vmatprep.subr.bf16.mxu1 %v5032_v24  ;;  %4886 = vmatprep.subr.bf16.mxu0 %v5033_v6 }
  0xdc   : > { %4759 = vmatmul.mubr.bf16.gmra.mxu1 %v5475_v1  ;;  %4807 = vmatmul.mubr.bf16.gmra.mxu0 %v5293_v38  ;;  %v5039_v38 = vld [vmem:[%s6337_s1 + $0x1c0] sm:$0xff]  }
  0xdd   : > { %4762 = vmatprep.mubr.bf16.mxu1 %v5510_v5  ;;  %4810 = vmatprep.mubr.bf16.mxu0 %v6358_v33 }
  0xde   : > { %4839 = vmatpush3.bf16.msra.mxu1 %v5032_v24  ;;  %4887 = vmatpush3.bf16.msra.mxu0 %v5033_v6 }
  0xdf   : > { %4840 = vmatprep.subr.bf16.mxu1 %v5034_v61  ;;  %4888 = vmatprep.subr.bf16.mxu0 %v5035_v9 }
  0xe2   : > { %4841 = vmatpush3.bf16.msra.mxu1 %v5034_v61  ;;  %4889 = vmatpush3.bf16.msra.mxu0 %v5035_v9 }
  0xe3   : > { %4842 = vmatprep.subr.bf16.mxu1 %v5036_v8  ;;  %4890 = vmatprep.subr.bf16.mxu0 %v5037_v2 }
  0xe4   : > { %4763 = vmatmul.mubr.bf16.gmra.mxu1 %v5514_v30  ;;  %4811 = vmatmul.mubr.bf16.gmra.mxu0 %v6359_v36 }
  0xe5   : > { %4766 = vmatprep.mubr.bf16.mxu1 %v6362_v52  ;;  %4814 = vmatprep.mubr.bf16.mxu0 %v6360_v16 }
  0xe6   : > { %4843 = vmatpush3.bf16.msra.mxu1 %v5036_v8  ;;  %4891 = vmatpush3.bf16.msra.mxu0 %v5037_v2 }
  0xe7   : > { %4844 = vmatprep.subr.bf16.mxu1 %v5039_v38  ;;  %4892 = vmatprep.subr.bf16.mxu0 %v5040_v50 }
  0xea   : > { %4845 = vmatpush3.bf16.msra.mxu1 %v5039_v38  ;;  %4893 = vmatpush3.bf16.msra.mxu0 %v5040_v50 }
  0xec   : > { %v4512_v51 = vpop.f32.mrf.mxu0  ;;  %v5806_v59 = vpop.f32.mrf.mxu1  ;;  %4767 = vmatmul.mubr.bf16.gmra.mxu1 %v6363_v27  ;;  %4815 = vmatmul.mubr.bf16.gmra.mxu0 %v5183_v35 }
  0xed   : > { %4770 = vmatprep.mubr.bf16.mxu1 %v5592_v43  ;;  %4818 = vmatprep.mubr.bf16.mxu0 %v5213_v49 }
  0xee   : > { %v458_v3 = vpop.f32.mrf.mxu0  ;;  %v5812_v32 = vpop.f32.mrf.mxu1 }
  0xf0   : > { %v4513_v33 = vpop.f32.mrf.mxu0  ;;  %v5814_v36 = vpop.f32.mrf.mxu1 }
  0xf2   : > { %v461_v37 = vpop.f32.mrf.mxu0  ;;  %v5816_v42 = vpop.f32.mrf.mxu1 }
  0xf4   : > { %v4516_v16 = vpop.f32.mrf.mxu0  ;;  %v5818_v28 = vpop.f32.mrf.mxu1  ;;  %4771 = vmatmul.mubr.bf16.gmra.mxu1 %v5596_v44  ;;  %4819 = vmatmul.mubr.bf16.gmra.mxu0 %v5243_v62  ;;  %v5843_v62 = vld [vmem:[%s5110_s23 + $0xcc] sm:$0xff]  }
  0xf5   : > { %4774 = vmatprep.mubr.bf16.mxu1 %v5615_v45  ;;  %4822 = vmatprep.mubr.bf16.mxu0 %v5269_v11 }
  0xf6   : > { %v474_v35 = vpop.f32.mrf.mxu0  ;;  %v5824_v49 = vpop.f32.mrf.mxu1 }
  0xf8   : > { %v5826_v63 = vpop.f32.mrf.mxu0  ;;  %v5828_v25 = vpop.f32.mrf.mxu1 }
  0xfa   : > { %v5830_v12 = vpop.f32.mrf.mxu0  ;;  %v5832_v0 = vpop.f32.mrf.mxu1 }
  0xfc   : > { %v5834_v41 = vpop.f32.mrf.mxu0  ;;  %v5836_v46 = vpop.f32.mrf.mxu1  ;;  %4775 = vmatmul.mubr.bf16.gmra.mxu1 %v5622_v60  ;;  %4823 = vmatmul.mubr.bf16.gmra.mxu0 %v5296_v39 }
  0xfd   : > { %6364 = vst [vmem:[#allocation4_spill] sm:$0xff] %v5836_v46  ;;  %4778 = vmatprep.mubr.bf16.mxu1 %v5646_v13  ;;  %4826 = vmatprep.mubr.bf16.mxu0 %v5618_v15 }
  0xfe   : > { %v5845_v11 = vpop.f32.mrf.mxu0  ;;  %v5847_v20 = vpop.f32.mrf.mxu1 }
  0xff   : > { %6365 = vst [vmem:[#allocation5_spill] sm:$0xff] %v5847_v20 }
 0x100   : > { %v5849_v57 = vpop.f32.mrf.mxu0  ;;  %v5851_v34 = vpop.f32.mrf.mxu1 }
 0x101   : > { %6366 = vst [vmem:[#allocation6_spill] sm:$0xff] %v5851_v34 }
 0x102   : > { %v5853_v48 = vpop.f32.mrf.mxu0  ;;  %v5855_v24 = vpop.f32.mrf.mxu1 }
 0x103   : > { %6367 = vst [vmem:[#allocation7_spill] sm:$0xff] %v5855_v24 }
 0x104   : > { %v5857_v6 = vpop.f32.mrf.mxu0  ;;  %v5859_v39 = vpop.f32.mrf.mxu1  ;;  %4779 = vmatmul.mubr.bf16.gmra.mxu1 %v5650_v56  ;;  %4827 = vmatmul.mubr.bf16.gmra.mxu0 %v5843_v62 }
 0x105   : > { %6368 = vst [vmem:[#allocation9_spill] sm:$0xff] %v5859_v39  ;;  %4846 = vmatprep.mubr.bf16.mxu1 %v5389_v17  ;;  %4894 = vmatprep.mubr.bf16.mxu0 %v5391_v26 }
 0x106   : > { %v5865_v15 = vpop.f32.mrf.mxu0  ;;  %v5867_v61 = vpop.f32.mrf.mxu1 }
 0x107   : > { %6369 = vst [vmem:[#allocation10_spill] sm:$0xff] %v5867_v61 }
 0x108   : > { %v5869_v9 = vpop.f32.mrf.mxu0  ;;  %v5871_v8 = vpop.f32.mrf.mxu1 }
 0x109   : > { %6370 = vst [vmem:[#allocation11_spill] sm:$0xff] %v5871_v8 }
 0x10a   : > { %v5873_v2 = vpop.f32.mrf.mxu0  ;;  %v5875_v38 = vpop.f32.mrf.mxu1 }
 0x10b   : > { %6371 = vst [vmem:[#allocation12_spill] sm:$0xff] %v5875_v38 }
 0x10c   : > { %v4560_v50 = vpop.f32.mrf.mxu1  ;;  %v4608_v39 = vpop.f32.mrf.mxu0  ;;  %4847 = vmatmul.mubr.bf16.vlgmr.msra.gmra.mxu1 %v5428_v47  ;;  %4895 = vmatmul.mubr.bf16.vlgmr.msra.gmra.mxu0 %v5430_v7 }
 0x10d   : > { %v1086_v17 = vadd.f32 %v4560_v50, %v4512_v51  ;;  %4850 = vmatprep.mubr.bf16.mxu1 %v5432_v23  ;;  %4898 = vmatprep.mubr.bf16.mxu0 %v5434_v40 }
 0x10e   : > { %v957_v26 = vpop.f32.mrf.mxu1  ;;  %v1408_v61 = vpop.f32.mrf.mxu0 }
 0x10f   : > { %v5881_v24 = vadd.f32 %v4608_v39, %v1086_v17  ;;  %v1084_v8 = vadd.f32 %v957_v26, %v458_v3 }
 0x110   : > { %v4561_v34 = vpop.f32.mrf.mxu1  ;;  %v4609_v20 = vpop.f32.mrf.mxu0 }
 0x111   : > { %v5883_v56 = vadd.f32 %v1408_v61, %v1084_v8  ;;  %v1087_v38 = vadd.f32 %v4561_v34, %v4513_v33 }
 0x112   : > { %v960_v4 = vpop.f32.mrf.mxu1  ;;  %v1411_v46 = vpop.f32.mrf.mxu0 }
 0x113   : > { %v5885_v47 = vadd.f32 %v4609_v20, %v1087_v38  ;;  %v1085_v7 = vadd.f32 %v960_v4, %v461_v37 }
 0x114   : > { %v4564_v51 = vpop.f32.mrf.mxu1  ;;  %v4612_v50 = vpop.f32.mrf.mxu0  ;;  %4851 = vmatmul.mubr.bf16.gmra.mxu1 %v5469_v53  ;;  %4899 = vmatmul.mubr.bf16.gmra.mxu0 %v5471_v55 }
 0x115   : > { %v5889_v23 = vadd.f32 %v1411_v46, %v1085_v7  ;;  %v1090_v40 = vadd.f32 %v4564_v51, %v4516_v16  ;;  %4854 = vmatprep.mubr.bf16.mxu1 %v5473_v21  ;;  %4902 = vmatprep.mubr.bf16.mxu0 %v5475_v1 }
 0x116   : > { %v973_v3 = vpop.f32.mrf.mxu1  ;;  %v1424_v33 = vpop.f32.mrf.mxu0 }
 0x117   : > { %v5893_v34 = vadd.f32 %v4612_v50, %v1090_v40  ;;  %v1088_v20 = vadd.f32 %v973_v3, %v474_v35 }
 0x118   : > { %v4565_v39 = vpop.f32.mrf.mxu1  ;;  %v4613_v4 = vpop.f32.mrf.mxu0 }
 0x119   : > { %v5895_v37 = vadd.f32 %v1424_v33, %v1088_v20  ;;  %v1091_v53 = vadd.f32 %v4565_v39, %v5826_v63 }
 0x11a   : > { %v976_v61 = vpop.f32.mrf.mxu1  ;;  %v1427_v55 = vpop.f32.mrf.mxu0 }
 0x11b   : > { %v5898_v46 = vadd.f32 %v4613_v4, %v1091_v53  ;;  %v1089_v16 = vadd.f32 %v976_v61, %v5830_v12 }
 0x11c   : > { %v4568_v21 = vpop.f32.mrf.mxu1  ;;  %v4616_v8 = vpop.f32.mrf.mxu0  ;;  %4855 = vmatmul.mubr.bf16.gmra.mxu1 %v5508_v19  ;;  %4903 = vmatmul.mubr.bf16.gmra.mxu0 %v5510_v5 }
 0x11d   : > { %v5903_v1 = vadd.f32 %v1427_v55, %v1089_v16  ;;  %v1094_v35 = vadd.f32 %v4568_v21, %v5834_v41  ;;  %4858 = vmatprep.mubr.bf16.mxu1 %v5512_v18  ;;  %4906 = vmatprep.mubr.bf16.mxu0 %v5514_v30 }
 0x11e   : > { %v989_v63 = vpop.f32.mrf.mxu1  ;;  %v1440_v38 = vpop.f32.mrf.mxu0 }
 0x11f   : > { %v5908_v17 = vadd.f32 %v4616_v8, %v1094_v35  ;;  %v1092_v12 = vadd.f32 %v989_v63, %v5845_v11 }
 0x120   : > { %v4569_v26 = vpop.f32.mrf.mxu1  ;;  %v4617_v7 = vpop.f32.mrf.mxu0 }
 0x121   : > { %v5911_v51 = vadd.f32 %v1440_v38, %v1092_v12  ;;  %v1095_v19 = vadd.f32 %v4569_v26, %v5849_v57 }
 0x122   : > { %v992_v5 = vpop.f32.mrf.mxu1  ;;  %v1443_v50 = vpop.f32.mrf.mxu0 }
 0x123   : > { %v5914_v40 = vadd.f32 %v4617_v7, %v1095_v19  ;;  %v1093_v18 = vadd.f32 %v992_v5, %v5853_v48  ;;  %v310_v7 = vunpack.c.h.bf16 %v5843_v62 }
 0x124   : > { %v4572_v41 = vpop.f32.mrf.mxu1  ;;  %v4620_v30 = vpop.f32.mrf.mxu0  ;;  %4859 = vmatmul.mubr.bf16.gmra.mxu1 %v5562_v14  ;;  %4907 = vmatmul.mubr.bf16.gmra.mxu0 %v6362_v52 }
 0x125   : > { %v5919_v3 = vadd.f32 %v1443_v50, %v1093_v18  ;;  %v1098_v11 = vadd.f32 %v4572_v41, %v5857_v6  ;;  %4862 = vmatprep.mubr.bf16.mxu1 %v5566_v58  ;;  %4910 = vmatprep.mubr.bf16.mxu0 %v6363_v27 }
 0x126   : > { %v1005_v57 = vpop.f32.mrf.mxu1  ;;  %v1456_v33 = vpop.f32.mrf.mxu0 }
 0x127   : > { %v5924_v20 = vadd.f32 %v4620_v30, %v1098_v11  ;;  %v1096_v48 = vadd.f32 %v1005_v57, %v5865_v15  ;;  %v2912_v11 = vrot.slane %v310_v7, 1  ;;  %v3242_v57 = vrot.slane %v310_v7, 2  ;;  %v6376_v7 = vld [vmem:[#allocation6_spill] sm:$0xff] }
 0x128   : > { %v4573_v39 = vpop.f32.mrf.mxu1  ;;  %v4621_v4 = vpop.f32.mrf.mxu0 }
 0x129   : > { %v5927_v53 = vadd.f32 %v1456_v33, %v1096_v48  ;;  %v1099_v14 = vadd.f32 %v4573_v39, %v5869_v9 }
 0x12a   : > { %v1008_v52 = vpop.f32.mrf.mxu1  ;;  %v1459_v61 = vpop.f32.mrf.mxu0 }
 0x12b   : > { %v5930_v55 = vadd.f32 %v4621_v4, %v1099_v14  ;;  %v1097_v58 = vadd.f32 %v1008_v52, %v5873_v2 }
 0x12c   : > { %v4576_v6 = vpop.f32.mrf.mxu1  ;;  %v4624_v27 = vpop.f32.mrf.mxu0  ;;  %4863 = vmatmul.mubr.bf16.gmra.mxu1 %v5590_v54  ;;  %4911 = vmatmul.mubr.bf16.gmra.mxu0 %v5592_v43  ;;  %v257_v43 = vld [vmem:[%s5110_s23 + $0xd4] sm:$0x1] }
 0x12d   : > { %v5935_v15 = vadd.f32 %v1459_v61, %v1097_v58  ;;  %v1102_v16 = vadd.f32 %v4576_v6, %v5806_v59  ;;  %4866 = vmatprep.mubr.bf16.mxu1 %v5594_v10  ;;  %4914 = vmatprep.mubr.bf16.mxu0 %v5596_v44  ;;  %v309_v59 = vunpack.c.l.bf16 %v5843_v62 }
 0x12e   : > { %v1021_v9 = vpop.f32.mrf.mxu1  ;;  %v1472_v21 = vpop.f32.mrf.mxu0 }
 0x12f   : > { %v5940_v8 = vadd.f32 %v4624_v27, %v1102_v16  ;;  %v1100_v2 = vadd.f32 %v1021_v9, %v5812_v32  ;;  %v311_v32 = vunpack.c.l.bf16 %v257_v43  ;;  %v6372_v16 = vld [vmem:[#allocation4_spill] sm:$0xff] }
 0x130   : > { %v4577_v35 = vpop.f32.mrf.mxu1  ;;  %v4625_v63 = vpop.f32.mrf.mxu0 }
 0x131   : > { %v5943_v38 = vadd.f32 %v1472_v21, %v1100_v2  ;;  %v1103_v54 = vadd.f32 %v4577_v35, %v5814_v36  ;;  %v2914_v48 = vrot.slane %v311_v32, 1  ;;  %v6373_v21 = vld [vmem:[#allocation3_spill] sm:$0xff]  ;;  %v6374_v2 = vld [vmem:[#allocation8_spill] sm:$0xff] }
 0x132   : > { %v1024_v12 = vpop.f32.mrf.mxu1  ;;  %v1475_v26 = vpop.f32.mrf.mxu0 }
 0x133   : > { %v5948_v10 = vadd.f32 %v4625_v63, %v1103_v54  ;;  %v1101_v44 = vadd.f32 %v1024_v12, %v5816_v42  ;;  %v2911_v42 = vrot.slane %v309_v59, 1  ;;  %v2915_v6 = vsel %vm697_vm0, %v2912_v11, %v2914_v48 }
 0x134   : > { %v4580_v19 = vpop.f32.mrf.mxu1  ;;  %v4628_v5 = vpop.f32.mrf.mxu0  ;;  %4867 = vmatmul.mubr.bf16.gmra.mxu1 %v5613_v29  ;;  %4915 = vmatmul.mubr.bf16.gmra.mxu0 %v5615_v45  ;;  %v3241_v29 = vrot.slane %v309_v59, 2 }
 0x135   : > { %v5954_v50 = vadd.f32 %v1475_v26, %v1101_v44  ;;  %v1106_v36 = vadd.f32 %v4580_v19, %v5818_v28  ;;  %4870 = vmatprep.mubr.bf16.mxu1 %v5620_v31  ;;  %4918 = vmatprep.mubr.bf16.mxu0 %v5622_v60  ;;  %v3244_v31 = vrot.slane %v311_v32, 2 }
 0x136   : > { %v1037_v18 = vpop.f32.mrf.mxu1  ;;  %v1488_v41 = vpop.f32.mrf.mxu0  ;;  %v3243_v27 = vsel %vm1148_vm1, %v3241_v29, %v3242_v57  ;;  %v6378_v29 = vld [vmem:[#allocation9_spill] sm:$0xff] }
 0x137   : > { %v5959_v30 = vadd.f32 %v4628_v5, %v1106_v36  ;;  %v1104_v62 = vadd.f32 %v1037_v18, %v5824_v49  ;;  %v2913_v49 = vsel %vm697_vm0, %v2911_v42, %v2912_v11  ;;  %v6377_v18 = vld [vmem:[#allocation7_spill] sm:$0xff] }
 0x138   : > { %v4581_v45 = vpop.f32.mrf.mxu1  ;;  %v4629_v33 = vpop.f32.mrf.mxu0  ;;  %v2918_v26 = vpack.c.bf16 %v2915_v6, %v2913_v49 }
 0x139   : > { %v5962_v39 = vadd.f32 %v1488_v41, %v1104_v62  ;;  %v1107_v28 = vadd.f32 %v4581_v45, %v5828_v25 }
 0x13a   : > { %v1040_v4 = vpop.f32.mrf.mxu1  ;;  %v1491_v60 = vpop.f32.mrf.mxu0 }
 0x13b   : > { %v5965_v14 = vadd.f32 %v4629_v33, %v1107_v28  ;;  %v1105_v52 = vadd.f32 %v1040_v4, %v5832_v0  ;;  %v3245_v0 = vsel %vm1148_vm1, %v3242_v57, %v3244_v31  ;;  %v6379_v28 = vld [vmem:[#allocation10_spill] sm:$0xff] }
 0x13c   : > { %v4584_v61 = vpop.f32.mrf.mxu1  ;;  %v4632_v58 = vpop.f32.mrf.mxu0  ;;  %4871 = vmatmul.mubr.bf16.gmra.mxu1 %v5644_v22  ;;  %4919 = vmatmul.mubr.bf16.gmra.mxu0 %v5646_v13  ;;  %v6375_v13 = vld [vmem:[#allocation5_spill] sm:$0xff]  ;;  %v3248_v59 = vpack.c.bf16 %v3245_v0, %v3243_v27 }
 0x13d   : > { %v5973_v25 = vadd.f32 %v1491_v60, %v1105_v52  ;;  %v1110_v9 = vadd.f32 %v4584_v61, %v6372_v16  ;;  %4874 = vmatprep.mubr.bf16.mxu1 %v6373_v21  ;;  %4922 = vmatprep.mubr.bf16.mxu0 %v6374_v2  ;;  %v6380_v61 = vld [vmem:[#allocation11_spill] sm:$0xff]  ;;  %v6381_v16 = vld [vmem:[#allocation12_spill] sm:$0xff] }
 0x13e   : > { %v1053_v35 = vpop.f32.mrf.mxu1  ;;  %v1504_v22 = vpop.f32.mrf.mxu0 }
 0x13f   : > { %v5979_v63 = vadd.f32 %v4632_v58, %v1110_v9  ;;  %v1108_v54 = vadd.f32 %v1053_v35, %v6375_v13 }
 0x140   : > { %v4585_v43 = vpop.f32.mrf.mxu1  ;;  %v4633_v12 = vpop.f32.mrf.mxu0 }
 0x141   : > { %v5982_v44 = vadd.f32 %v1504_v22, %v1108_v54  ;;  %v1111_v19 = vadd.f32 %v4585_v43, %v6376_v7 }
 0x142   : > { %v1056_v5 = vpop.f32.mrf.mxu1  ;;  %v1507_v32 = vpop.f32.mrf.mxu0 }
 0x143   : > { %v5985_v36 = vadd.f32 %v4633_v12, %v1111_v19  ;;  %v1109_v41 = vadd.f32 %v1056_v5, %v6377_v18 }
 0x144   : > { %v4588_v42 = vpop.f32.mrf.mxu1  ;;  %v4636_v62 = vpop.f32.mrf.mxu0  ;;  %4875 = vmatmul.mubr.bf16.gmra.mxu1 %v2918_v26  ;;  %4923 = vmatmul.mubr.bf16.gmra.mxu0 %v3248_v59 }
 0x145   : > { %v5988_v11 = vadd.f32 %v1507_v32, %v1109_v41  ;;  %v1114_v57 = vadd.f32 %v4588_v42, %v6378_v29 }
 0x146   : > { %v1069_v45 = vpop.f32.mrf.mxu1  ;;  %v1520_v33 = vpop.f32.mrf.mxu0 }
 0x147   : > { %v5991_v48 = vadd.f32 %v4636_v62, %v1114_v57  ;;  %v1112_v31 = vadd.f32 %v1069_v45, %v6379_v28 }
 0x148   : > { %v4589_v4 = vpop.f32.mrf.mxu1  ;;  %v4637_v60 = vpop.f32.mrf.mxu0 }
 0x149   : > { %v5994_v52 = vadd.f32 %v1520_v33, %v1112_v31  ;;  %v1115_v58 = vadd.f32 %v4589_v4, %v6380_v61 }
 0x14a   : > { %v1072_v49 = vpop.f32.mrf.mxu1  ;;  %v1523_v6 = vpop.f32.mrf.mxu0 }
 0x14b   : > { %v5997_v27 = vadd.f32 %v4637_v60, %v1115_v58  ;;  %v1113_v9 = vadd.f32 %v1072_v49, %v6381_v16 }
 0x14c   : > { %v4656_v21 = vpop.f32.mrf.mxu1  ;;  %v4704_v2 = vpop.f32.mrf.mxu0 }
 0x14d   : > { %v6000_v0 = vadd.f32 %v1523_v6, %v1113_v9  ;;  %v1860_v35 = vadd.f32 %v4656_v21, %v5881_v24 }
 0x14e   : > { %v1731_v22 = vpop.f32.mrf.mxu1  ;;  %v2064_v13 = vpop.f32.mrf.mxu0 }
 0x14f   : > { %v6003_v54 = vadd.f32 %v4704_v2, %v1860_v35  ;;  %v1858_v43 = vadd.f32 %v1731_v22, %v5883_v56 }
 0x150   : > { %v4657_v12 = vpop.f32.mrf.mxu1  ;;  %v4705_v26 = vpop.f32.mrf.mxu0 }
 0x151   : > { %v6006_v59 = vadd.f32 %v2064_v13, %v1858_v43  ;;  %v1861_v7 = vadd.f32 %v4657_v12, %v5885_v47 }
 0x152   : > { %v1734_v19 = vpop.f32.mrf.mxu1  ;;  %v2067_v5 = vpop.f32.mrf.mxu0 }
 0x153   : > { %v6009_v32 = vadd.f32 %v4705_v26, %v1861_v7  ;;  %v1859_v18 = vadd.f32 %v1734_v19, %v5889_v23 }
 0x154   : > { %v4660_v41 = vpop.f32.mrf.mxu1  ;;  %v4708_v24 = vpop.f32.mrf.mxu0 }
 0x155   : > { %v6012_v42 = vadd.f32 %v2067_v5, %v1859_v18  ;;  %v1864_v62 = vadd.f32 %v4660_v41, %v5893_v34 }
 0x156   : > { %v1747_v29 = vpop.f32.mrf.mxu1  ;;  %v2080_v56 = vpop.f32.mrf.mxu0 }
 0x157   : > { %v6015_v57 = vadd.f32 %v4708_v24, %v1864_v62  ;;  %v1862_v45 = vadd.f32 %v1747_v29, %v5895_v37 }
 0x158   : > { %v4661_v33 = vpop.f32.mrf.mxu1  ;;  %v4709_v47 = vpop.f32.mrf.mxu0 }
 0x159   : > { %v6018_v28 = vadd.f32 %v2080_v56, %v1862_v45  ;;  %v1865_v31 = vadd.f32 %v4661_v33, %v5898_v46 }
 0x15a   : > { %v1750_v4 = vpop.f32.mrf.mxu1  ;;  %v2083_v23 = vpop.f32.mrf.mxu0 }
 0x15b   : > { %v6021_v60 = vadd.f32 %v4709_v47, %v1865_v31  ;;  %v1863_v61 = vadd.f32 %v1750_v4, %v5903_v1 }
 0x15c   : > { %v4664_v58 = vpop.f32.mrf.mxu1  ;;  %v4712_v34 = vpop.f32.mrf.mxu0 }
 0x15d   : > { %v6024_v49 = vadd.f32 %v2083_v23, %v1863_v61  ;;  %v1868_v6 = vadd.f32 %v4664_v58, %v5908_v17 }
 0x15e   : > { %v1763_v16 = vpop.f32.mrf.mxu1  ;;  %v2096_v37 = vpop.f32.mrf.mxu0 }
 0x15f   : > { %v6027_v9 = vadd.f32 %v4712_v34, %v1868_v6  ;;  %v1866_v21 = vadd.f32 %v1763_v16, %v5911_v51 }
 0x160   : > { %v4665_v2 = vpop.f32.mrf.mxu1  ;;  %v4713_v46 = vpop.f32.mrf.mxu0 }
 0x161   : > { %v6030_v35 = vadd.f32 %v2096_v37, %v1866_v21  ;;  %v1869_v22 = vadd.f32 %v4665_v2, %v5914_v40 }
 0x162   : > { %v1766_v13 = vpop.f32.mrf.mxu1  ;;  %v2099_v1 = vpop.f32.mrf.mxu0 }
 0x163   : > { %v6033_v43 = vadd.f32 %v4713_v46, %v1869_v22  ;;  %v1867_v12 = vadd.f32 %v1766_v13, %v5919_v3 }
 0x164   : > { %v4668_v26 = vpop.f32.mrf.mxu1  ;;  %v4716_v17 = vpop.f32.mrf.mxu0 }
 0x165   : > { %v6036_v7 = vadd.f32 %v2099_v1, %v1867_v12  ;;  %v1872_v19 = vadd.f32 %v4668_v26, %v5924_v20 }
 0x166   : > { %v1779_v5 = vpop.f32.mrf.mxu1  ;;  %v2112_v51 = vpop.f32.mrf.mxu0 }
 0x167   : > { %v6039_v18 = vadd.f32 %v4716_v17, %v1872_v19  ;;  %v1870_v41 = vadd.f32 %v1779_v5, %v5927_v53 }
 0x168   : > { %v4669_v24 = vpop.f32.mrf.mxu1  ;;  %v4717_v40 = vpop.f32.mrf.mxu0 }
 0x169   : > { %v6042_v62 = vadd.f32 %v2112_v51, %v1870_v41  ;;  %v1873_v29 = vadd.f32 %v4669_v24, %v5930_v55 }
 0x16a   : > { %v1782_v56 = vpop.f32.mrf.mxu1  ;;  %v2115_v3 = vpop.f32.mrf.mxu0 }
 0x16b   : > { %v6045_v45 = vadd.f32 %v4717_v40, %v1873_v29  ;;  %v1871_v33 = vadd.f32 %v1782_v56, %v5935_v15 }
 0x16c   : > { %v4672_v47 = vpop.f32.mrf.mxu1  ;;  %v4720_v20 = vpop.f32.mrf.mxu0 }
 0x16d   : > { %v6048_v31 = vadd.f32 %v2115_v3, %v1871_v33  ;;  %v1876_v4 = vadd.f32 %v4672_v47, %v5940_v8 }
 0x16e   : > { %v1795_v23 = vpop.f32.mrf.mxu1  ;;  %v2128_v53 = vpop.f32.mrf.mxu0 }
 0x16f   : > { %v6051_v61 = vadd.f32 %v4720_v20, %v1876_v4  ;;  %v1874_v58 = vadd.f32 %v1795_v23, %v5943_v38 }
 0x170   : > { %v4673_v34 = vpop.f32.mrf.mxu1  ;;  %v4721_v55 = vpop.f32.mrf.mxu0 }
 0x171   : > { %v6054_v6 = vadd.f32 %v2128_v53, %v1874_v58  ;;  %v1877_v16 = vadd.f32 %v4673_v34, %v5948_v10 }
 0x172   : > { %v1798_v37 = vpop.f32.mrf.mxu1  ;;  %v2131_v15 = vpop.f32.mrf.mxu0 }
 0x173   : > { %v6057_v21 = vadd.f32 %v4721_v55, %v1877_v16  ;;  %v1875_v2 = vadd.f32 %v1798_v37, %v5954_v50 }
 0x174   : > { %v4676_v46 = vpop.f32.mrf.mxu1  ;;  %v4724_v8 = vpop.f32.mrf.mxu0 }
 0x175   : > { %v6060_v22 = vadd.f32 %v2131_v15, %v1875_v2  ;;  %v1880_v13 = vadd.f32 %v4676_v46, %v5959_v30 }
 0x176   : > { %v1811_v1 = vpop.f32.mrf.mxu1  ;;  %v2144_v38 = vpop.f32.mrf.mxu0 }
 0x177   : > { %v6063_v12 = vadd.f32 %v4724_v8, %v1880_v13  ;;  %v1878_v26 = vadd.f32 %v1811_v1, %v5962_v39 }
 0x178   : > { %v4677_v17 = vpop.f32.mrf.mxu1  ;;  %v4725_v10 = vpop.f32.mrf.mxu0 }
 0x179   : > { %v6066_v19 = vadd.f32 %v2144_v38, %v1878_v26  ;;  %v1881_v5 = vadd.f32 %v4677_v17, %v5965_v14 }
 0x17a   : > { %v1814_v51 = vpop.f32.mrf.mxu1  ;;  %v2147_v50 = vpop.f32.mrf.mxu0 }
 0x17b   : > { %v6069_v41 = vadd.f32 %v4725_v10, %v1881_v5  ;;  %v1879_v24 = vadd.f32 %v1814_v51, %v5973_v25 }
 0x17c   : > { %v4680_v40 = vpop.f32.mrf.mxu1  ;;  %v4728_v30 = vpop.f32.mrf.mxu0 }
 0x17d   : > { %v6072_v29 = vadd.f32 %v2147_v50, %v1879_v24  ;;  %v1884_v56 = vadd.f32 %v4680_v40, %v5979_v63 }
 0x17e   : > { %v1827_v3 = vpop.f32.mrf.mxu1  ;;  %v2160_v39 = vpop.f32.mrf.mxu0 }
 0x17f   : > { %v6075_v33 = vadd.f32 %v4728_v30, %v1884_v56  ;;  %v1882_v47 = vadd.f32 %v1827_v3, %v5982_v44 }
 0x180   : > { %v4681_v20 = vpop.f32.mrf.mxu1  ;;  %v4729_v14 = vpop.f32.mrf.mxu0 }
 0x181   : > { %v6078_v4 = vadd.f32 %v2160_v39, %v1882_v47  ;;  %v1885_v23 = vadd.f32 %v4681_v20, %v5985_v36 }
 0x182   : > { %v1830_v53 = vpop.f32.mrf.mxu1  ;;  %v2163_v25 = vpop.f32.mrf.mxu0 }
 0x183   : > { %v6081_v58 = vadd.f32 %v4729_v14, %v1885_v23  ;;  %v1883_v34 = vadd.f32 %v1830_v53, %v5988_v11 }
 0x184   : > { %v4684_v55 = vpop.f32.mrf.mxu1  ;;  %v4732_v63 = vpop.f32.mrf.mxu0 }
 0x185   : > { %6382 = vst [vmem:[#allocation4_spill] sm:$0xff] %v6081_v58  ;;  %v6084_v16 = vadd.f32 %v2163_v25, %v1883_v34  ;;  %v1888_v37 = vadd.f32 %v4684_v55, %v5991_v48 }
 0x186   : > { %v1843_v15 = vpop.f32.mrf.mxu1  ;;  %v2176_v44 = vpop.f32.mrf.mxu0 }
 0x187   : > { %6383 = vst [vmem:[#allocation3_spill] sm:$0xff] %v6084_v16  ;;  %v6087_v2 = vadd.f32 %v4732_v63, %v1888_v37  ;;  %v1886_v46 = vadd.f32 %v1843_v15, %v5994_v52 }
 0x188   : > { %v4685_v8 = vpop.f32.mrf.mxu1  ;;  %v4733_v36 = vpop.f32.mrf.mxu0 }
 0x189   : > { %v6090_v13 = vadd.f32 %v2176_v44, %v1886_v46  ;;  %v1889_v1 = vadd.f32 %v4685_v8, %v5997_v27 }
 0x18a   : > { %v1846_v38 = vpop.f32.mrf.mxu1  ;;  %v2179_v11 = vpop.f32.mrf.mxu0 }
 0x18b   : > { %v6093_v26 = vadd.f32 %v4733_v36, %v1889_v1  ;;  %v1887_v17 = vadd.f32 %v1846_v38, %v6000_v0 }
 0x18c   : > { %v4752_v10 = vpop.f32.mrf.mxu1  ;;  %v4800_v48 = vpop.f32.mrf.mxu0 }
 0x18d   : > { %6384 = vst [vmem:[#allocation8_spill] sm:$0xff] %v6093_v26  ;;  %v6096_v5 = vadd.f32 %v2179_v11, %v1887_v17  ;;  %v2523_v51 = vadd.f32 %v4752_v10, %v6003_v54 }
 0x18e   : > { %v2394_v50 = vpop.f32.mrf.mxu1  ;;  %v2717_v52 = vpop.f32.mrf.mxu0 }
 0x18f   : > { %6385 = vst [vmem:[#allocation5_spill] sm:$0xff] %v6096_v5  ;;  %v6099_v24 = vadd.f32 %v4800_v48, %v2523_v51  ;;  %v2521_v40 = vadd.f32 %v2394_v50, %v6006_v59 }
 0x190   : > { %v6102_v30 = vpop.f32.mrf.mxu1  ;;  %v6104_v27 = vpop.f32.mrf.mxu0 }
 0x191   : > { %v6106_v56 = vadd.f32 %v2717_v52, %v2521_v40 }
 0x192   : > { %v6108_v3 = vpop.f32.mrf.mxu1  ;;  %v6110_v0 = vpop.f32.mrf.mxu0 }
 0x194   : > { %v4756_v39 = vpop.f32.mrf.mxu1  ;;  %v4804_v47 = vpop.f32.mrf.mxu0 }
 0x195   : > { %v2527_v54 = vadd.f32 %v4756_v39, %v6015_v57 }
 0x196   : > { %v2410_v20 = vpop.f32.mrf.mxu1  ;;  %v2733_v14 = vpop.f32.mrf.mxu0 }
 0x197   : > { %v6113_v23 = vadd.f32 %v4804_v47, %v2527_v54  ;;  %v2525_v59 = vadd.f32 %v2410_v20, %v6018_v28 }
 0x198   : > { %v6116_v53 = vpop.f32.mrf.mxu1  ;;  %v6118_v25 = vpop.f32.mrf.mxu0 }
 0x199   : > { %v6120_v34 = vadd.f32 %v2733_v14, %v2525_v59 }
 0x19a   : > { %v6122_v55 = vpop.f32.mrf.mxu1  ;;  %v6124_v63 = vpop.f32.mrf.mxu0 }
 0x19c   : > { %v4760_v37 = vpop.f32.mrf.mxu1  ;;  %v4808_v15 = vpop.f32.mrf.mxu0 }
 0x19d   : > { %v2531_v57 = vadd.f32 %v4760_v37, %v6027_v9 }
 0x19e   : > { %v2426_v44 = vpop.f32.mrf.mxu1  ;;  %v2749_v46 = vpop.f32.mrf.mxu0 }
 0x19f   : > { %v6127_v8 = vadd.f32 %v4808_v15, %v2531_v57  ;;  %v2529_v28 = vadd.f32 %v2426_v44, %v6030_v35 }
 0x1a0   : > { %v6130_v36 = vpop.f32.mrf.mxu1  ;;  %v6132_v1 = vpop.f32.mrf.mxu0 }
 0x1a1   : > { %v6134_v38 = vadd.f32 %v2749_v46, %v2529_v28 }
 0x1a2   : > { %v6136_v11 = vpop.f32.mrf.mxu1  ;;  %v6138_v17 = vpop.f32.mrf.mxu0 }
 0x1a4   : > { %v4764_v10 = vpop.f32.mrf.mxu1  ;;  %v4812_v48 = vpop.f32.mrf.mxu0 }
 0x1a5   : > { %v2535_v9 = vadd.f32 %v4764_v10, %v6039_v18 }
 0x1a6   : > { %v2442_v51 = vpop.f32.mrf.mxu1  ;;  %v2765_v50 = vpop.f32.mrf.mxu0 }
 0x1a7   : > { %v6141_v52 = vadd.f32 %v4812_v48, %v2535_v9  ;;  %v2533_v35 = vadd.f32 %v2442_v51, %v6042_v62 }
 0x1a8   : > { %v6144_v40 = vpop.f32.mrf.mxu1  ;;  %v6146_v39 = vpop.f32.mrf.mxu0 }
 0x1a9   : > { %v6148_v47 = vadd.f32 %v2765_v50, %v2533_v35 }
 0x1aa   : > { %v6150_v54 = vpop.f32.mrf.mxu1  ;;  %v6152_v20 = vpop.f32.mrf.mxu0 }
 0x1ac   : > { %v4768_v14 = vpop.f32.mrf.mxu1  ;;  %v4816_v59 = vpop.f32.mrf.mxu0 }
 0x1ad   : > { %v2539_v18 = vadd.f32 %v4768_v14, %v6051_v61 }
 0x1ae   : > { %v2458_v37 = vpop.f32.mrf.mxu1  ;;  %v2781_v15 = vpop.f32.mrf.mxu0 }
 0x1af   : > { %v6155_v57 = vadd.f32 %v4816_v59, %v2539_v18  ;;  %v2537_v62 = vadd.f32 %v2458_v37, %v6054_v6 }
 0x1b0   : > { %v6158_v44 = vpop.f32.mrf.mxu1  ;;  %v6160_v46 = vpop.f32.mrf.mxu0 }
 0x1b1   : > { %v6162_v28 = vadd.f32 %v2781_v15, %v2537_v62 }
 0x1b2   : > { %v6164_v10 = vpop.f32.mrf.mxu1  ;;  %v6166_v48 = vpop.f32.mrf.mxu0 }
 0x1b4   : > { %v4772_v9 = vpop.f32.mrf.mxu1  ;;  %v4820_v51 = vpop.f32.mrf.mxu0 }
 0x1b5   : > { %v2543_v61 = vadd.f32 %v4772_v9, %v6063_v12 }
 0x1b6   : > { %v2474_v50 = vpop.f32.mrf.mxu1  ;;  %v2797_v35 = vpop.f32.mrf.mxu0 }
 0x1b7   : > { %v6169_v14 = vadd.f32 %v4820_v51, %v2543_v61  ;;  %v2541_v6 = vadd.f32 %v2474_v50, %v6066_v19 }
 0x1b8   : > { %v6172_v59 = vpop.f32.mrf.mxu1  ;;  %v6174_v18 = vpop.f32.mrf.mxu0 }
 0x1b9   : > { %6386 = vst [vmem:[#allocation6_spill] sm:$0xff] %v6174_v18  ;;  %v6176_v37 = vadd.f32 %v2797_v35, %v2541_v6 }
 0x1ba   : > { %v6178_v15 = vpop.f32.mrf.mxu1  ;;  %v6180_v62 = vpop.f32.mrf.mxu0 }
 0x1bb   : > { %6387 = vst [vmem:[#allocation7_spill] sm:$0xff] %v6176_v37  ;;  %6388 = vst [vmem:[#allocation9_spill] sm:$0xff] %v6180_v62 }
 0x1bc   : > { %v4776_v5 = vpop.f32.mrf.mxu1  ;;  %v4824_v26 = vpop.f32.mrf.mxu0 }
 0x1bd   : > { %v2547_v12 = vadd.f32 %v4776_v5, %v6075_v33 }
 0x1be   : > { %v2490_v9 = vpop.f32.mrf.mxu1  ;;  %v2813_v16 = vpop.f32.mrf.mxu0 }
 0x1bf   : > { %v6183_v51 = vadd.f32 %v4824_v26, %v2547_v12  ;;  %v2545_v19 = vadd.f32 %v2490_v9, %v6078_v4 }
 0x1c0   : > { %v6186_v61 = vpop.f32.mrf.mxu1  ;;  %v6188_v50 = vpop.f32.mrf.mxu0 }
 0x1c1   : > { %v6190_v35 = vadd.f32 %v2813_v16, %v2545_v19 }
 0x1c2   : > { %v6192_v6 = vpop.f32.mrf.mxu1  ;;  %v6194_v58 = vpop.f32.mrf.mxu0 }
 0x1c3   : > { %6389 = vst [vmem:[#allocation10_spill] sm:$0xff] %v6190_v35  ;;  %6390 = vst [vmem:[#allocation11_spill] sm:$0xff] %v6194_v58  ;;  %v2524_v58 = vadd.f32 %v6102_v30, %v6009_v32 }
 0x1c4   : > { %v4780_v62 = vpop.f32.mrf.mxu1  ;;  %v4828_v37 = vpop.f32.mrf.mxu0 }
 0x1c5   : > { %v2551_v33 = vadd.f32 %v4780_v62, %v6087_v2 }
 0x1c6   : > { %v2506_v5 = vpop.f32.mrf.mxu1  ;;  %v2829_v18 = vpop.f32.mrf.mxu0 }
 0x1c7   : > { %v6197_v26 = vadd.f32 %v4828_v37, %v2551_v33  ;;  %v2549_v4 = vadd.f32 %v2506_v5, %v6090_v13  ;;  %v2522_v37 = vadd.f32 %v6108_v3, %v6012_v42 }
 0x1c8   : > { %v6200_v12 = vpop.f32.mrf.mxu1  ;;  %v6202_v9 = vpop.f32.mrf.mxu0 }
 0x1c9   : > { %6391 = vst [vmem:[#allocation12_spill] sm:$0xff] %v6197_v26  ;;  %6392 = vst [vmem:[#allocation13_spill] sm:$0xff] %v6202_v9  ;;  %v6204_v16 = vadd.f32 %v2829_v18, %v2549_v4  ;;  %v2847_v9 = vadd.f32 %v6104_v27, %v2524_v58 }
 0x1ca   : > { %v6206_v19 = vpop.f32.mrf.mxu1  ;;  %v6208_v35 = vpop.f32.mrf.mxu0 }
 0x1cb   : > { %6393 = vst [vmem:[#allocation14_spill] sm:$0xff] %v6204_v16  ;;  %6394 = vst [vmem:[#allocation15_spill] sm:$0xff] %v6206_v19  ;;  %v2845_v16 = vadd.f32 %v6110_v0, %v2522_v37 }
 0x1cc   : > { %6395 = vst [vmem:[#allocation16_spill] sm:$0xff] %v6208_v35  ;;  %v4848_v2 = vpop.f32.mrf.mxu1  ;;  %v4896_v62 = vpop.f32.mrf.mxu0  ;;  %v6220_v35 = vld [vmem:[%s6338_s2] ss:$0 sm:$0xff] }
 0x1cd   : > { %v3179_v13 = vadd.f32 %v4848_v2, %v6099_v24 }
 0x1ce   : > { %v3050_v33 = vpop.f32.mrf.mxu1  ;;  %v3380_v5 = vpop.f32.mrf.mxu0 }
 0x1cf   : > { %v3509_v18 = vadd.f32 %v4896_v62, %v3179_v13  ;;  %v3177_v4 = vadd.f32 %v3050_v33, %v6106_v56  ;;  %v2528_v56 = vadd.f32 %v6116_v53, %v6021_v60  ;;  %v2526_v62 = vadd.f32 %v6122_v55, %v6024_v49 }
 0x1d0   : > { %v4849_v32 = vpop.f32.mrf.mxu1  ;;  %v4897_v30 = vpop.f32.mrf.mxu0 }
 0x1d1   : > { %v3507_v42 = vadd.f32 %v3380_v5, %v3177_v4  ;;  %v3180_v3 = vadd.f32 %v4849_v32, %v2847_v9  ;;  %v3612_v26 = vadd.f32 %v6220_v35, %v3509_v18  ;;  %v2851_v49 = vadd.f32 %v6118_v25, %v2528_v56 }
 0x1d2   : > { %v3053_v24 = vpop.f32.mrf.mxu1  ;;  %v3383_v2 = vpop.f32.mrf.mxu0  ;;  %v2849_v53 = vadd.f32 %v6124_v63, %v2526_v62  ;;  %v2532_v25 = vadd.f32 %v6130_v36, %v6033_v43 }
 0x1d3   : > { %v3510_v58 = vadd.f32 %v4897_v30, %v3180_v3  ;;  %v3178_v27 = vadd.f32 %v3053_v24, %v2845_v16  ;;  %v3610_v19 = vadd.f32 %v6220_v35, %v3507_v42  ;;  %v3644_v4 = vmax.f32 %v3612_v26, 0.0 }
 0x1d4   : > { %v4852_v13 = vpop.f32.mrf.mxu1  ;;  %v4900_v33 = vpop.f32.mrf.mxu0 }
 0x1d5   : > { %v3613_v0 = vadd.f32 %v6220_v35, %v3510_v58  ;;  %v3508_v9 = vadd.f32 %v3383_v2, %v3178_v27  ;;  %v3183_v37 = vadd.f32 %v4852_v13, %v6113_v23  ;;  %v3642_v26 = vmax.f32 %v3610_v19, 0.0 }
 0x1d6   : > { %v3066_v5 = vpop.f32.mrf.mxu1  ;;  %v3396_v18 = vpop.f32.mrf.mxu0 }
 0x1d7   : > { %v3645_v16 = vmax.f32 %v3613_v0, 0.0  ;;  %v3611_v32 = vadd.f32 %v6220_v35, %v3508_v9  ;;  %v3181_v60 = vadd.f32 %v3066_v5, %v6120_v34  ;;  %v3513_v55 = vadd.f32 %v4900_v33, %v3183_v37 }
 0x1d8   : > { %v4853_v23 = vpop.f32.mrf.mxu1  ;;  %v4901_v30 = vpop.f32.mrf.mxu0  ;;  %v2530_v37 = vadd.f32 %v6136_v11, %v6036_v7 }
 0x1d9   : > { %v4191_v42 = vpack.c.bf16 %v3645_v16, %v3644_v4  ;;  %v3643_v3 = vmax.f32 %v3611_v32, 0.0  ;;  %v3511_v24 = vadd.f32 %v3396_v18, %v3181_v60  ;;  %v3184_v2 = vadd.f32 %v4853_v23, %v2851_v49 }
 0x1da   : > { %v3069_v34 = vpop.f32.mrf.mxu1  ;;  %v3399_v58 = vpop.f32.mrf.mxu0  ;;  %v3616_v56 = vadd.f32 %v6220_v35, %v3513_v55  ;;  %v2855_v18 = vadd.f32 %v6132_v1, %v2532_v25  ;;  %v2853_v11 = vadd.f32 %v6138_v17, %v2530_v37 }
 0x1db   : > { %4263 = vst [vmem:[%s6239_s13 + $0x8] sm:$0xff] %v4191_v42   ;;  %v4186_v63 = vpack.c.bf16 %v3643_v3, %v3642_v26  ;;  %v3182_v27 = vadd.f32 %v3069_v34, %v2849_v53  ;;  %v3514_v62 = vadd.f32 %v4901_v30, %v3184_v2  ;;  %v3614_v19 = vadd.f32 %v6220_v35, %v3511_v24 }
 0x1dc   : > { %v4856_v13 = vpop.f32.mrf.mxu1  ;;  %v4904_v33 = vpop.f32.mrf.mxu0  ;;  %v3648_v60 = vmax.f32 %v3616_v56, 0.0  ;;  %v2536_v30 = vadd.f32 %v6144_v40, %v6045_v45 }
 0x1dd   : > { %4187 = vst [vmem:[%s6239_s13] sm:$0xff] %v4186_v63   ;;  %v3512_v0 = vadd.f32 %v3399_v58, %v3182_v27  ;;  %v3187_v9 = vadd.f32 %v4856_v13, %v6127_v8  ;;  %v3617_v5 = vadd.f32 %v6220_v35, %v3514_v62  ;;  %v3646_v8 = vmax.f32 %v3614_v19, 0.0 }
 0x1de   : > { %v3082_v43 = vpop.f32.mrf.mxu1  ;;  %v3412_v36 = vpop.f32.mrf.mxu0  ;;  %v2534_v63 = vadd.f32 %v6150_v54, %v6048_v31  ;;  %v2859_v40 = vadd.f32 %v6146_v39, %v2536_v30 }
 0x1df   : > { %v3615_v4 = vadd.f32 %v6220_v35, %v3512_v0  ;;  %v3517_v16 = vadd.f32 %v4904_v33, %v3187_v9  ;;  %v3185_v32 = vadd.f32 %v3082_v43, %v6134_v38  ;;  %v3649_v49 = vmax.f32 %v3617_v5, 0.0 }
 0x1e0   : > { %v4857_v53 = vpop.f32.mrf.mxu1  ;;  %v4905_v55 = vpop.f32.mrf.mxu0  ;;  %v2857_v5 = vadd.f32 %v6152_v20, %v2534_v63 }
 0x1e1   : > { %v3647_v23 = vmax.f32 %v3615_v4, 0.0  ;;  %v3188_v7 = vadd.f32 %v4857_v53, %v2855_v18  ;;  %v4201_v1 = vpack.c.bf16 %v3649_v49, %v3648_v60  ;;  %v3515_v26 = vadd.f32 %v3412_v36, %v3185_v32 }
 0x1e2   : > { %v3085_v42 = vpop.f32.mrf.mxu1  ;;  %v3415_v3 = vpop.f32.mrf.mxu0  ;;  %v3620_v38 = vadd.f32 %v6220_v35, %v3517_v16  ;;  %v2538_v53 = vadd.f32 %v6164_v10, %v6060_v22 }
 0x1e3   : > { %v4196_v24 = vpack.c.bf16 %v3647_v23, %v3646_v8  ;;  %v3518_v2 = vadd.f32 %v4905_v55, %v3188_v7  ;;  %4265 = vst [vmem:[%s6239_s13 + $0x18] sm:$0xff] %v4201_v1   ;;  %v3186_v34 = vadd.f32 %v3085_v42, %v2853_v11  ;;  %v3618_v27 = vadd.f32 %v6220_v35, %v3515_v26 }
 0x1e4   : > { %v4860_v58 = vpop.f32.mrf.mxu1  ;;  %v4908_v25 = vpop.f32.mrf.mxu0  ;;  %v3652_v33 = vmax.f32 %v3620_v38, 0.0  ;;  %v2861_v10 = vadd.f32 %v6166_v48, %v2538_v53 }
 0x1e5   : > { %4264 = vst [vmem:[%s6239_s13 + $0x10] sm:$0xff] %v4196_v24   ;;  %v3621_v17 = vadd.f32 %v6220_v35, %v3518_v2  ;;  %v3191_v45 = vadd.f32 %v4860_v58, %v6141_v52  ;;  %v3516_v56 = vadd.f32 %v3415_v3, %v3186_v34  ;;  %v3650_v36 = vmax.f32 %v3618_v27, 0.0 }
 0x1e6   : > { %v3098_v62 = vpop.f32.mrf.mxu1  ;;  %v3428_v13 = vpop.f32.mrf.mxu0 }
 0x1e7   : > { %v3653_v19 = vmax.f32 %v3621_v17, 0.0  ;;  %v3521_v0 = vadd.f32 %v4908_v25, %v3191_v45  ;;  %v3189_v9 = vadd.f32 %v3098_v62, %v6148_v47  ;;  %v3619_v31 = vadd.f32 %v6220_v35, %v3516_v56 }
 0x1e8   : > { %v4861_v54 = vpop.f32.mrf.mxu1  ;;  %v4909_v37 = vpop.f32.mrf.mxu0  ;;  %v2540_v47 = vadd.f32 %v6158_v44, %v6057_v21 }
 0x1e9   : > { %v4211_v52 = vpack.c.bf16 %v3653_v19, %v3652_v33  ;;  %v3519_v43 = vadd.f32 %v3428_v13, %v3189_v9  ;;  %v3192_v39 = vadd.f32 %v4861_v54, %v2859_v40  ;;  %v3651_v18 = vmax.f32 %v3619_v31, 0.0  ;;  %v6396_v31 = vld [vmem:[#allocation6_spill] sm:$0xff] }
 0x1ea   : > { %v3101_v4 = vpop.f32.mrf.mxu1  ;;  %v3431_v16 = vpop.f32.mrf.mxu0  ;;  %v3624_v32 = vadd.f32 %v6220_v35, %v3521_v0  ;;  %v2863_v44 = vadd.f32 %v6160_v46, %v2540_v47  ;;  %v2544_v40 = vadd.f32 %v6172_v59, %v6069_v41  ;;  %v2542_v0 = vadd.f32 %v6178_v15, %v6072_v29  ;;  %v6398_v15 = vld [vmem:[#allocation9_spill] sm:$0xff] }
 0x1eb   : > { %4267 = vst [vmem:[%s6239_s13 + $0x28] sm:$0xff] %v4211_v52   ;;  %v3522_v60 = vadd.f32 %v4909_v37, %v3192_v39  ;;  %v3190_v49 = vadd.f32 %v3101_v4, %v2857_v5  ;;  %v4206_v20 = vpack.c.bf16 %v3651_v18, %v3650_v36  ;;  %v3622_v23 = vadd.f32 %v6220_v35, %v3519_v43  ;;  %v6397_v52 = vld [vmem:[#allocation7_spill] sm:$0xff] }
 0x1ec   : > { %v4864_v55 = vpop.f32.mrf.mxu1  ;;  %v4912_v8 = vpop.f32.mrf.mxu0  ;;  %v3656_v42 = vmax.f32 %v3624_v32, 0.0  ;;  %v2867_v54 = vadd.f32 %v6396_v31, %v2544_v40  ;;  %v2865_v32 = vadd.f32 %v6398_v15, %v2542_v0  ;;  %v6404_v0 = vld [vmem:[#allocation5_spill] sm:$0xff] }
 0x1ed   : > { %v3625_v7 = vadd.f32 %v6220_v35, %v3522_v60  ;;  %v3520_v11 = vadd.f32 %v3431_v16, %v3190_v49  ;;  %v3195_v30 = vadd.f32 %v4864_v55, %v6155_v57  ;;  %4266 = vst [vmem:[%s6239_s13 + $0x20] sm:$0xff] %v4206_v20   ;;  %v3654_v34 = vmax.f32 %v3622_v23, 0.0  ;;  %v6399_v60 = vld [vmem:[#allocation4_spill] sm:$0xff]  ;;  %v6408_v15 = vld [vmem:[#allocation13_spill] sm:$0xff] }
 0x1ee   : > { %v3114_v1 = vpop.f32.mrf.mxu1  ;;  %v3444_v26 = vpop.f32.mrf.mxu0  ;;  %v2548_v49 = vadd.f32 %v6186_v61, %v6399_v60  ;;  %v6409_v60 = vld [vmem:[#allocation16_spill] sm:$0xff] }
 0x1ef   : > { %v3657_v3 = vmax.f32 %v3625_v7, 0.0  ;;  %v3623_v21 = vadd.f32 %v6220_v35, %v3520_v11  ;;  %v3193_v22 = vadd.f32 %v3114_v1, %v6162_v28  ;;  %v3525_v24 = vadd.f32 %v4912_v8, %v3195_v30 }
 0x1f0   : > { %v4865_v38 = vpop.f32.mrf.mxu1  ;;  %v4913_v2 = vpop.f32.mrf.mxu0 }
 0x1f1   : > { %v4221_v57 = vpack.c.bf16 %v3657_v3, %v3656_v42  ;;  %v3655_v58 = vmax.f32 %v3623_v21, 0.0  ;;  %v3523_v25 = vadd.f32 %v3444_v26, %v3193_v22  ;;  %v3196_v63 = vadd.f32 %v4865_v38, %v2863_v44  ;;  %v6400_v26 = vld [vmem:[#allocation3_spill] sm:$0xff] }
 0x1f2   : > { %v3117_v17 = vpop.f32.mrf.mxu1  ;;  %v3447_v45 = vpop.f32.mrf.mxu0  ;;  %v3628_v46 = vadd.f32 %v6220_v35, %v3525_v24  ;;  %v2546_v42 = vadd.f32 %v6192_v6, %v6400_v26  ;;  %v2871_v21 = vadd.f32 %v6188_v50, %v2548_v49 }
 0x1f3   : > { %4269 = vst [vmem:[%s6239_s13 + $0x38] sm:$0xff] %v4221_v57   ;;  %v4216_v28 = vpack.c.bf16 %v3655_v58, %v3654_v34  ;;  %v3194_v27 = vadd.f32 %v3117_v17, %v2861_v10  ;;  %v3526_v48 = vadd.f32 %v4913_v2, %v3196_v63  ;;  %v3626_v13 = vadd.f32 %v6220_v35, %v3523_v25  ;;  %v6401_v57 = vld [vmem:[#allocation10_spill] sm:$0xff]  ;;  %v6402_v17 = vld [vmem:[#allocation11_spill] sm:$0xff] }
 0x1f4   : > { %v4868_v56 = vpop.f32.mrf.mxu1  ;;  %v4916_v62 = vpop.f32.mrf.mxu0  ;;  %v3660_v39 = vmax.f32 %v3628_v46, 0.0 }
 0x1f5   : > { %4268 = vst [vmem:[%s6239_s13 + $0x30] sm:$0xff] %v4216_v28   ;;  %v3524_v33 = vadd.f32 %v3447_v45, %v3194_v27  ;;  %v3199_v19 = vadd.f32 %v4868_v56, %v6169_v14  ;;  %v3629_v9 = vadd.f32 %v6220_v35, %v3526_v48  ;;  %v3658_v14 = vmax.f32 %v3626_v13, 0.0 }
 0x1f6   : > { %v3130_v41 = vpop.f32.mrf.mxu1  ;;  %v3460_v59 = vpop.f32.mrf.mxu0  ;;  %v2869_v45 = vadd.f32 %v6402_v17, %v2546_v42 }
 0x1f7   : > { %v3627_v37 = vadd.f32 %v6220_v35, %v3524_v33  ;;  %v3529_v5 = vadd.f32 %v4916_v62, %v3199_v19  ;;  %v3197_v43 = vadd.f32 %v3130_v41, %v6397_v52  ;;  %v3661_v36 = vmax.f32 %v3629_v9, 0.0  ;;  %v6403_v33 = vld [vmem:[#allocation8_spill] sm:$0xff]  ;;  %v6405_v9 = vld [vmem:[#allocation15_spill] sm:$0xff] }
 0x1f8   : > { %v4869_v18 = vpop.f32.mrf.mxu1  ;;  %v4917_v4 = vpop.f32.mrf.mxu0  ;;  %v2552_v19 = vadd.f32 %v6200_v12, %v6403_v33  ;;  %v2550_v41 = vadd.f32 %v6405_v9, %v6404_v0 }
 0x1f9   : > { %v3659_v16 = vmax.f32 %v3627_v37, 0.0  ;;  %v3200_v29 = vadd.f32 %v4869_v18, %v2867_v54  ;;  %v4231_v47 = vpack.c.bf16 %v3661_v36, %v3660_v39  ;;  %v3527_v53 = vadd.f32 %v3460_v59, %v3197_v43  ;;  %v6406_v43 = vld [vmem:[#allocation12_spill] sm:$0xff] }
 0x1fa   : > { %v3133_v20 = vpop.f32.mrf.mxu1  ;;  %v3463_v55 = vpop.f32.mrf.mxu0  ;;  %v3632_v23 = vadd.f32 %v6220_v35, %v3529_v5  ;;  %v2873_v49 = vadd.f32 %v6409_v60, %v2550_v41 }
 0x1fb   : > { %v4226_v8 = vpack.c.bf16 %v3659_v16, %v3658_v14  ;;  %v3530_v7 = vadd.f32 %v4917_v4, %v3200_v29  ;;  %4271 = vst [vmem:[%s6239_s13 + $0x48] sm:$0xff] %v4231_v47   ;;  %v3198_v11 = vadd.f32 %v3133_v20, %v2865_v32  ;;  %v3630_v22 = vadd.f32 %v6220_v35, %v3527_v53  ;;  %v6407_v16 = vld [vmem:[#allocation14_spill] sm:$0xff] }
 0x1fc   : > { %v4872_v30 = vpop.f32.mrf.mxu1  ;;  %v4920_v1 = vpop.f32.mrf.mxu0  ;;  %v3664_v38 = vmax.f32 %v3632_v23, 0.0  ;;  %v2875_v32 = vadd.f32 %v6408_v15, %v2552_v19 }
 0x1fd   : > { %4270 = vst [vmem:[%s6239_s13 + $0x40] sm:$0xff] %v4226_v8   ;;  %v3633_v3 = vadd.f32 %v6220_v35, %v3530_v7  ;;  %v3203_v61 = vadd.f32 %v4872_v30, %v6183_v51  ;;  %v3528_v44 = vadd.f32 %v3463_v55, %v3198_v11  ;;  %v3662_v28 = vmax.f32 %v3630_v22, 0.0 }
 0x1fe   : > { %v3146_v10 = vpop.f32.mrf.mxu1  ;;  %v3476_v24 = vpop.f32.mrf.mxu0 }
 0x1ff   : > { %v3665_v2 = vmax.f32 %v3633_v3, 0.0  ;;  %v3533_v34 = vadd.f32 %v4920_v1, %v3203_v61  ;;  %v3201_v58 = vadd.f32 %v3146_v10, %v6401_v57  ;;  %v3631_v6 = vadd.f32 %v6220_v35, %v3528_v44 }
 0x200   : > { %v4873_v25 = vpop.f32.mrf.mxu1  ;;  %v4921_v63 = vpop.f32.mrf.mxu0 }
 0x201   : > { %v4241_v51 = vpack.c.bf16 %v3665_v2, %v3664_v38  ;;  %v3531_v40 = vadd.f32 %v3476_v24, %v3201_v58  ;;  %v3204_v50 = vadd.f32 %v4873_v25, %v2871_v21  ;;  %v3663_v27 = vmax.f32 %v3631_v6, 0.0 }
 0x202   : > { %v3149_v46 = vpop.f32.mrf.mxu1  ;;  %v3479_v48 = vpop.f32.mrf.mxu0  ;;  %v3636_v56 = vadd.f32 %v6220_v35, %v3533_v34 }
 0x203   : > { %4273 = vst [vmem:[%s6239_s13 + $0x58] sm:$0xff] %v4241_v51   ;;  %v3534_v62 = vadd.f32 %v4921_v63, %v3204_v50  ;;  %v3202_v13 = vadd.f32 %v3149_v46, %v2869_v45  ;;  %v4236_v59 = vpack.c.bf16 %v3663_v27, %v3662_v28  ;;  %v3634_v37 = vadd.f32 %v6220_v35, %v3531_v40 }
 0x204   : > { %v4876_v31 = vpop.f32.mrf.mxu1  ;;  %v4924_v54 = vpop.f32.mrf.mxu0  ;;  %v3668_v4 = vmax.f32 %v3636_v56, 0.0 }
 0x205   : > { %v3637_v5 = vadd.f32 %v6220_v35, %v3534_v62  ;;  %v3532_v52 = vadd.f32 %v3479_v48, %v3202_v13  ;;  %v3207_v39 = vadd.f32 %v4876_v31, %v6406_v43  ;;  %4272 = vst [vmem:[%s6239_s13 + $0x50] sm:$0xff] %v4236_v59   ;;  %v3666_v55 = vmax.f32 %v3634_v37, 0.0 }
 0x206   : > { %v3162_v36 = vpop.f32.mrf.mxu1  ;;  %v3492_v18 = vpop.f32.mrf.mxu0 }
 0x207   : > { %v3669_v14 = vmax.f32 %v3637_v5, 0.0  ;;  %v3635_v12 = vadd.f32 %v6220_v35, %v3532_v52  ;;  %v3205_v29 = vadd.f32 %v3162_v36, %v6407_v16  ;;  %v3537_v47 = vadd.f32 %v4924_v54, %v3207_v39 }
 0x208   : > { %v4877_v53 = vpop.f32.mrf.mxu1  ;;  %v4925_v20 = vpop.f32.mrf.mxu0 }
 0x209   : > { %v4251_v8 = vpack.c.bf16 %v3669_v14, %v3668_v4  ;;  %v3667_v23 = vmax.f32 %v3635_v12, 0.0  ;;  %v3535_v7 = vadd.f32 %v3492_v18, %v3205_v29  ;;  %v3208_v11 = vadd.f32 %v4877_v53, %v2875_v32 }
 0x20a   : > { %v3165_v30 = vpop.f32.mrf.mxu1  ;;  %v3640_v42 = vadd.f32 %v6220_v35, %v3537_v47  ;;  %v3495_v61 = vpop.f32.mrf.mxu0 }
 0x20b   : > { %4275 = vst [vmem:[%s6239_s13 + $0x68] sm:$0xff] %v4251_v8   ;;  %v4246_v1 = vpack.c.bf16 %v3667_v23, %v3666_v55  ;;  %v3206_v26 = vadd.f32 %v3165_v30, %v2873_v49  ;;  %v3538_v3 = vadd.f32 %v4925_v20, %v3208_v11  ;;  %v3638_v21 = vadd.f32 %v6220_v35, %v3535_v7 }
 0x20c   : > { %v3672_v24 = vmax.f32 %v3640_v42, 0.0 }
 0x20d   : > { %4274 = vst [vmem:[%s6239_s13 + $0x60] sm:$0xff] %v4246_v1   ;;  %v3536_v22 = vadd.f32 %v3495_v61, %v3206_v26  ;;  %v3641_v44 = vadd.f32 %v6220_v35, %v3538_v3  ;;  %v3670_v2 = vmax.f32 %v3638_v21, 0.0 }
 0x20f   : > { %v3639_v10 = vadd.f32 %v6220_v35, %v3536_v22  ;;  %v3673_v38 = vmax.f32 %v3641_v44, 0.0 }
 0x211   : > { %v3671_v34 = vmax.f32 %v3639_v10, 0.0  ;;  %v4261_v57 = vpack.c.bf16 %v3673_v38, %v3672_v24 }
 0x213   : > { %v4256_v58 = vpack.c.bf16 %v3671_v34, %v3670_v2  ;;  %4277 = vst [vmem:[%s6239_s13 + $0x78] sm:$0xff] %v4261_v57  }
 0x215   : > { %4276 = vst [vmem:[%s6239_s13 + $0x70] sm:$0xff] %v4256_v58  }
 0x216 PF: > { %s13_s12 = sadd.s32 1, %s5065_s12  }
 0x217   : > { %p10_p4 = scmp.ge.s32.totalorder %s13_s12, 4  }
 0x219   :  { %12 = sbr.rel (!%p10_p4) target bundleno = 1 (0x1), region = 70 }

// kernel: share_erm_forward.5
= control target key start
LH: loop header
LB: loop body
LE: loop exit
PB: predicated region body
PF: predicated region fallthrough
CT: control target
= control target key end

     0   :  { %17 = vsyncpa [#allocation4], 0  ;;  %s7727_s0 = inlined_call_operand.vmem [shape: bf16[2,18,18,128], index: 0, kind: input, shape index: {}]   ;;  %s7728_s1 = inlined_call_operand.vmem [shape: bf16[2,16,16,128], index: 1, kind: input, shape index: {}]   ;;  %s7729_s2 = inlined_call_operand.vmem [shape: bf16[9,128,128], index: 2, kind: input, shape index: {}]   ;;  %s7730_s3 = inlined_call_operand.vmem [shape: f32[1,128], index: 3, kind: input, shape index: {}]   ;;  %s7731_s4 = inlined_call_operand.vmem [shape: bf16[128,128], index: 4, kind: input, shape index: {}]   ;;  %s7732_s5 = inlined_call_operand.vmem [shape: f32[1,128], index: 5, kind: input, shape index: {}]   ;;  %s7733_s6 = inlined_call_operand.vmem [shape: bf16[128,128], index: 6, kind: input, shape index: {}]   ;;  %s7734_s7 = inlined_call_operand.vmem [shape: f32[1,128], index: 7, kind: input, shape index: {}]   ;;  %s7735_s8 = inlined_call_operand.vmem [shape: bf16[128,128], index: 8, kind: input, shape index: {}]   ;;  %s7736_s9 = inlined_call_operand.vmem [shape: f32[1,128], index: 9, kind: input, shape index: {}]   ;;  %s7737_s10 = inlined_call_operand.vmem [shape: bf16[128,128], index: 10, kind: input, shape index: {}]   ;;  %s7738_s11 = inlined_call_operand.vmem [shape: f32[1,128], index: 11, kind: input, shape index: {}]   ;;  %s7739_s12 = inlined_call_operand.hbm [shape: f32[2,1,128], index: 12, kind: output, shape index: {}]  }
   0x1   :  { %19 = vsyncpa [#allocation4 + $0x1], 0  ;;  %s6022_s21 = smov 0   ;;  %s6024_s22 = smov 0  }
   0x2   :  { %s6026_s23 = smov 0   ;;  %s6028_s24 = smov 0  }
   0x3 LB: > { %7796 = sst [smem:[#allocation6_spill]] %s5948_s23  ;;  %s6043_s25 = sadd.s32 4294967295, %s5952_s24   ;;  %s5952_s24 = sphi %s6028_s24, %s7937_s24   ;;  %s5948_s23 = sphi %s6026_s23, %s7934_s23   ;;  %s5944_s22 = sphi %s6024_s22, %s7936_s22   ;;  %s5940_s21 = sphi %s6022_s21, %s7935_s21  }
   0x4   : > { %s4601_s26 = sadd.s32 4294967294, %s5952_s24   ;;  %s6047_s27 = sadd.s32 1, %s5952_s24  }
   0x5   : > { %s294_s28 = sadd.s32 1, %s5948_s23  ;;  %s291_s29 = ssub.s32 %s5952_s24, %s6047_s27 }
   0x6   : > { %p304_p0 = scmp.ne.s32.totalorder %s5948_s23, %s5944_s22  ;;  %p292_p1 = scmp.eq.s32.totalorder %s291_s29, 0 }
   0x7   : > { %p305_p2 = scmp.eq.s32.totalorder %s6043_s25, 1  ;;  %p310_p3 = scmp.ne.s32.totalorder %s5944_s22, %s5940_s21 }
   0x8   : > { %p311_p4 = scmp.eq.s32.totalorder %s4601_s26, 1  ;;  %p4604_p7 = scmp.ge.s32.totalorder %s5952_s24, 1 }
   0x9   : > { %s6058_s30 = scalar_select %p292_p1, %s5948_s23, %s294_s28  }
   0xa   : > { %p6060_p5 = por %p305_p2, %p304_p0  ;;  %p6064_p6 = por %p311_p4, %p310_p3 }
   0xb   : > { %7797 = sst [smem:[#allocation7_spill]] %s6058_s30  ;;  %p375_p8 = scmp.lt.s32.totalorder %s5952_s24, 3 }
   0xd   : > { %p376_p9 = pnand %p4604_p7, %p375_p8 }
   0xf   : > { %379 = sbr.rel (%p376_p9) target bundleno = 1400 (0x578), region = 68 }
  0x14   : > { %v5752_v0 = vld [vmem:[%s7729_s2 + $0x38] sm:$0xff]   ;;  %p421_p10 = scmp.lt.s32.totalorder %s6043_s25, 1  ;;  %v5754_v2 = vld [vmem:[%s7729_s2 + $0x30] sm:$0xff]   ;;  %v5756_v4 = vld [vmem:[%s7729_s2 + $0x28] sm:$0xff]   ;;  %vm957_vm0 = vcmask 1046528   ;;  %vm1408_vm1 = vcmask 1045504  }
  0x15   : > { %v5753_v1 = vld [vmem:[%s7729_s2 + $0x78] sm:$0xff]   ;;  %5198 = vmatprep.subr.bf16.mxu0 %v5752_v0  ;;  %v5755_v3 = vld [vmem:[%s7729_s2 + $0x70] sm:$0xff]   ;;  %v5757_v5 = vld [vmem:[%s7729_s2 + $0x68] sm:$0xff]   ;;  %vm5955_vm2 = vmmov 0   ;;  %s4863_s20 = sshll.u32 %s6043_s25, 4 }
  0x16   : > { %5246 = vmatprep.subr.bf16.mxu1 %v5753_v1  ;;  %5199 = vmatpush3.bf16.msra.mxu0 %v5752_v0  ;;  %s6090_s18 = scalar_select %p421_p10, %s6043_s25, 1  ;;  %v5758_v6 = vld [vmem:[%s7729_s2 + $0x20] sm:$0xff]   ;;  %v5760_v8 = vld [vmem:[%s7729_s2 + $0x18] sm:$0xff]   ;;  %v5762_v10 = vld [vmem:[%s7729_s2 + $0x10] sm:$0xff]  }
  0x17   : > { %5247 = vmatpush3.bf16.msra.mxu1 %v5753_v1  ;;  %5200 = vmatprep.subr.bf16.mxu0 %v5754_v2  ;;  %v5759_v7 = vld [vmem:[%s7729_s2 + $0x60] sm:$0xff]   ;;  %v5761_v9 = vld [vmem:[%s7729_s2 + $0x58] sm:$0xff]   ;;  %v5763_v11 = vld [vmem:[%s7729_s2 + $0x50] sm:$0xff]   ;;  %s7686_s16 = scalar_lea.hbm %s7739_s12, %s4863_s20  ;;  %s5956_s25 = smov [#allocation3]  }
  0x18   : > { %5248 = vmatprep.subr.bf16.mxu1 %v5755_v3  ;;  %s5710_s29 = smul.u32 216, %s6090_s18  ;;  %v5764_v25 = vld [vmem:[%s7729_s2 + $0x8] sm:$0xff]   ;;  %v5766_v43 = vld [vmem:[%s7729_s2] sm:$0xff]   ;;  %v5770_v57 = vld [vmem:[%s7729_s2 + $0xb8] sm:$0xff]   ;;  %s5896_s17 = sshll.u32 %s5956_s25, 4  ;;  %s5897_s17 = int_to_ptr.vmem [resolvable:$false] %s5896_s17 }
  0x19   : > { %v5765_v26 = vld [vmem:[%s7729_s2 + $0x48] sm:$0xff]   ;;  %v5767_v48 = vld [vmem:[%s7729_s2 + $0x40] sm:$0xff]   ;;  %s5898_s19 = scalar_lea.vmem %s5897_s17, 32 }
  0x1a   : > { %5201 = vmatpush3.bf16.msra.mxu0 %v5754_v2  ;;  %s6108_s23 = scalar_lea.vmem %s7727_s0, %s5710_s29  ;;  %s419_s29 = sand.u32 1, %s5944_s22  }
  0x1b   : > { %5249 = vmatpush3.bf16.msra.mxu1 %v5755_v3  ;;  %5202 = vmatprep.subr.bf16.mxu0 %v5756_v4  ;;  %v464_v12 = vld [vmem:[%s6108_s23] sm:$0xff]   ;;  %v6118_v13 = vld [vmem:[%s6108_s23 + $0x8] sm:$0x1]  ;;  %v6121_v14 = vld [vmem:[%s6108_s23 + $0xc] sm:$0xff]   ;;  %s420_s26 = scalar_lea.vmem [#allocation3], %s419_s29 }
  0x1c   : > { %5250 = vmatprep.subr.bf16.mxu1 %v5757_v5  ;;  %7800 = vst [vmem:[#allocation8_spill] sm:$0xff] %v6121_v14  ;;  %v518_v15 = vunpack.c.l.bf16 %v464_v12  ;;  %v519_v16 = vunpack.c.h.bf16 %v464_v12  ;;  %v7747_v17 = vunpack.c.l.bf16 %v6118_v13  ;;  %v469_v18 = vld [vmem:[%s6108_s23 + $0x14] sm:$0x1]  ;;  %v521_v19 = vunpack.c.l.bf16 %v6121_v14  ;;  %5214 = vmatprep.mubr.bf16.mxu0 %v464_v12  ;;  %v6128_v24 = vld [vmem:[%s6108_s23 + $0x18] sm:$0xff]   ;;  %v6142_v34 = vld [vmem:[%s6108_s23 + $0x20] sm:$0x1] }
  0x1d   : > { %v522_v20 = vunpack.c.h.bf16 %v6121_v14  ;;  %v523_v21 = vunpack.c.l.bf16 %v469_v18  ;;  %7801 = vst [vmem:[#allocation9_spill] sm:$0xff] %v6128_v24  ;;  %v524_v36 = vunpack.c.l.bf16 %v6128_v24  ;;  %v525_v37 = vunpack.c.h.bf16 %v6128_v24  ;;  %v6148_v38 = vld [vmem:[%s6108_s23 + $0x24] sm:$0xff]   ;;  %v6151_v39 = vld [vmem:[%s6108_s23 + $0x2c] sm:$0x1]  ;;  %v6158_v42 = vld [vmem:[%s6108_s23 + $0x30] sm:$0xff]   ;;  %s4534_s28 = sshll.u32 %s420_s26, 4  ;;  %s7688_s28 = int_to_ptr.vmem [resolvable:$true] %s4534_s28 }
  0x1e   : > { %5203 = vmatpush3.bf16.msra.mxu0 %v5756_v4  ;;  %v958_v22 = vrot.slane %v518_v15, 1  ;;  %v959_v23 = vrot.slane %v519_v16, 1  ;;  %v961_v27 = vrot.slane %v7747_v17, 1  ;;  %v963_v28 = vrot.slane %v521_v19, 1  ;;  %7802 = vst [vmem:[#allocation10_spill] sm:$0xff] %v6148_v38  ;;  %7803 = vst [vmem:[#allocation11_spill] sm:$0xff] %v6158_v42  ;;  %p5899_p0 = scmp.lt.s32.totalorder %s7688_s28, %s5897_s17 }
  0x1f   : > { %5251 = vmatpush3.bf16.msra.mxu1 %v5757_v5  ;;  %5204 = vmatprep.subr.bf16.mxu0 %v5758_v6  ;;  %v964_v29 = vrot.slane %v522_v20, 1  ;;  %v1414_v30 = vrot.slane %v521_v19, 2  ;;  %v6139_v32 = vrot.slane %v522_v20, 2  ;;  %v966_v33 = vrot.slane %v523_v21, 1  ;;  %v6185_v61 = vld [vmem:[%s6108_s23 + $0x38] sm:$0x1] }
  0x20   : > { %5252 = vmatprep.subr.bf16.mxu1 %v5759_v7  ;;  %v960_v31 = vsel %vm957_vm0, %v958_v22, %v959_v23  ;;  %v962_v35 = vsel %vm957_vm0, %v959_v23, %v961_v27  ;;  %v6163_v44 = vrot.slane %v518_v15, 2  ;;  %v968_v47 = vrot.slane %v524_v36, 1  ;;  %v6195_v2 = vld [vmem:[%s6108_s23 + $0x3c] sm:$0xff]   ;;  %v6198_v3 = vld [vmem:[%s6108_s23 + $0x44] sm:$0x1]  ;;  %v6201_v4 = vld [vmem:[%s6108_s23 + $0x48] sm:$0xff]  }
  0x21   : > { %v1070_v40 = vpack.c.bf16 %v962_v35, %v960_v31  ;;  %v6155_v41 = vsel %vm1408_vm1, %v1414_v30, %v6139_v32  ;;  %v965_v45 = vsel %vm957_vm0, %v963_v28, %v964_v29  ;;  %v967_v46 = vsel %vm957_vm0, %v964_v29, %v966_v33  ;;  %7805 = vst [vmem:[#allocation13_spill] sm:$0xff] %v6195_v2  ;;  %v5783_v19 = vld [vmem:[%s7729_s2 + $0xf8] sm:$0xff]   ;;  %v5773_v22 = vld [vmem:[%s7729_s2 + $0xb0] sm:$0xff]  }
  0x22   : > { %5205 = vmatpush3.bf16.msra.mxu0 %v5758_v6  ;;  %v969_v49 = vrot.slane %v525_v37, 1  ;;  %v7746_v50 = vunpack.c.l.bf16 %v6142_v34  ;;  %v527_v51 = vunpack.c.l.bf16 %v6148_v38  ;;  %v528_v52 = vunpack.c.h.bf16 %v6148_v38  ;;  %7806 = vst [vmem:[#allocation14_spill] sm:$0xff] %v6201_v4  ;;  %v6236_v30 = vld [vmem:[%s6108_s23 + $0x54] sm:$0xff]   ;;  %v6239_v31 = vld [vmem:[%s6108_s23 + $0x5c] sm:$0x1] }
  0x23   : > { %5253 = vmatpush3.bf16.msra.mxu1 %v5759_v7  ;;  %5206 = vmatprep.subr.bf16.mxu0 %v5760_v8  ;;  %v6173_v53 = vrot.slane %v519_v16, 2  ;;  %v6175_v54 = vrot.slane %v523_v21, 2  ;;  %v7745_v55 = vunpack.c.l.bf16 %v6151_v39  ;;  %v530_v56 = vunpack.c.l.bf16 %v6158_v42  ;;  %7808 = vst [vmem:[#allocation16_spill] sm:$0xff] %v6236_v30 }
  0x24   : > { %5254 = vmatprep.subr.bf16.mxu1 %v5761_v9  ;;  %5262 = vmatprep.mubr.bf16.mxu1 %v1070_v40  ;;  %v971_v58 = vrot.slane %v7746_v50, 1  ;;  %v973_v59 = vrot.slane %v527_v51, 1  ;;  %v974_v60 = vrot.slane %v528_v52, 1  ;;  %v6187_v62 = vpack.c.bf16 %v967_v46, %v965_v45  ;;  %v5784_v40 = vld [vmem:[%s7729_s2 + $0xf0] sm:$0xff]   ;;  %v6327_v50 = vld [vmem:[%s6108_s23 + $0x80] sm:$0x1] }
  0x25   : > { %v6189_v63 = vrot.slane %v524_v36, 2  ;;  %v976_v0 = vrot.slane %v7745_v55, 1  ;;  %v531_v1 = vunpack.c.h.bf16 %v6158_v42  ;;  %v6203_v5 = vrot.slane %v525_v37, 2  ;;  %7814 = vst [vmem:[#allocation22_spill] sm:$0xff] %v6327_v50 }
  0x26   : > { %5207 = vmatpush3.bf16.msra.mxu0 %v5760_v8  ;;  %7804 = vst [vmem:[#allocation12_spill] sm:$0xff] %v6187_v62  ;;  %v970_v6 = vsel %vm957_vm0, %v968_v47, %v969_v49  ;;  %v972_v7 = vsel %vm957_vm0, %v969_v49, %v971_v58  ;;  %v6207_v8 = vrot.slane %v527_v51, 2  ;;  %v7744_v15 = vunpack.c.l.bf16 %v6185_v61  ;;  %v6255_v47 = vld [vmem:[%s6108_s23 + $0x60] sm:$0xff]   ;;  %v5776_v51 = vld [vmem:[%s7729_s2 + $0xa8] sm:$0xff]  }
  0x27   : > { %5255 = vmatpush3.bf16.msra.mxu1 %v5761_v9  ;;  %5208 = vmatprep.subr.bf16.mxu0 %v5762_v10  ;;  %v6209_v9 = vrot.slane %v528_v52, 2  ;;  %v979_v12 = vrot.slane %v531_v1, 1  ;;  %v533_v16 = vunpack.c.l.bf16 %v6195_v2  ;;  %v534_v18 = vunpack.c.h.bf16 %v6195_v2  ;;  %7810 = vst [vmem:[#allocation18_spill] sm:$0xff] %v6255_v47 }
  0x28   : > { %5256 = vmatprep.subr.bf16.mxu1 %v5763_v11  ;;  %v6218_v20 = vpack.c.bf16 %v972_v7, %v970_v6  ;;  %v977_v21 = vsel %vm957_vm0, %v974_v60, %v976_v0  ;;  %v7742_v23 = vunpack.c.l.bf16 %v6198_v3  ;;  %v6229_v27 = vrot.slane %v530_v56, 2  ;;  %v6273_v7 = vld [vmem:[%s6108_s23 + $0x68] sm:$0x1] }
  0x29   : > { %v6231_v28 = vrot.slane %v531_v1, 2  ;;  %v981_v29 = vrot.slane %v7744_v15, 1  ;;  %v983_v33 = vrot.slane %v533_v16, 1  ;;  %v984_v35 = vrot.slane %v534_v18, 1 }
  0x2a   : > { %5209 = vmatpush3.bf16.msra.mxu0 %v5762_v10  ;;  %v975_v10 = vsel %vm957_vm0, %v973_v59, %v974_v60  ;;  %7807 = vst [vmem:[#allocation15_spill] sm:$0xff] %v6218_v20  ;;  %v986_v36 = vrot.slane %v7742_v23, 1  ;;  %v537_v37 = vunpack.c.h.bf16 %v6201_v4  ;;  %v6252_v46 = vrot.slane %v533_v16, 2 }
  0x2b   : > { %5257 = vmatpush3.bf16.msra.mxu1 %v5763_v11  ;;  %5210 = vmatprep.subr.bf16.mxu0 %v5764_v25  ;;  %v978_v11 = vrot.slane %v530_v56, 1  ;;  %v6260_v49 = vrot.slane %v534_v18, 2  ;;  %v539_v58 = vunpack.c.l.bf16 %v6236_v30  ;;  %v540_v59 = vunpack.c.h.bf16 %v6236_v30 }
  0x2c   : > { %5258 = vmatprep.subr.bf16.mxu1 %v5765_v26  ;;  %v989_v56 = vrot.slane %v537_v37, 1  ;;  %v985_v60 = vsel %vm957_vm0, %v983_v33, %v984_v35  ;;  %v987_v0 = vsel %vm957_vm0, %v984_v35, %v986_v36  ;;  %v7743_v1 = vunpack.c.l.bf16 %v6239_v31  ;;  %v6299_v36 = vld [vmem:[%s6108_s23 + $0x78] sm:$0xff]  }
  0x2d   : > { %v980_v45 = vsel %vm957_vm0, %v978_v11, %v979_v12  ;;  %v542_v6 = vunpack.c.l.bf16 %v6255_v47  ;;  %v6282_v16 = vrot.slane %v537_v37, 2  ;;  %v993_v33 = vrot.slane %v539_v58, 1 }
  0x2e   : > { %5211 = vmatpush3.bf16.msra.mxu0 %v5764_v25  ;;  %v536_v25 = vunpack.c.l.bf16 %v6201_v4  ;;  %v543_v35 = vunpack.c.h.bf16 %v6255_v47  ;;  %v6301_v37 = vpack.c.bf16 %v987_v0, %v985_v60  ;;  %v548_v55 = vunpack.c.l.bf16 %v6299_v36  ;;  %v6341_v0 = vld [vmem:[%s6108_s23 + $0x8c] sm:$0x1] }
  0x2f   : > { %5259 = vmatpush3.bf16.msra.mxu1 %v5765_v26  ;;  %5212 = vmatprep.subr.bf16.mxu0 %v5766_v43  ;;  %v6227_v26 = vld [vmem:[%s6108_s23 + $0x50] sm:$0x1]  ;;  %v998_v15 = vrot.slane %v542_v6, 1  ;;  %7818 = vst [vmem:[#allocation25_spill] sm:$0xff] %v6341_v0 }
  0x30   : > { %5260 = vmatprep.subr.bf16.mxu1 %v5767_v48  ;;  %v988_v52 = vrot.slane %v536_v25, 1  ;;  %7813 = vst [vmem:[#allocation21_spill] sm:$0xff] %v6301_v37 }
  0x32   : > { %5213 = vmatpush3.bf16.msra.mxu0 %v5766_v43  ;;  %v6249_v43 = vpack.c.bf16 %v977_v21, %v975_v10  ;;  %v5788_v10 = vld [vmem:[%s7729_s2 + $0xe8] sm:$0xff]  }
  0x33   : > { %5261 = vmatpush3.bf16.msra.mxu1 %v5767_v48  ;;  %5294 = vmatprep.subr.bf16.mxu0 %v5770_v57  ;;  %v982_v48 = vsel %vm957_vm0, %v979_v12, %v981_v29  ;;  %v6280_v12 = vrot.slane %v536_v25, 2  ;;  %v6290_v21 = vld [vmem:[%s6108_s23 + $0x6c] sm:$0xff]   ;;  %v6293_v29 = vld [vmem:[%s6108_s23 + $0x74] sm:$0x1]  ;;  %v996_v25 = vrot.slane %v7743_v1, 1  ;;  %v6311_v1 = vrot.slane %v540_v59, 2 }
  0x34   : > { %5342 = vmatprep.subr.bf16.mxu1 %v5783_v19  ;;  %7809 = vst [vmem:[#allocation17_spill] sm:$0xff] %v6249_v43  ;;  %v6278_v11 = vpack.c.bf16 %v982_v48, %v980_v45  ;;  %7812 = vst [vmem:[#allocation20_spill] sm:$0xff] %v6293_v29  ;;  %v990_v45 = vsel %vm957_vm0, %v988_v52, %v989_v56  ;;  %v6304_v48 = vrot.slane %v539_v58, 2  ;;  %v999_v52 = vrot.slane %v543_v35, 1 }
  0x35   : > { %5215 = vmatmul.mubr.bf16.vlgmr.msra.gmra.mxu0 %v6121_v14  ;;  %v545_v58 = vunpack.c.l.bf16 %v6290_v21  ;;  %v546_v60 = vunpack.c.h.bf16 %v6290_v21  ;;  %v5787_v14 = vld [vmem:[%s7729_s2 + $0x90] sm:$0xff]  }
  0x36   : > { %5263 = vmatmul.mubr.bf16.vlgmr.msra.gmra.mxu1 %v6187_v62  ;;  %5295 = vmatpush3.bf16.msra.mxu0 %v5770_v57  ;;  %v7741_v57 = vunpack.c.l.bf16 %v6227_v26  ;;  %7811 = vst [vmem:[#allocation19_spill] sm:$0xff] %v6278_v11 }
  0x37   : > { %5218 = vmatprep.mubr.bf16.mxu0 %v6128_v24  ;;  %5266 = vmatprep.mubr.bf16.mxu1 %v6218_v20  ;;  %v7819_v20 = vunpack.c.l.bf16 %v6293_v29  ;;  %v6352_v62 = vrot.slane %v545_v58, 2 }
  0x38   : > { %5296 = vmatprep.subr.bf16.mxu0 %v5773_v22  ;;  %5343 = vmatpush3.bf16.msra.mxu1 %v5783_v19  ;;  %v991_v18 = vrot.slane %v7741_v57, 1  ;;  %v5779_v19 = vld [vmem:[%s7729_s2 + $0xa0] sm:$0xff]  }
  0x39   : > { %5344 = vmatprep.subr.bf16.mxu1 %v5784_v40  ;;  %v5789_v57 = vld [vmem:[%s7729_s2 + $0xe0] sm:$0xff]  }
  0x3a   : > { %5297 = vmatpush3.bf16.msra.mxu0 %v5773_v22  ;;  %v994_v22 = vrot.slane %v540_v59, 1  ;;  %v992_v23 = vsel %vm957_vm0, %v989_v56, %v991_v18  ;;  %v5782_v18 = vld [vmem:[%s7729_s2 + $0x98] sm:$0xff]  }
  0x3b   : > { %5298 = vmatprep.subr.bf16.mxu0 %v5776_v51  ;;  %v6329_v17 = vpack.c.bf16 %v992_v23, %v990_v45  ;;  %v1006_v23 = vrot.slane %v7819_v20, 1  ;;  %v549_v45 = vunpack.c.h.bf16 %v6299_v36  ;;  %v6358_v20 = vrot.slane %v546_v60, 2 }
  0x3c   : > { %5345 = vmatpush3.bf16.msra.mxu1 %v5784_v40  ;;  %v995_v56 = vsel %vm957_vm0, %v993_v33, %v994_v22  ;;  %v997_v59 = vsel %vm957_vm0, %v994_v22, %v996_v25  ;;  %v6331_v40 = vrot.slane %v542_v6, 2  ;;  %v7816_v33 = vunpack.c.l.bf16 %v6273_v7  ;;  %v6338_v25 = vld [vmem:[%s6108_s23 + $0x84] sm:$0xff]   ;;  %v5793_v6 = vld [vmem:[%s7729_s2 + $0xd8] sm:$0xff]  }
  0x3d   : > { %5219 = vmatmul.mubr.bf16.gmra.mxu0 %v6148_v38  ;;  %5346 = vmatprep.subr.bf16.mxu1 %v5788_v10  ;;  %7815 = vst [vmem:[#allocation23_spill] sm:$0xff] %v6329_v17  ;;  %7817 = vst [vmem:[#allocation24_spill] sm:$0xff] %v6338_v25  ;;  %v1008_v38 = vrot.slane %v548_v55, 1  ;;  %v1009_v24 = vrot.slane %v549_v45, 1 }
  0x3e   : > { %5267 = vmatmul.mubr.bf16.gmra.mxu1 %v6249_v43  ;;  %5222 = vmatprep.mubr.bf16.mxu0 %v6158_v42  ;;  %v1001_v22 = vrot.slane %v7816_v33, 1  ;;  %v1004_v43 = vrot.slane %v546_v60, 1  ;;  %v1000_v33 = vsel %vm957_vm0, %v998_v15, %v999_v52  ;;  %v6355_v42 = vld [vmem:[%s6108_s23 + $0x90] sm:$0xff]   ;;  %v551_v15 = vunpack.c.l.bf16 %v6338_v25 }
  0x3f   : > { %5270 = vmatprep.mubr.bf16.mxu1 %v6278_v11  ;;  %5299 = vmatpush3.bf16.msra.mxu0 %v5776_v51  ;;  %v6333_v51 = vrot.slane %v543_v35, 2  ;;  %v1003_v11 = vrot.slane %v545_v58, 1  ;;  %v6349_v35 = vpack.c.bf16 %v997_v59, %v995_v56  ;;  %7821 = vst [vmem:[#allocation27_spill] sm:$0xff] %v6355_v42  ;;  %v552_v58 = vunpack.c.h.bf16 %v6338_v25  ;;  %v5794_v56 = vld [vmem:[%s7729_s2 + $0xd0] sm:$0xff]   ;;  %v6391_v25 = vld [vmem:[%s6108_s23 + $0xa4] sm:$0x1] }
  0x40   : > { %5300 = vmatprep.subr.bf16.mxu0 %v5779_v19  ;;  %5347 = vmatpush3.bf16.msra.mxu1 %v5788_v10  ;;  %v1002_v10 = vsel %vm957_vm0, %v999_v52, %v1001_v22  ;;  %v1007_v52 = vsel %vm957_vm0, %v1004_v43, %v1006_v23  ;;  %v554_v59 = vunpack.c.l.bf16 %v6355_v42  ;;  %v6372_v22 = vld [vmem:[%s6108_s23 + $0x98] sm:$0x1]  ;;  %v7825_v23 = vunpack.c.l.bf16 %v6327_v50  ;;  %7827 = vst [vmem:[#allocation32_spill] sm:$0xff] %v6391_v25 }
  0x41   : > { %5348 = vmatprep.subr.bf16.mxu1 %v5789_v57  ;;  %7820 = vst [vmem:[#allocation26_spill] sm:$0xff] %v6349_v35  ;;  %v1014_v29 = vrot.slane %v552_v58, 1  ;;  %v6403_v50 = vrot.slane %v551_v15, 2 }
  0x42   : > { %v1011_v60 = vrot.slane %v7825_v23, 1  ;;  %v1010_v23 = vsel %vm957_vm0, %v1008_v38, %v1009_v24  ;;  %v7781_v38 = vunpack.c.l.bf16 %v6372_v22 }
  0x43   : > { %5301 = vmatpush3.bf16.msra.mxu0 %v5779_v19  ;;  %v1005_v19 = vsel %vm957_vm0, %v1003_v11, %v1004_v43  ;;  %v6381_v11 = vrot.slane %v548_v55, 2  ;;  %v6383_v43 = vrot.slane %v549_v45, 2  ;;  %v555_v55 = vunpack.c.h.bf16 %v6355_v42  ;;  %v5792_v45 = vld [vmem:[%s7729_s2 + $0x88] sm:$0xff]   ;;  %7829 = vst [vmem:[#allocation33_spill] sm:$0xff] %v6403_v50 }
  0x44   : > { %5302 = vmatprep.subr.bf16.mxu0 %v5782_v18  ;;  %5349 = vmatpush3.bf16.msra.mxu1 %v5789_v57  ;;  %v6379_v57 = vpack.c.bf16 %v1002_v10, %v1000_v33  ;;  %v7828_v33 = vunpack.c.l.bf16 %v6341_v0  ;;  %v5798_v42 = vld [vmem:[%s7729_s2 + $0xc8] sm:$0xff]   ;;  %v7782_v50 = vunpack.c.l.bf16 %v6391_v25 }
  0x45   : > { %5223 = vmatmul.mubr.bf16.gmra.mxu0 %v6195_v2  ;;  %5350 = vmatprep.subr.bf16.mxu1 %v5793_v6  ;;  %7823 = vst [vmem:[#allocation29_spill] sm:$0xff] %v6381_v11  ;;  %7824 = vst [vmem:[#allocation30_spill] sm:$0xff] %v6383_v43  ;;  %v6388_v2 = vld [vmem:[%s6108_s23 + $0x9c] sm:$0xff]   ;;  %v1019_v0 = vrot.slane %v555_v55, 1  ;;  %v6422_v11 = vld [vmem:[%s6108_s23 + $0xb0] sm:$0x1] }
  0x46   : > { %5271 = vmatmul.mubr.bf16.gmra.mxu1 %v6301_v37  ;;  %5226 = vmatprep.mubr.bf16.mxu0 %v6201_v4  ;;  %7822 = vst [vmem:[#allocation28_spill] sm:$0xff] %v6379_v57  ;;  %7826 = vst [vmem:[#allocation31_spill] sm:$0xff] %v6388_v2  ;;  %v1013_v37 = vrot.slane %v551_v15, 1  ;;  %v1016_v10 = vrot.slane %v7828_v33, 1  ;;  %v6400_v4 = vpack.c.bf16 %v1007_v52, %v1005_v19  ;;  %v1018_v33 = vrot.slane %v554_v59, 1 }
  0x47   : > { %5274 = vmatprep.mubr.bf16.mxu1 %v6329_v17  ;;  %5303 = vmatpush3.bf16.msra.mxu0 %v5782_v18  ;;  %v6406_v18 = vld [vmem:[%s6108_s23 + $0xa8] sm:$0xff]   ;;  %v6408_v17 = vrot.slane %v552_v58, 2  ;;  %v1012_v19 = vsel %vm957_vm0, %v1009_v24, %v1011_v60  ;;  %v557_v15 = vunpack.c.l.bf16 %v6388_v2  ;;  %v5797_v24 = vld [vmem:[%s7729_s2 + $0x80] sm:$0xff]   ;;  %v6427_v60 = vrot.slane %v554_v59, 2 }
  0x48   : > { %5304 = vmatprep.subr.bf16.mxu0 %v5787_v14  ;;  %5351 = vmatpush3.bf16.msra.mxu1 %v5793_v6  ;;  %7830 = vst [vmem:[#allocation34_spill] sm:$0xff] %v6406_v18  ;;  %v558_v6 = vunpack.c.h.bf16 %v6388_v2  ;;  %v1015_v52 = vsel %vm957_vm0, %v1013_v37, %v1014_v29  ;;  %v1017_v58 = vsel %vm957_vm0, %v1014_v29, %v1016_v10  ;;  %v1021_v2 = vrot.slane %v7781_v38, 1  ;;  %v5799_v38 = vld [vmem:[%s7729_s2 + $0xc0] sm:$0xff]  }
  0x49   : > { %7831 = vst [vmem:[#allocation35_spill] sm:$0xff] %v6408_v17  ;;  %5352 = vmatprep.subr.bf16.mxu1 %v5794_v56  ;;  %v560_v17 = vunpack.c.l.bf16 %v6406_v18  ;;  %7832 = vst [vmem:[#allocation36_spill] sm:$0xff] %v6427_v60  ;;  %v1023_v37 = vrot.slane %v557_v15, 1  ;;  %v6434_v29 = vrot.slane %v555_v55, 2  ;;  %v1026_v10 = vrot.slane %v7782_v50, 1  ;;  %v6440_v60 = vld [vmem:[%s6108_s23 + $0xb4] sm:$0xff]  }
  0x4a   : > { %v1024_v43 = vrot.slane %v558_v6, 1  ;;  %v561_v59 = vunpack.c.h.bf16 %v6406_v18  ;;  %v1020_v55 = vsel %vm957_vm0, %v1018_v33, %v1019_v0  ;;  %v6454_v50 = vld [vmem:[%s6108_s23 + $0xbc] sm:$0x1]  ;;  %v564_v33 = vunpack.c.h.bf16 %v6440_v60 }
  0x4b   : > { %5305 = vmatpush3.bf16.msra.mxu0 %v5787_v14  ;;  %v6432_v14 = vpack.c.bf16 %v1012_v19, %v1010_v23  ;;  %v1022_v23 = vsel %vm957_vm0, %v1019_v0, %v1021_v2  ;;  %v6451_v19 = vrot.slane %v557_v15, 2  ;;  %v562_v2 = vunpack.c.l.bf16 %v6422_v11 }
  0x4c   : > { %5306 = vmatprep.subr.bf16.mxu0 %v5792_v45  ;;  %5353 = vmatpush3.bf16.msra.mxu1 %v5794_v56  ;;  %v6447_v56 = vpack.c.bf16 %v1017_v58, %v1015_v52  ;;  %v1027_v18 = vsel %vm957_vm0, %v1024_v43, %v1026_v10  ;;  %v1029_v25 = vrot.slane %v561_v59, 1  ;;  %v6462_v52 = vld [vmem:[%s7729_s2 + $0x138] sm:$0xff]   ;;  %v563_v0 = vunpack.c.l.bf16 %v6440_v60 }
  0x4d   : > { %5227 = vmatmul.mubr.bf16.gmra.mxu0 %v6236_v30  ;;  %5354 = vmatprep.subr.bf16.mxu1 %v5798_v42  ;;  %v1025_v30 = vsel %vm957_vm0, %v1023_v37, %v1024_v43  ;;  %v6467_v15 = vrot.slane %v558_v6, 2  ;;  %v6469_v58 = vrot.slane %v560_v17, 2  ;;  %v6474_v43 = vsel %vm1408_vm1, %v6163_v44, %v6173_v53 }
  0x4e   : > { %5275 = vmatmul.mubr.bf16.gmra.mxu1 %v6349_v35  ;;  %5230 = vmatprep.mubr.bf16.mxu0 %v6255_v47  ;;  %v1028_v35 = vrot.slane %v560_v17, 1  ;;  %v6478_v37 = vpack.c.bf16 %v1027_v18, %v1025_v30  ;;  %v6480_v10 = vrot.slane %v561_v59, 2  ;;  %v565_v17 = vunpack.c.l.bf16 %v6454_v50  ;;  %v6496_v30 = vld [vmem:[%s7729_s2 + $0x178] sm:$0xff]  }
  0x4f   : > { %5278 = vmatprep.mubr.bf16.mxu1 %v6379_v57  ;;  %5307 = vmatpush3.bf16.msra.mxu0 %v5792_v45  ;;  %v6476_v45 = vpack.c.bf16 %v1022_v23, %v1020_v55  ;;  %v1031_v57 = vrot.slane %v562_v2, 1  ;;  %v7833_v6 = vunpack.c.l.bf16 %v6118_v13  ;;  %v1418_v44 = vsel %vm1408_vm1, %v6139_v32, %v6175_v54  ;;  %v7858_v50 = vld [vmem:[#allocation34_spill] sm:$0xff] }
  0x50   : > { %5308 = vmatprep.subr.bf16.mxu0 %v5797_v24  ;;  %5355 = vmatpush3.bf16.msra.mxu1 %v5798_v42  ;;  %v6485_v42 = vsel %vm957_vm0, %v1028_v35, %v1029_v25  ;;  %v6498_v18 = vrot.slane %v563_v0, 1  ;;  %v6500_v59 = vrot.slane %v564_v33, 1  ;;  %v6503_v35 = vpack.c.bf16 %v1418_v44, %v6155_v41 }
  0x51   : > { %5356 = vmatprep.subr.bf16.mxu1 %v5799_v38  ;;  %v1412_v47 = vrot.slane %v7833_v6, 2  ;;  %v7834_v13 = vunpack.c.l.bf16 %v6142_v34  ;;  %v1484_v32 = vrot.slane %v563_v0, 2  ;;  %v6509_v54 = vrot.slane %v564_v33, 2 }
  0x52   : > { %v1032_v34 = vsel %vm957_vm0, %v1029_v25, %v1031_v57  ;;  %v7835_v0 = vunpack.c.l.bf16 %v6151_v39  ;;  %v1431_v25 = vsel %vm1408_vm1, %v6229_v27, %v6231_v28  ;;  %v7836_v57 = vunpack.c.l.bf16 %v6185_v61 }
  0x53   : > { %5309 = vmatpush3.bf16.msra.mxu0 %v5797_v24  ;;  %v1422_v24 = vrot.slane %v7834_v13, 2  ;;  %v6513_v55 = vsel %vm1408_vm1, %v6173_v53, %v1412_v47  ;;  %v7837_v6 = vunpack.c.l.bf16 %v6198_v3  ;;  %v7838_v13 = vunpack.c.l.bf16 %v6227_v26 }
  0x54   : > { %5357 = vmatpush3.bf16.msra.mxu1 %v5799_v38  ;;  %5390 = vmatprep.subr.bf16.mxu0 %v6462_v52  ;;  %v1421_v38 = vsel %vm1408_vm1, %v6189_v63, %v6203_v5  ;;  %v1521_v41 = vpack.c.bf16 %v6513_v55, %v6474_v43  ;;  %v1427_v53 = vrot.slane %v7835_v0, 2  ;;  %v1426_v63 = vsel %vm1408_vm1, %v6207_v8, %v6209_v9  ;;  %v7860_v43 = vld [vmem:[#allocation9_spill] sm:$0xff] }
  0x55   : > { %5231 = vmatmul.mubr.bf16.gmra.mxu0 %v6290_v21  ;;  %v1423_v23 = vsel %vm1408_vm1, %v6203_v5, %v1422_v24  ;;  %v1432_v33 = vrot.slane %v7836_v57, 2  ;;  %5438 = vmatprep.subr.bf16.mxu1 %v6496_v30  ;;  %v1436_v5 = vsel %vm1408_vm1, %v6252_v46, %v6260_v49  ;;  %v1437_v44 = vrot.slane %v7837_v6, 2  ;;  %v7843_v57 = vld [vmem:[#allocation30_spill] sm:$0xff]  ;;  %v5808_v55 = vld [vmem:[%s7729_s2 + $0x168] sm:$0xff]  }
  0x56   : > { %5279 = vmatmul.mubr.bf16.gmra.mxu1 %v6400_v4  ;;  %5234 = vmatprep.mubr.bf16.mxu0 %v6299_v36  ;;  %v6528_v47 = vpack.c.bf16 %v1423_v23, %v1421_v38  ;;  %v1428_v39 = vsel %vm1408_vm1, %v6209_v9, %v1427_v53  ;;  %v1441_v8 = vsel %vm1408_vm1, %v6280_v12, %v6282_v16  ;;  %v1442_v24 = vrot.slane %v7838_v13, 2  ;;  %v7850_v13 = vld [vmem:[#allocation27_spill] sm:$0xff] }
  0x57   : > { %5282 = vmatprep.mubr.bf16.mxu1 %v6432_v14  ;;  %v6549_v27 = vpack.c.bf16 %v1428_v39, %v1426_v63  ;;  %v1433_v61 = vsel %vm1408_vm1, %v6231_v28, %v1432_v33  ;;  %v1446_v9 = vsel %vm1408_vm1, %v6304_v48, %v6311_v1  ;;  %v1438_v3 = vsel %vm1408_vm1, %v6260_v49, %v1437_v44  ;;  %v7841_v63 = vld [vmem:[#allocation20_spill] sm:$0xff]  ;;  %v7844_v33 = vld [vmem:[#allocation29_spill] sm:$0xff] }
  0x58   : > { %v6558_v46 = vpack.c.bf16 %v1433_v61, %v1431_v25  ;;  %v7839_v38 = vunpack.c.l.bf16 %v6239_v31  ;;  %v1451_v23 = vsel %vm1408_vm1, %v6331_v40, %v6333_v51  ;;  %v6567_v28 = vpack.c.bf16 %v1438_v3, %v1436_v5  ;;  %v7849_v61 = vld [vmem:[#allocation33_spill] sm:$0xff] }
  0x59   : > { %v1443_v26 = vsel %vm1408_vm1, %v6282_v16, %v1442_v24  ;;  %v7840_v0 = vunpack.c.l.bf16 %v6273_v7  ;;  %v1456_v53 = vsel %vm1408_vm1, %v6352_v62, %v6358_v20  ;;  %v7842_v25 = vunpack.c.l.bf16 %v7841_v63  ;;  %v7845_v16 = vld [vmem:[#allocation24_spill] sm:$0xff]  ;;  %v7846_v62 = vld [vmem:[#allocation22_spill] sm:$0xff]  ;;  %v7851_v3 = vld [vmem:[#allocation25_spill] sm:$0xff] }
  0x5a   : > { %v1447_v12 = vrot.slane %v7839_v38, 2  ;;  %v6576_v49 = vpack.c.bf16 %v1443_v26, %v1441_v8  ;;  %v1461_v39 = vsel %vm1408_vm1, %v7844_v33, %v7843_v57  ;;  %v7847_v6 = vunpack.c.l.bf16 %v7846_v62  ;;  %v7848_v8 = vld [vmem:[#allocation35_spill] sm:$0xff] }
  0x5b   : > { %v1452_v48 = vrot.slane %v7840_v0, 2  ;;  %v1457_v40 = vrot.slane %v7842_v25, 2  ;;  %v7852_v38 = vunpack.c.l.bf16 %v7851_v3  ;;  %v1036_v62 = vrot.slane %v565_v17, 1  ;;  %v7863_v3 = vld [vmem:[#allocation13_spill] sm:$0xff] }
  0x5c   : > { %v1448_v31 = vsel %vm1408_vm1, %v6311_v1, %v1447_v12  ;;  %v1462_v44 = vrot.slane %v7847_v6, 2  ;;  %v1466_v1 = vsel %vm1408_vm1, %v7849_v61, %v7848_v8  ;;  %v7857_v61 = vld [vmem:[#allocation31_spill] sm:$0xff] }
  0x5d   : > { %5235 = vmatmul.mubr.bf16.gmra.mxu0 %v7845_v16  ;;  %v6586_v7 = vpack.c.bf16 %v1448_v31, %v1446_v9  ;;  %v1453_v5 = vsel %vm1408_vm1, %v6333_v51, %v1452_v48  ;;  %v1458_v9 = vsel %vm1408_vm1, %v6358_v20, %v1457_v40  ;;  %v1467_v12 = vrot.slane %v7852_v38, 2  ;;  %v7853_v51 = vld [vmem:[#allocation36_spill] sm:$0xff]  ;;  %v5811_v38 = vld [vmem:[%s7729_s2 + $0x158] sm:$0xff]  }
  0x5e   : > { %5283 = vmatmul.mubr.bf16.gmra.mxu1 %v6447_v56  ;;  %5238 = vmatprep.mubr.bf16.mxu0 %v7850_v13  ;;  %v6597_v24 = vpack.c.bf16 %v1453_v5, %v1451_v23  ;;  %v1471_v26 = vsel %vm1408_vm1, %v7853_v51, %v6434_v29  ;;  %v6607_v0 = vpack.c.bf16 %v1458_v9, %v1456_v53  ;;  %v7854_v23 = vunpack.c.l.bf16 %v6372_v22  ;;  %v7855_v40 = vld [vmem:[#allocation32_spill] sm:$0xff]  ;;  %v7862_v9 = vld [vmem:[#allocation11_spill] sm:$0xff]  ;;  %v5812_v51 = vld [vmem:[%s7729_s2 + $0x150] sm:$0xff]  }
  0x5f   : > { %5286 = vmatprep.mubr.bf16.mxu1 %v6476_v45  ;;  %v1463_v48 = vsel %vm1408_vm1, %v7843_v57, %v1462_v44  ;;  %v1476_v20 = vsel %vm1408_vm1, %v6451_v19, %v6467_v15  ;;  %v1468_v25 = vsel %vm1408_vm1, %v7848_v8, %v1467_v12  ;;  %v7856_v33 = vunpack.c.l.bf16 %v7855_v40  ;;  %v5807_v12 = vld [vmem:[%s7729_s2 + $0x110] sm:$0xff]  }
  0x60   : > { %v1472_v31 = vrot.slane %v7854_v23, 2  ;;  %v6616_v63 = vpack.c.bf16 %v1463_v48, %v1461_v39  ;;  %v1481_v53 = vsel %vm1408_vm1, %v6469_v58, %v6480_v10  ;;  %v6625_v57 = vpack.c.bf16 %v1468_v25, %v1466_v1  ;;  %v7865_v48 = vld [vmem:[#allocation16_spill] sm:$0xff]  ;;  %v7866_v40 = vld [vmem:[#allocation18_spill] sm:$0xff] }
  0x61   : > { %v1477_v5 = vrot.slane %v7856_v33, 2  ;;  %v1482_v19 = vrot.slane %v562_v2, 2  ;;  %v1486_v39 = vsel %vm1408_vm1, %v1484_v32, %v6509_v54  ;;  %v1487_v58 = vrot.slane %v565_v17, 2  ;;  %v7859_v17 = vld [vmem:[#allocation8_spill] sm:$0xff]  ;;  %v5817_v33 = vld [vmem:[%s7729_s2 + $0x1b8] sm:$0xff]  }
  0x62   : > { %v1473_v22 = vsel %vm1408_vm1, %v6434_v29, %v1472_v31  ;;  %v6642_v8 = vpack.c.bf16 %v1032_v34, %v6485_v42  ;;  %v7861_v34 = vld [vmem:[#allocation10_spill] sm:$0xff]  ;;  %v5810_v23 = vld [vmem:[%s7729_s2 + $0x108] sm:$0xff]   ;;  %v5816_v25 = vld [vmem:[%s7729_s2 + $0x140] sm:$0xff]  }
  0x63   : > { %v6635_v6 = vpack.c.bf16 %v1473_v22, %v1471_v26  ;;  %v1478_v44 = vsel %vm1408_vm1, %v6467_v15, %v1477_v5  ;;  %v1483_v11 = vsel %vm1408_vm1, %v6480_v10, %v1482_v19  ;;  %v1488_v32 = vsel %vm1408_vm1, %v6509_v54, %v1487_v58  ;;  %v5801_v54 = vld [vmem:[%s7729_s2 + $0x130] sm:$0xff]   ;;  %v5815_v31 = vld [vmem:[%s7729_s2 + $0x148] sm:$0xff]   ;;  %v5822_v5 = vld [vmem:[%s7729_s2 + $0x1f8] sm:$0xff]  }
  0x64   : > { %v6644_v29 = vpack.c.bf16 %v1478_v44, %v1476_v20  ;;  %v6648_v2 = vpack.c.bf16 %v1483_v11, %v1481_v53  ;;  %v6653_v1 = vpack.c.bf16 %v1488_v32, %v1486_v39  ;;  %v1035_v15 = vsel %vm957_vm0, %v6498_v18, %v6500_v59  ;;  %v5806_v18 = vld [vmem:[%s7729_s2 + $0x170] sm:$0xff]   ;;  %v5813_v20 = vld [vmem:[%s7729_s2 + $0x100] sm:$0xff]   ;;  %v5825_v58 = vld [vmem:[%s7729_s2 + $0x1e8] sm:$0xff]  }
  0x65   : > { %5239 = vmatmul.mubr.bf16.gmra.mxu0 %v7857_v61  ;;  %v1037_v10 = vsel %vm957_vm0, %v6500_v59, %v1036_v62  ;;  %v5802_v59 = vld [vmem:[%s7729_s2 + $0x128] sm:$0xff]   ;;  %v7864_v26 = vld [vmem:[#allocation14_spill] sm:$0xff]  ;;  %v6750_v53 = vld [vmem:[%s6108_s23 + $0xc0] sm:$0xff]  }
  0x66   : > { %5287 = vmatmul.mubr.bf16.gmra.mxu1 %v6478_v37  ;;  %5242 = vmatprep.mubr.bf16.mxu0 %v7858_v50  ;;  %v6663_v42 = vpack.c.bf16 %v1037_v10, %v1035_v15  ;;  %v7867_v22 = vld [vmem:[#allocation12_spill] sm:$0xff]  ;;  %v5818_v19 = vld [vmem:[%s7729_s2 + $0x1b0] sm:$0xff]   ;;  %v7868_v39 = vld [vmem:[#allocation15_spill] sm:$0xff] }
  0x67   : > { %5290 = vmatprep.mubr.bf16.mxu1 %v6642_v8  ;;  %v5823_v62 = vld [vmem:[%s7729_s2 + $0x1f0] sm:$0xff]   ;;  %v5820_v11 = vld [vmem:[%s7729_s2 + $0x1a0] sm:$0xff]  }
  0x68   : > { %v7869_v44 = vld [vmem:[#allocation17_spill] sm:$0xff]  ;;  %v7870_v32 = vld [vmem:[#allocation19_spill] sm:$0xff] }
  0x69   : > { %v5826_v15 = vld [vmem:[%s7729_s2 + $0x1e0] sm:$0xff]   ;;  %v7871_v10 = vld [vmem:[#allocation21_spill] sm:$0xff] }
  0x6d   : > { %5243 = vmatmul.mubr.bf16.gmra.mxu0 %v6440_v60 }
  0x6e   : > { %5291 = vmatmul.mubr.bf16.gmra.mxu1 %v6663_v42  ;;  %5310 = vmatprep.mubr.bf16.mxu0 %v1521_v41  ;;  %v5803_v41 = vld [vmem:[%s7729_s2 + $0x120] sm:$0xff]  }
  0x6f   : > { %5358 = vmatprep.mubr.bf16.mxu1 %v7859_v17  ;;  %v5821_v17 = vld [vmem:[%s7729_s2 + $0x198] sm:$0xff]  }
  0x75   : > { %5311 = vmatmul.mubr.bf16.vlgmr.msra.gmra.mxu0 %v6503_v35 }
  0x76   : > { %5391 = vmatpush3.bf16.msra.mxu0 %v6462_v52  ;;  %5359 = vmatmul.mubr.bf16.vlgmr.msra.gmra.mxu1 %v7860_v43  ;;  %v5809_v52 = vld [vmem:[%s7729_s2 + $0x160] sm:$0xff]  }
  0x77   : > { %5314 = vmatprep.mubr.bf16.mxu0 %v6528_v47  ;;  %5392 = vmatprep.subr.bf16.mxu0 %v5801_v54 }
  0x78   : > { %5362 = vmatprep.mubr.bf16.mxu1 %v7861_v34  ;;  %5439 = vmatpush3.bf16.msra.mxu1 %v6496_v30  ;;  %v5804_v30 = vld [vmem:[%s7729_s2 + $0x118] sm:$0xff]  }
  0x79   : > { %5440 = vmatprep.subr.bf16.mxu1 %v5806_v18 }
  0x7a   : > { %5393 = vmatpush3.bf16.msra.mxu0 %v5801_v54  ;;  %v5828_v54 = vld [vmem:[%s7729_s2 + $0x1d8] sm:$0xff]  }
  0x7b   : > { %5394 = vmatprep.subr.bf16.mxu0 %v5802_v59 }
  0x7c   : > { %5441 = vmatpush3.bf16.msra.mxu1 %v5806_v18  ;;  %v5824_v18 = vld [vmem:[%s7729_s2 + $0x190] sm:$0xff]  }
  0x7d   : > { %5315 = vmatmul.mubr.bf16.gmra.mxu0 %v6549_v27  ;;  %5442 = vmatprep.subr.bf16.mxu1 %v5808_v55 }
  0x7e   : > { %5363 = vmatmul.mubr.bf16.gmra.mxu1 %v7862_v9  ;;  %5318 = vmatprep.mubr.bf16.mxu0 %v6558_v46 }
  0x7f   : > { %5366 = vmatprep.mubr.bf16.mxu1 %v7863_v3  ;;  %5395 = vmatpush3.bf16.msra.mxu0 %v5802_v59  ;;  %v7872_v59 = vld [vmem:[#allocation23_spill] sm:$0xff] }
  0x80   : > { %5396 = vmatprep.subr.bf16.mxu0 %v5803_v41  ;;  %5443 = vmatpush3.bf16.msra.mxu1 %v5808_v55  ;;  %v5829_v55 = vld [vmem:[%s7729_s2 + $0x1d0] sm:$0xff]  }
  0x81   : > { %5444 = vmatprep.subr.bf16.mxu1 %v5809_v52 }
  0x83   : > { %5397 = vmatpush3.bf16.msra.mxu0 %v5803_v41  ;;  %v7873_v41 = vld [vmem:[#allocation26_spill] sm:$0xff] }
  0x84   : > { %5398 = vmatprep.subr.bf16.mxu0 %v5804_v30  ;;  %5445 = vmatpush3.bf16.msra.mxu1 %v5809_v52  ;;  %v5827_v52 = vld [vmem:[%s7729_s2 + $0x188] sm:$0xff]  }
  0x85   : > { %5319 = vmatmul.mubr.bf16.gmra.mxu0 %v6567_v28  ;;  %5446 = vmatprep.subr.bf16.mxu1 %v5811_v38 }
  0x86   : > { %5367 = vmatmul.mubr.bf16.gmra.mxu1 %v7864_v26  ;;  %5322 = vmatprep.mubr.bf16.mxu0 %v6576_v49 }
  0x87   : > { %5370 = vmatprep.mubr.bf16.mxu1 %v7865_v48  ;;  %5399 = vmatpush3.bf16.msra.mxu0 %v5804_v30  ;;  %v5831_v30 = vld [vmem:[%s7729_s2 + $0x1c8] sm:$0xff]  }
  0x88   : > { %5400 = vmatprep.subr.bf16.mxu0 %v5807_v12  ;;  %5447 = vmatpush3.bf16.msra.mxu1 %v5811_v38  ;;  %v5830_v38 = vld [vmem:[%s7729_s2 + $0x180] sm:$0xff]  }
  0x89   : > { %5448 = vmatprep.subr.bf16.mxu1 %v5812_v51 }
  0x8b   : > { %5401 = vmatpush3.bf16.msra.mxu0 %v5807_v12  ;;  %v7874_v12 = vld [vmem:[#allocation28_spill] sm:$0xff] }
  0x8c   : > { %5402 = vmatprep.subr.bf16.mxu0 %v5810_v23  ;;  %5449 = vmatpush3.bf16.msra.mxu1 %v5812_v51  ;;  %v5832_v51 = vld [vmem:[%s7729_s2 + $0x1c0] sm:$0xff]  }
  0x8d   : > { %5323 = vmatmul.mubr.bf16.gmra.mxu0 %v6586_v7  ;;  %5450 = vmatprep.subr.bf16.mxu1 %v5815_v31 }
  0x8e   : > { %5371 = vmatmul.mubr.bf16.gmra.mxu1 %v7866_v40  ;;  %5326 = vmatprep.mubr.bf16.mxu0 %v6597_v24 }
  0x8f   : > { %5374 = vmatprep.mubr.bf16.mxu1 %v6290_v21  ;;  %5403 = vmatpush3.bf16.msra.mxu0 %v5810_v23  ;;  %v5833_v23 = vld [vmem:[%s7729_s2 + $0x238] sm:$0xff]  }
  0x90   : > { %5404 = vmatprep.subr.bf16.mxu0 %v5813_v20  ;;  %5451 = vmatpush3.bf16.msra.mxu1 %v5815_v31  ;;  %v514_v31 = vld [vmem:[%s6108_s23 + $0xc8] sm:$0x1] }
  0x91   : > { %5452 = vmatprep.subr.bf16.mxu1 %v5816_v25 }
  0x93   : > { %5405 = vmatpush3.bf16.msra.mxu0 %v5813_v20  ;;  %v566_v20 = vunpack.c.l.bf16 %v6750_v53 }
  0x94   : > { %5453 = vmatpush3.bf16.msra.mxu1 %v5816_v25  ;;  %5486 = vmatprep.subr.bf16.mxu0 %v5817_v33  ;;  %v567_v25 = vunpack.c.h.bf16 %v6750_v53 }
  0x95   : > { %5327 = vmatmul.mubr.bf16.gmra.mxu0 %v6607_v0  ;;  %5534 = vmatprep.subr.bf16.mxu1 %v5822_v5 }
  0x96   : > { %5375 = vmatmul.mubr.bf16.gmra.mxu1 %v6299_v36  ;;  %5330 = vmatprep.mubr.bf16.mxu0 %v6616_v63 }
  0x97   : > { %5378 = vmatprep.mubr.bf16.mxu1 %v7845_v16 }
  0x9d   : > { %5331 = vmatmul.mubr.bf16.gmra.mxu0 %v6625_v57 }
  0x9e   : > { %5379 = vmatmul.mubr.bf16.gmra.mxu1 %v7850_v13  ;;  %5334 = vmatprep.mubr.bf16.mxu0 %v6635_v6 }
  0x9f   : > { %5382 = vmatprep.mubr.bf16.mxu1 %v7857_v61 }
  0xa5   : > { %5335 = vmatmul.mubr.bf16.gmra.mxu0 %v6644_v29 }
  0xa6   : > { %5383 = vmatmul.mubr.bf16.gmra.mxu1 %v7858_v50  ;;  %5338 = vmatprep.mubr.bf16.mxu0 %v6648_v2 }
  0xa7   : > { %5386 = vmatprep.mubr.bf16.mxu1 %v6440_v60 }
  0xad   : > { %5339 = vmatmul.mubr.bf16.gmra.mxu0 %v6653_v1 }
  0xae   : > { %5387 = vmatmul.mubr.bf16.gmra.mxu1 %v6750_v53  ;;  %5406 = vmatprep.mubr.bf16.mxu0 %v7867_v22  ;;  %v2186_v22 = vrot.slane %v567_v25, 1 }
  0xaf   : > { %5454 = vmatprep.mubr.bf16.mxu1 %v6503_v35  ;;  %v5819_v35 = vld [vmem:[%s7729_s2 + $0x1a8] sm:$0xff]  }
  0xb5   : > { %5407 = vmatmul.mubr.bf16.vlgmr.msra.gmra.mxu0 %v7868_v39 }
  0xb6   : > { %5487 = vmatpush3.bf16.msra.mxu0 %v5817_v33  ;;  %5455 = vmatmul.mubr.bf16.vlgmr.msra.gmra.mxu1 %v6528_v47  ;;  %v568_v33 = vunpack.c.l.bf16 %v514_v31 }
  0xb7   : > { %5410 = vmatprep.mubr.bf16.mxu0 %v7869_v44  ;;  %5488 = vmatprep.subr.bf16.mxu0 %v5818_v19 }
  0xb8   : > { %5458 = vmatprep.mubr.bf16.mxu1 %v6549_v27  ;;  %5535 = vmatpush3.bf16.msra.mxu1 %v5822_v5  ;;  %v2185_v5 = vrot.slane %v566_v20, 1 }
  0xb9   : > { %5536 = vmatprep.subr.bf16.mxu1 %v5823_v62 }
  0xba   : > { %5489 = vmatpush3.bf16.msra.mxu0 %v5818_v19  ;;  %v2515_v19 = vrot.slane %v566_v20, 2 }
  0xbb   : > { %5490 = vmatprep.subr.bf16.mxu0 %v5819_v35 }
  0xbc   : > { %5537 = vmatpush3.bf16.msra.mxu1 %v5823_v62  ;;  %v2516_v62 = vrot.slane %v567_v25, 2 }
  0xbd   : > { %5411 = vmatmul.mubr.bf16.gmra.mxu0 %v7870_v32  ;;  %5538 = vmatprep.subr.bf16.mxu1 %v5825_v58 }
  0xbe   : > { %5459 = vmatmul.mubr.bf16.gmra.mxu1 %v6558_v46  ;;  %5414 = vmatprep.mubr.bf16.mxu0 %v7871_v10 }
  0xbf   : > { %5462 = vmatprep.mubr.bf16.mxu1 %v6567_v28  ;;  %5491 = vmatpush3.bf16.msra.mxu0 %v5819_v35  ;;  %v2188_v35 = vrot.slane %v568_v33, 1 }
  0xc0   : > { %5492 = vmatprep.subr.bf16.mxu0 %v5820_v11  ;;  %5539 = vmatpush3.bf16.msra.mxu1 %v5825_v58  ;;  %v6829_v58 = vld [vmem:[%s6108_s23 + $0xcc] sm:$0xff]  }
  0xc1   : > { %5540 = vmatprep.subr.bf16.mxu1 %v5826_v15 }
  0xc3   : > { %5493 = vmatpush3.bf16.msra.mxu0 %v5820_v11  ;;  %v2518_v11 = vrot.slane %v568_v33, 2 }
  0xc4   : > { %5494 = vmatprep.subr.bf16.mxu0 %v5821_v17  ;;  %5541 = vmatpush3.bf16.msra.mxu1 %v5826_v15  ;;  %v6832_v15 = vld [vmem:[%s6108_s23 + $0xd4] sm:$0x1]  ;;  %s4866_s23 = sshll.u32 %s6090_s18, 7  ;;  %s5892_s18 = scalar_lea.vmem %s7688_s28, 16 }
  0xc5   : > { %5415 = vmatmul.mubr.bf16.gmra.mxu0 %v7872_v59  ;;  %5542 = vmatprep.subr.bf16.mxu1 %v5828_v54  ;;  %v571_v31 = vunpack.c.l.bf16 %v6832_v15  ;;  %s7397_s30 = scalar_lea.vmem %s7728_s1, %s4866_s23  ;;  %p5893_p11 = scmp.ne.s32.totalorder %s7688_s28, %s5892_s18 }
  0xc6   : > { %5463 = vmatmul.mubr.bf16.gmra.mxu1 %v6576_v49  ;;  %5418 = vmatprep.mubr.bf16.mxu0 %v7873_v41  ;;  %p5900_p1 = scmp.lt.s32.totalorder %s5898_s19, %s5892_s18 }
  0xc7   : > { %5466 = vmatprep.mubr.bf16.mxu1 %v6586_v7  ;;  %5495 = vmatpush3.bf16.msra.mxu0 %v5821_v17  ;;  %v569_v17 = vunpack.c.l.bf16 %v6829_v58  ;;  %v3504_v25 = vrot.slane %v571_v31, 2  ;;  %p5894_p12 = pnand %p5893_p11, %p6060_p5 }
  0xc8   : > { %5496 = vmatprep.subr.bf16.mxu0 %v5824_v18  ;;  %5543 = vmatpush3.bf16.msra.mxu1 %v5828_v54  ;;  %v570_v54 = vunpack.c.h.bf16 %v6829_v58  ;;  %p5901_p2 = por %p5900_p1, %p5899_p0 }
  0xc9   : > { %5544 = vmatprep.subr.bf16.mxu1 %v5829_v55  ;;  %p5895_p13 = pneg %p5894_p12 }
  0xcb   : > { %5497 = vmatpush3.bf16.msra.mxu0 %v5824_v18  ;;  %v2187_v18 = vsel %vm957_vm0, %v2185_v5, %v2186_v22  ;;  %p5902_p3 = pnand %p5901_p2, %p5895_p13 }
  0xcc   : > { %5498 = vmatprep.subr.bf16.mxu0 %v5827_v52  ;;  %5545 = vmatpush3.bf16.msra.mxu1 %v5829_v55  ;;  %v2189_v55 = vsel %vm957_vm0, %v2186_v22, %v2188_v35 }
  0xcd   : > { %5419 = vmatmul.mubr.bf16.gmra.mxu0 %v7874_v12  ;;  %5546 = vmatprep.subr.bf16.mxu1 %v5831_v30  ;;  %v6849_v20 = vpack.c.bf16 %v2189_v55, %v2187_v18 }
  0xce   : > { %5467 = vmatmul.mubr.bf16.gmra.mxu1 %v6597_v24  ;;  %5422 = vmatprep.mubr.bf16.mxu0 %v6400_v4 }
  0xcf   : > { %5470 = vmatprep.mubr.bf16.mxu1 %v6607_v0  ;;  %5499 = vmatpush3.bf16.msra.mxu0 %v5827_v52  ;;  %v2517_v52 = vsel %vm1408_vm1, %v2515_v19, %v2516_v62 }
  0xd0   : > { %5500 = vmatprep.subr.bf16.mxu0 %v5830_v38  ;;  %5547 = vmatpush3.bf16.msra.mxu1 %v5831_v30  ;;  %v2519_v30 = vsel %vm1408_vm1, %v2516_v62, %v2518_v11  ;;  %v5834_v62 = vld [vmem:[%s7729_s2 + $0x230] sm:$0xff]  }
  0xd1   : > { %5548 = vmatprep.subr.bf16.mxu1 %v5832_v51  ;;  %v6853_v33 = vpack.c.bf16 %v2519_v30, %v2517_v52 }
  0xd3   : > { %5501 = vmatpush3.bf16.msra.mxu0 %v5830_v38  ;;  %v3501_v38 = vrot.slane %v569_v17, 2 }
  0xd4   : > { %5549 = vmatpush3.bf16.msra.mxu1 %v5832_v51  ;;  %5582 = vmatprep.subr.bf16.mxu0 %v5833_v23  ;;  %v3502_v51 = vrot.slane %v570_v54, 2 }
  0xd5   : > { %5423 = vmatmul.mubr.bf16.gmra.mxu0 %v6432_v14 }
  0xd6   : > { %5471 = vmatmul.mubr.bf16.gmra.mxu1 %v6616_v63  ;;  %5426 = vmatprep.mubr.bf16.mxu0 %v6447_v56  ;;  %v6856_v5 = vsel %vm1408_vm1, %v3501_v38, %v3502_v51  ;;  %v6859_v22 = vsel %vm1408_vm1, %v3502_v51, %v3504_v25 }
  0xd7   : > { %5474 = vmatprep.mubr.bf16.mxu1 %v6625_v57 }
  0xdd   : > { %5427 = vmatmul.mubr.bf16.gmra.mxu0 %v6476_v45 }
  0xde   : > { %5475 = vmatmul.mubr.bf16.gmra.mxu1 %v6635_v6  ;;  %5430 = vmatprep.mubr.bf16.mxu0 %v6478_v37 }
  0xdf   : > { %5478 = vmatprep.mubr.bf16.mxu1 %v6644_v29 }
  0xe5   : > { %5431 = vmatmul.mubr.bf16.gmra.mxu0 %v6642_v8 }
  0xe6   : > { %5479 = vmatmul.mubr.bf16.gmra.mxu1 %v6648_v2  ;;  %5434 = vmatprep.mubr.bf16.mxu0 %v6663_v42 }
  0xe7   : > { %5482 = vmatprep.mubr.bf16.mxu1 %v6653_v1 }
  0xed   : > { %5435 = vmatmul.mubr.bf16.gmra.mxu0 %v6849_v20 }
  0xee   : > { %5483 = vmatmul.mubr.bf16.gmra.mxu1 %v6853_v33  ;;  %5502 = vmatprep.mubr.bf16.mxu0 %v7860_v43  ;;  %v5835_v43 = vld [vmem:[%s7729_s2 + $0x228] sm:$0xff]  }
  0xef   : > { %5550 = vmatprep.mubr.bf16.mxu1 %v7868_v39 }
  0xf5   : > { %v5216_v35 = vpop.f32.mrf.mxu0  ;;  %5503 = vmatmul.mubr.bf16.vlgmr.msra.gmra.mxu0 %v7861_v34 }
  0xf6   : > { %v5264_v11 = vpop.f32.mrf.mxu1  ;;  %5583 = vmatpush3.bf16.msra.mxu0 %v5833_v23  ;;  %5551 = vmatmul.mubr.bf16.vlgmr.msra.gmra.mxu1 %v7869_v44 }
  0xf7   : > { %v6872_v18 = vadd.f32 %v5264_v11, %v5216_v35  ;;  %v718_v55 = vpop.f32.mrf.mxu0  ;;  %5506 = vmatprep.mubr.bf16.mxu0 %v7862_v9  ;;  %5584 = vmatprep.subr.bf16.mxu0 %v5834_v62  ;;  %v5836_v9 = vld [vmem:[%s7729_s2 + $0x220] sm:$0xff]  }
  0xf8   : > { %v1217_v39 = vpop.f32.mrf.mxu1  ;;  %5554 = vmatprep.mubr.bf16.mxu1 %v7870_v32 }
  0xf9   : > { %v6879_v52 = vadd.f32 %v1217_v39, %v718_v55  ;;  %v5217_v34 = vpop.f32.mrf.mxu0  ;;  %v5837_v55 = vld [vmem:[%s7729_s2 + $0x218] sm:$0xff]  }
  0xfa   : > { %v5265_v30 = vpop.f32.mrf.mxu1  ;;  %5585 = vmatpush3.bf16.msra.mxu0 %v5834_v62 }
  0xfb   : > { %v6881_v23 = vadd.f32 %v5265_v30, %v5217_v34  ;;  %v721_v44 = vpop.f32.mrf.mxu0  ;;  %5586 = vmatprep.subr.bf16.mxu0 %v5835_v43 }
  0xfc   : > { %v1220_v38 = vpop.f32.mrf.mxu1 }
  0xfd   : > { %v6886_v51 = vadd.f32 %v1220_v38, %v721_v44  ;;  %v5220_v25 = vpop.f32.mrf.mxu0  ;;  %5507 = vmatmul.mubr.bf16.gmra.mxu0 %v7863_v3 }
  0xfe   : > { %v5268_v32 = vpop.f32.mrf.mxu1  ;;  %5555 = vmatmul.mubr.bf16.gmra.mxu1 %v7871_v10  ;;  %5510 = vmatprep.mubr.bf16.mxu0 %v7864_v26 }
  0xff   : > { %v6891_v62 = vadd.f32 %v5268_v32, %v5220_v25  ;;  %v734_v35 = vpop.f32.mrf.mxu0  ;;  %5558 = vmatprep.mubr.bf16.mxu1 %v7872_v59  ;;  %5587 = vmatpush3.bf16.msra.mxu0 %v5835_v43  ;;  %v5838_v59 = vld [vmem:[%s7729_s2 + $0x210] sm:$0xff]  }
 0x100   : > { %v1233_v11 = vpop.f32.mrf.mxu1  ;;  %5588 = vmatprep.subr.bf16.mxu0 %v5836_v9 }
 0x101   : > { %v6897_v39 = vadd.f32 %v1233_v11, %v734_v35  ;;  %v5221_v3 = vpop.f32.mrf.mxu0  ;;  %v5839_v35 = vld [vmem:[%s7729_s2 + $0x208] sm:$0xff]  }
 0x102   : > { %v5269_v34 = vpop.f32.mrf.mxu1 }
 0x103   : > { %v6899_v30 = vadd.f32 %v5269_v34, %v5221_v3  ;;  %v737_v10 = vpop.f32.mrf.mxu0  ;;  %5589 = vmatpush3.bf16.msra.mxu0 %v5836_v9 }
 0x104   : > { %v1236_v26 = vpop.f32.mrf.mxu1  ;;  %5590 = vmatprep.subr.bf16.mxu0 %v5837_v55 }
 0x105   : > { %v6904_v43 = vadd.f32 %v1236_v26, %v737_v10  ;;  %v5224_v44 = vpop.f32.mrf.mxu0  ;;  %5511 = vmatmul.mubr.bf16.gmra.mxu0 %v7865_v48 }
 0x106   : > { %v5272_v38 = vpop.f32.mrf.mxu1  ;;  %5559 = vmatmul.mubr.bf16.gmra.mxu1 %v7873_v41  ;;  %5514 = vmatprep.mubr.bf16.mxu0 %v7866_v40 }
 0x107   : > { %v6909_v25 = vadd.f32 %v5272_v38, %v5224_v44  ;;  %v750_v32 = vpop.f32.mrf.mxu0  ;;  %5562 = vmatprep.mubr.bf16.mxu1 %v7874_v12  ;;  %5591 = vmatpush3.bf16.msra.mxu0 %v5837_v55  ;;  %v5841_v12 = vld [vmem:[%s7729_s2 + $0x200] sm:$0xff]  }
 0x108   : > { %v1249_v9 = vpop.f32.mrf.mxu1  ;;  %5592 = vmatprep.subr.bf16.mxu0 %v5838_v59 }
 0x109   : > { %v6915_v11 = vadd.f32 %v1249_v9, %v750_v32  ;;  %v5225_v48 = vpop.f32.mrf.mxu0 }
 0x10a   : > { %v5273_v3 = vpop.f32.mrf.mxu1 }
 0x10b   : > { %v6917_v34 = vadd.f32 %v5273_v3, %v5225_v48  ;;  %v753_v41 = vpop.f32.mrf.mxu0  ;;  %5593 = vmatpush3.bf16.msra.mxu0 %v5838_v59 }
 0x10c   : > { %v1252_v40 = vpop.f32.mrf.mxu1  ;;  %5594 = vmatprep.subr.bf16.mxu0 %v5839_v35 }
 0x10d   : > { %v6922_v55 = vadd.f32 %v1252_v40, %v753_v41  ;;  %v5228_v10 = vpop.f32.mrf.mxu0  ;;  %5515 = vmatmul.mubr.bf16.gmra.mxu0 %v6290_v21 }
 0x10e   : > { %v5276_v26 = vpop.f32.mrf.mxu1  ;;  %5563 = vmatmul.mubr.bf16.gmra.mxu1 %v6400_v4  ;;  %5518 = vmatprep.mubr.bf16.mxu0 %v6299_v36 }
 0x10f   : > { %v6927_v44 = vadd.f32 %v5276_v26, %v5228_v10  ;;  %v766_v38 = vpop.f32.mrf.mxu0  ;;  %5566 = vmatprep.mubr.bf16.mxu1 %v6432_v14  ;;  %5595 = vmatpush3.bf16.msra.mxu0 %v5839_v35 }
 0x110   : > { %v1265_v59 = vpop.f32.mrf.mxu1  ;;  %5596 = vmatprep.subr.bf16.mxu0 %v5841_v12 }
 0x111   : > { %v6930_v32 = vadd.f32 %v1265_v59, %v766_v38  ;;  %v5229_v9 = vpop.f32.mrf.mxu0 }
 0x112   : > { %v5277_v48 = vpop.f32.mrf.mxu1 }
 0x113   : > { %v6932_v3 = vadd.f32 %v5277_v48, %v5229_v9  ;;  %v769_v21 = vpop.f32.mrf.mxu0  ;;  %5597 = vmatpush3.bf16.msra.mxu0 %v5841_v12 }
 0x114   : > { %v1268_v41 = vpop.f32.mrf.mxu1 }
 0x115   : > { %v6934_v4 = vadd.f32 %v1268_v41, %v769_v21  ;;  %v5232_v36 = vpop.f32.mrf.mxu0  ;;  %5519 = vmatmul.mubr.bf16.gmra.mxu0 %v7845_v16 }
 0x116   : > { %v5280_v40 = vpop.f32.mrf.mxu1  ;;  %5567 = vmatmul.mubr.bf16.gmra.mxu1 %v6447_v56  ;;  %5522 = vmatprep.mubr.bf16.mxu0 %v7850_v13 }
 0x117   : > { %v6939_v14 = vadd.f32 %v5280_v40, %v5232_v36  ;;  %v782_v35 = vpop.f32.mrf.mxu0  ;;  %5570 = vmatprep.mubr.bf16.mxu1 %v6476_v45 }
 0x118   : > { %v1281_v10 = vpop.f32.mrf.mxu1 }
 0x119   : > { %v6942_v26 = vadd.f32 %v1281_v10, %v782_v35  ;;  %v5233_v12 = vpop.f32.mrf.mxu0 }
 0x11a   : > { %v5281_v38 = vpop.f32.mrf.mxu1 }
 0x11b   : > { %v6944_v59 = vadd.f32 %v5281_v38, %v5233_v12  ;;  %v6946_v9 = vpop.f32.mrf.mxu0 }
 0x11c   : > { %v6948_v16 = vpop.f32.mrf.mxu1 }
 0x11d   : > { %v5236_v48 = vpop.f32.mrf.mxu0  ;;  %5523 = vmatmul.mubr.bf16.gmra.mxu0 %v7857_v61  ;;  %v3171_v61 = vrot.slane %v569_v17, 1 }
 0x11e   : > { %v5284_v56 = vpop.f32.mrf.mxu1  ;;  %5571 = vmatmul.mubr.bf16.gmra.mxu1 %v6478_v37  ;;  %5526 = vmatprep.mubr.bf16.mxu0 %v7858_v50  ;;  %v3172_v37 = vrot.slane %v570_v54, 1  ;;  %v3174_v50 = vrot.slane %v571_v31, 1 }
 0x11f   : > { %v6953_v45 = vadd.f32 %v5284_v56, %v5236_v48  ;;  %v798_v13 = vpop.f32.mrf.mxu0  ;;  %5574 = vmatprep.mubr.bf16.mxu1 %v6642_v8 }
 0x120   : > { %v1297_v21 = vpop.f32.mrf.mxu1  ;;  %v3173_v17 = vsel %vm957_vm0, %v3171_v61, %v3172_v37  ;;  %v3175_v15 = vsel %vm957_vm0, %v3172_v37, %v3174_v50 }
 0x121   : > { %v6956_v41 = vadd.f32 %v1297_v21, %v798_v13  ;;  %v5237_v36 = vpop.f32.mrf.mxu0 }
 0x122   : > { %v5285_v40 = vpop.f32.mrf.mxu1 }
 0x123   : > { %v6958_v35 = vadd.f32 %v5285_v40, %v5237_v36  ;;  %v6960_v10 = vpop.f32.mrf.mxu0 }
 0x124   : > { %v6968_v12 = vpop.f32.mrf.mxu1 }
 0x125   : > { %v5240_v8 = vpop.f32.mrf.mxu0  ;;  %5527 = vmatmul.mubr.bf16.gmra.mxu0 %v6440_v60  ;;  %v3178_v60 = vpack.c.bf16 %v3175_v15, %v3173_v17 }
 0x126   : > { %v5288_v38 = vpop.f32.mrf.mxu1  ;;  %5575 = vmatmul.mubr.bf16.gmra.mxu1 %v6663_v42  ;;  %5530 = vmatprep.mubr.bf16.mxu0 %v6750_v53 }
 0x127   : > { %v6973_v48 = vadd.f32 %v5288_v38, %v5240_v8  ;;  %v814_v56 = vpop.f32.mrf.mxu0  ;;  %5578 = vmatprep.mubr.bf16.mxu1 %v6849_v20 }
 0x128   : > { %v1313_v54 = vpop.f32.mrf.mxu1 }
 0x129   : > { %v6978_v31 = vadd.f32 %v1313_v54, %v814_v56  ;;  %v5241_v13 = vpop.f32.mrf.mxu0 }
 0x12a   : > { %v5289_v21 = vpop.f32.mrf.mxu1 }
 0x12b   : > { %v6980_v36 = vadd.f32 %v5289_v21, %v5241_v13  ;;  %v6982_v42 = vpop.f32.mrf.mxu0 }
 0x12c   : > { %v6984_v53 = vpop.f32.mrf.mxu1 }
 0x12d   : > { %v5244_v40 = vpop.f32.mrf.mxu0  ;;  %5531 = vmatmul.mubr.bf16.gmra.mxu0 %v6829_v58 }
 0x12e   : > { %v5292_v20 = vpop.f32.mrf.mxu1  ;;  %5579 = vmatmul.mubr.bf16.gmra.mxu1 %v3178_v60  ;;  %5598 = vmatprep.mubr.bf16.mxu0 %v6528_v47 }
 0x12f   : > { %v6988_v61 = vadd.f32 %v5292_v20, %v5244_v40  ;;  %v830_v37 = vpop.f32.mrf.mxu0 }
 0x130   : > { %v1329_v50 = vpop.f32.mrf.mxu1 }
 0x131   : > { %v6990_v8 = vadd.f32 %v1329_v50, %v830_v37  ;;  %v5245_v38 = vpop.f32.mrf.mxu0 }
 0x132   : > { %v5293_v56 = vpop.f32.mrf.mxu1 }
 0x133   : > { %v6992_v17 = vadd.f32 %v5293_v56, %v5245_v38  ;;  %v833_v15 = vpop.f32.mrf.mxu0 }
 0x134   : > { %v1332_v54 = vpop.f32.mrf.mxu1 }
 0x135   : > { %v6994_v13 = vadd.f32 %v1332_v54, %v833_v15  ;;  %v5312_v21 = vpop.f32.mrf.mxu0  ;;  %5599 = vmatmul.mubr.bf16.vlgmr.msra.gmra.mxu0 %v6549_v27 }
 0x136   : > { %v1797_v58 = vadd.f32 %v5312_v21, %v6872_v18  ;;  %v5360_v47 = vpop.f32.mrf.mxu1  ;;  %5602 = vmatprep.mubr.bf16.mxu0 %v6558_v46 }
 0x137   : > { %v1668_v60 = vpop.f32.mrf.mxu0 }
 0x138   : > { %v1795_v40 = vadd.f32 %v1668_v60, %v6879_v52  ;;  %v7000_v20 = vadd.f32 %v5360_v47, %v1797_v58  ;;  %v1991_v37 = vpop.f32.mrf.mxu1 }
 0x139   : > { %v5313_v50 = vpop.f32.mrf.mxu0 }
 0x13a   : > { %v1798_v38 = vadd.f32 %v5313_v50, %v6881_v23  ;;  %v7003_v56 = vadd.f32 %v1991_v37, %v1795_v40  ;;  %v5361_v15 = vpop.f32.mrf.mxu1 }
 0x13b   : > { %v1671_v54 = vpop.f32.mrf.mxu0 }
 0x13c   : > { %v1796_v27 = vadd.f32 %v1671_v54, %v6886_v51  ;;  %v7006_v19 = vadd.f32 %v5361_v15, %v1798_v38  ;;  %v1994_v18 = vpop.f32.mrf.mxu1 }
 0x13d   : > { %v5316_v21 = vpop.f32.mrf.mxu0  ;;  %5603 = vmatmul.mubr.bf16.gmra.mxu0 %v6567_v28 }
 0x13e   : > { %v1801_v46 = vadd.f32 %v5316_v21, %v6891_v62  ;;  %v7010_v52 = vadd.f32 %v1994_v18, %v1796_v27  ;;  %v5364_v58 = vpop.f32.mrf.mxu1  ;;  %5606 = vmatprep.mubr.bf16.mxu0 %v6576_v49 }
 0x13f   : > { %v1684_v23 = vpop.f32.mrf.mxu0 }
 0x140   : > { %v1799_v47 = vadd.f32 %v1684_v23, %v6897_v39  ;;  %v7014_v60 = vadd.f32 %v5364_v58, %v1801_v46  ;;  %v2007_v40 = vpop.f32.mrf.mxu1 }
 0x141   : > { %v5317_v51 = vpop.f32.mrf.mxu0 }
 0x142   : > { %v1802_v37 = vadd.f32 %v5317_v51, %v6899_v30  ;;  %v7017_v50 = vadd.f32 %v2007_v40, %v1799_v47  ;;  %v5365_v38 = vpop.f32.mrf.mxu1 }
 0x143   : > { %v1687_v28 = vpop.f32.mrf.mxu0 }
 0x144   : > { %v1800_v62 = vadd.f32 %v1687_v28, %v6904_v43  ;;  %v7020_v15 = vadd.f32 %v5365_v38, %v1802_v37  ;;  %v2010_v54 = vpop.f32.mrf.mxu1 }
 0x145   : > { %v5320_v27 = vpop.f32.mrf.mxu0  ;;  %5607 = vmatmul.mubr.bf16.gmra.mxu0 %v6586_v7 }
 0x146   : > { %v1805_v49 = vadd.f32 %v5320_v27, %v6909_v25  ;;  %v7024_v39 = vadd.f32 %v2010_v54, %v1800_v62  ;;  %v5368_v18 = vpop.f32.mrf.mxu1  ;;  %5610 = vmatprep.mubr.bf16.mxu0 %v6597_v24 }
 0x147   : > { %v1700_v30 = vpop.f32.mrf.mxu0 }
 0x148   : > { %v1803_v21 = vadd.f32 %v1700_v30, %v6915_v11  ;;  %v7028_v46 = vadd.f32 %v5368_v18, %v1805_v49  ;;  %v2023_v58 = vpop.f32.mrf.mxu1 }
 0x149   : > { %v5321_v43 = vpop.f32.mrf.mxu0 }
 0x14a   : > { %v1806_v23 = vadd.f32 %v5321_v43, %v6917_v34  ;;  %v7031_v47 = vadd.f32 %v2023_v58, %v1803_v21  ;;  %v5369_v40 = vpop.f32.mrf.mxu1 }
 0x14b   : > { %v1703_v7 = vpop.f32.mrf.mxu0 }
 0x14c   : > { %v1804_v25 = vadd.f32 %v1703_v7, %v6922_v55  ;;  %v7034_v51 = vadd.f32 %v5369_v40, %v1806_v23  ;;  %v2026_v37 = vpop.f32.mrf.mxu1 }
 0x14d   : > { %v5324_v38 = vpop.f32.mrf.mxu0  ;;  %5611 = vmatmul.mubr.bf16.gmra.mxu0 %v6607_v0 }
 0x14e   : > { %v1809_v24 = vadd.f32 %v5324_v38, %v6927_v44  ;;  %v7038_v11 = vadd.f32 %v2026_v37, %v1804_v25  ;;  %v5372_v28 = vpop.f32.mrf.mxu1  ;;  %5614 = vmatprep.mubr.bf16.mxu0 %v6616_v63  ;;  %v1361_v37 = vadd.f32 %v6948_v16, %v6946_v9 }
 0x14f   : > { %v1716_v34 = vpop.f32.mrf.mxu0 }
 0x150   : > { %v1807_v62 = vadd.f32 %v1716_v34, %v6930_v32  ;;  %v7042_v54 = vadd.f32 %v5372_v28, %v1809_v24  ;;  %v2039_v27 = vpop.f32.mrf.mxu1 }
 0x151   : > { %v5325_v55 = vpop.f32.mrf.mxu0 }
 0x152   : > { %v1810_v49 = vadd.f32 %v5325_v55, %v6932_v3  ;;  %v7045_v18 = vadd.f32 %v2039_v27, %v1807_v62  ;;  %v5373_v30 = vpop.f32.mrf.mxu1 }
 0x153   : > { %v1719_v0 = vpop.f32.mrf.mxu0 }
 0x154   : > { %v1808_v44 = vadd.f32 %v1719_v0, %v6934_v4  ;;  %v7048_v21 = vadd.f32 %v5373_v30, %v1810_v49  ;;  %v2042_v58 = vpop.f32.mrf.mxu1  ;;  %v1365_v0 = vadd.f32 %v6968_v12, %v6960_v10 }
 0x155   : > { %v5328_v43 = vpop.f32.mrf.mxu0  ;;  %5615 = vmatmul.mubr.bf16.gmra.mxu0 %v6625_v57 }
 0x156   : > { %v1813_v63 = vadd.f32 %v5328_v43, %v6939_v14  ;;  %v7052_v32 = vadd.f32 %v2042_v58, %v1808_v44  ;;  %v5376_v23 = vpop.f32.mrf.mxu1  ;;  %5618 = vmatprep.mubr.bf16.mxu0 %v6635_v6 }
 0x157   : > { %v1732_v3 = vpop.f32.mrf.mxu0 }
 0x158   : > { %v1811_v40 = vadd.f32 %v1732_v3, %v6942_v26  ;;  %v7056_v7 = vadd.f32 %v5376_v23, %v1813_v63  ;;  %v2055_v25 = vpop.f32.mrf.mxu1 }
 0x159   : > { %v5329_v4 = vpop.f32.mrf.mxu0 }
 0x15a   : > { %v1814_v38 = vadd.f32 %v5329_v4, %v6944_v59  ;;  %v7061_v57 = vadd.f32 %v2055_v25, %v1811_v40  ;;  %v5377_v14 = vpop.f32.mrf.mxu1 }
 0x15b   : > { %v1735_v24 = vpop.f32.mrf.mxu0 }
 0x15c   : > { %v1812_v28 = vadd.f32 %v1735_v24, %v1361_v37  ;;  %v7063_v34 = vadd.f32 %v5377_v14, %v1814_v38  ;;  %v2058_v6 = vpop.f32.mrf.mxu1  ;;  %v1369_v37 = vadd.f32 %v6984_v53, %v6982_v42 }
 0x15d   : > { %v5332_v62 = vpop.f32.mrf.mxu0  ;;  %5619 = vmatmul.mubr.bf16.gmra.mxu0 %v6644_v29 }
 0x15e   : > { %v1817_v26 = vadd.f32 %v5332_v62, %v6953_v45  ;;  %v7067_v27 = vadd.f32 %v2058_v6, %v1812_v28  ;;  %v5380_v55 = vpop.f32.mrf.mxu1  ;;  %5622 = vmatprep.mubr.bf16.mxu0 %v6648_v2 }
 0x15f   : > { %v1748_v9 = vpop.f32.mrf.mxu0 }
 0x160   : > { %v1815_v59 = vadd.f32 %v1748_v9, %v6956_v41  ;;  %v7071_v16 = vadd.f32 %v5380_v55, %v1817_v26  ;;  %v2071_v49 = vpop.f32.mrf.mxu1 }
 0x161   : > { %v5333_v30 = vpop.f32.mrf.mxu0 }
 0x162   : > { %v1818_v44 = vadd.f32 %v5333_v30, %v6958_v35  ;;  %v7076_v29 = vadd.f32 %v2071_v49, %v1815_v59  ;;  %v5381_v45 = vpop.f32.mrf.mxu1 }
 0x163   : > { %v1751_v58 = vpop.f32.mrf.mxu0 }
 0x164   : > { %v1816_v43 = vadd.f32 %v1751_v58, %v1365_v0  ;;  %v7078_v63 = vadd.f32 %v5381_v45, %v1818_v44  ;;  %v2074_v2 = vpop.f32.mrf.mxu1 }
 0x165   : > { %v5336_v23 = vpop.f32.mrf.mxu0  ;;  %5623 = vmatmul.mubr.bf16.gmra.mxu0 %v6653_v1 }
 0x166   : > { %v1821_v41 = vadd.f32 %v5336_v23, %v6973_v48  ;;  %v7082_v3 = vadd.f32 %v2074_v2, %v1816_v43  ;;  %v5384_v40 = vpop.f32.mrf.mxu1  ;;  %5626 = vmatprep.mubr.bf16.mxu0 %v6853_v33 }
 0x167   : > { %v1764_v10 = vpop.f32.mrf.mxu0 }
 0x168   : > { %v1819_v35 = vadd.f32 %v1764_v10, %v6978_v31  ;;  %v7086_v12 = vadd.f32 %v5384_v40, %v1821_v41  ;;  %v2087_v25 = vpop.f32.mrf.mxu1  ;;  %v7875_v31 = vpack.c.bf16 %v6859_v22, %v6856_v5 }
 0x169   : > { %v5337_v4 = vpop.f32.mrf.mxu0 }
 0x16a   : > { %v1822_v38 = vadd.f32 %v5337_v4, %v6980_v36  ;;  %v7091_v1 = vadd.f32 %v2087_v25, %v1819_v35  ;;  %v5385_v48 = vpop.f32.mrf.mxu1 }
 0x16b   : > { %v1767_v14 = vpop.f32.mrf.mxu0 }
 0x16c   : > { %v1820_v24 = vadd.f32 %v1767_v14, %v1369_v37  ;;  %v7093_v28 = vadd.f32 %v5385_v48, %v1822_v38  ;;  %v2090_v33 = vpop.f32.mrf.mxu1 }
 0x16d   : > { %v5340_v6 = vpop.f32.mrf.mxu0  ;;  %5627 = vmatmul.mubr.bf16.gmra.mxu0 %v7875_v31 }
 0x16e   : > { %v1825_v62 = vadd.f32 %v5340_v6, %v6988_v61  ;;  %v7099_v26 = vadd.f32 %v2090_v33, %v1820_v24  ;;  %v5388_v42 = vpop.f32.mrf.mxu1 }
 0x16f   : > { %v1780_v53 = vpop.f32.mrf.mxu0 }
 0x170   : > { %v1823_v36 = vadd.f32 %v1780_v53, %v6990_v8  ;;  %v7102_v55 = vadd.f32 %v5388_v42, %v1825_v62  ;;  %v2103_v9 = vpop.f32.mrf.mxu1 }
 0x171   : > { %v5341_v59 = vpop.f32.mrf.mxu0 }
 0x172   : > { %v1826_v49 = vadd.f32 %v5341_v59, %v6992_v17  ;;  %v7105_v30 = vadd.f32 %v2103_v9, %v1823_v36  ;;  %v5389_v0 = vpop.f32.mrf.mxu1 }
 0x173   : > { %v1783_v44 = vpop.f32.mrf.mxu0 }
 0x174   : > { %v1824_v5 = vadd.f32 %v1783_v44, %v6994_v13  ;;  %v7108_v22 = vadd.f32 %v5389_v0, %v1826_v49  ;;  %v2106_v61 = vpop.f32.mrf.mxu1 }
 0x175   : > { %v5408_v45 = vpop.f32.mrf.mxu0 }
 0x176   : > { %v7110_v58 = vadd.f32 %v2106_v61, %v1824_v5  ;;  %v2453_v8 = vadd.f32 %v5408_v45, %v7000_v20  ;;  %v5456_v43 = vpop.f32.mrf.mxu1 }
 0x177   : > { %v2324_v2 = vpop.f32.mrf.mxu0 }
 0x178   : > { %v2451_v23 = vadd.f32 %v2324_v2, %v7003_v56  ;;  %v7114_v41 = vadd.f32 %v5456_v43, %v2453_v8  ;;  %v2654_v17 = vpop.f32.mrf.mxu1 }
 0x179   : > { %v5409_v40 = vpop.f32.mrf.mxu0 }
 0x17a   : > { %v2454_v10 = vadd.f32 %v5409_v40, %v7006_v19  ;;  %v7117_v35 = vadd.f32 %v2654_v17, %v2451_v23  ;;  %v5457_v13 = vpop.f32.mrf.mxu1 }
 0x17b   : > { %v2327_v25 = vpop.f32.mrf.mxu0 }
 0x17c   : > { %v7120_v4 = vadd.f32 %v2327_v25, %v7010_v52  ;;  %v7122_v37 = vadd.f32 %v5457_v13, %v2454_v10  ;;  %v7124_v20 = vpop.f32.mrf.mxu1 }
 0x17d   : > { %v5412_v38 = vpop.f32.mrf.mxu0 }
 0x17e   : > { %v2457_v56 = vadd.f32 %v5412_v38, %v7014_v60  ;;  %v5460_v48 = vpop.f32.mrf.mxu1 }
 0x17f   : > { %v2340_v14 = vpop.f32.mrf.mxu0 }
 0x180   : > { %v7128_v24 = vadd.f32 %v2340_v14, %v7017_v50  ;;  %v7130_v19 = vadd.f32 %v5460_v48, %v2457_v56  ;;  %v7132_v33 = vpop.f32.mrf.mxu1 }
 0x181   : > { %v5413_v6 = vpop.f32.mrf.mxu0 }
 0x182   : > { %v2458_v52 = vadd.f32 %v5413_v6, %v7020_v15  ;;  %v5461_v31 = vpop.f32.mrf.mxu1 }
 0x183   : > { %v2343_v62 = vpop.f32.mrf.mxu0 }
 0x184   : > { %v7136_v42 = vadd.f32 %v2343_v62, %v7024_v39  ;;  %v7138_v53 = vadd.f32 %v5461_v31, %v2458_v52  ;;  %v7140_v60 = vpop.f32.mrf.mxu1 }
 0x185   : > { %v5416_v36 = vpop.f32.mrf.mxu0 }
 0x186   : > { %v2461_v50 = vadd.f32 %v5416_v36, %v7028_v46  ;;  %v5464_v9 = vpop.f32.mrf.mxu1 }
 0x187   : > { %v2356_v59 = vpop.f32.mrf.mxu0 }
 0x188   : > { %v7144_v49 = vadd.f32 %v2356_v59, %v7031_v47  ;;  %v7146_v0 = vadd.f32 %v5464_v9, %v2461_v50  ;;  %v7148_v15 = vpop.f32.mrf.mxu1 }
 0x189   : > { %v5417_v44 = vpop.f32.mrf.mxu0 }
 0x18a   : > { %v2462_v39 = vadd.f32 %v5417_v44, %v7034_v51  ;;  %v5465_v5 = vpop.f32.mrf.mxu1  ;;  %v7794_v44 = vmov 0.0  }
 0x18b   : > { %v2359_v61 = vpop.f32.mrf.mxu0  ;;  %5630 = vmatprep.subr.bf16.mxu1 %v7794_v44  ;;  %5670 = vmatprep.subr.bf16.mxu0 %v7794_v44 }
 0x18c   : > { %v7152_v45 = vadd.f32 %v2359_v61, %v7038_v11  ;;  %v7154_v8 = vadd.f32 %v5465_v5, %v2462_v39  ;;  %v7156_v46 = vpop.f32.mrf.mxu1  ;;  %5646 = vmatprep.mubr.msk.bf16.mxu1 %vm5955_vm2, %v7794_v44  ;;  %5686 = vmatprep.mubr.msk.bf16.mxu0 %vm5955_vm2, %v7794_v44 }
 0x18d   : > { %v5420_v43 = vpop.f32.mrf.mxu0 }
 0x18e   : > { %v2465_v47 = vadd.f32 %v5420_v43, %v7042_v54  ;;  %v5468_v2 = vpop.f32.mrf.mxu1 }
 0x18f   : > { %v2372_v23 = vpop.f32.mrf.mxu0 }
 0x190   : > { %v7160_v17 = vadd.f32 %v2372_v23, %v7045_v18  ;;  %v7162_v40 = vadd.f32 %v5468_v2, %v2465_v47  ;;  %v7164_v51 = vpop.f32.mrf.mxu1 }
 0x191   : > { %v5421_v10 = vpop.f32.mrf.mxu0 }
 0x192   : > { %v2466_v11 = vadd.f32 %v5421_v10, %v7048_v21  ;;  %v5469_v13 = vpop.f32.mrf.mxu1 }
 0x193   : > { %v2375_v25 = vpop.f32.mrf.mxu0 }
 0x194   : > { %v7168_v38 = vadd.f32 %v2375_v25, %v7052_v32  ;;  %v7170_v56 = vadd.f32 %v5469_v13, %v2466_v11  ;;  %v7172_v54 = vpop.f32.mrf.mxu1 }
 0x195   : > { %v5424_v48 = vpop.f32.mrf.mxu0 }
 0x196   : > { %v2469_v18 = vadd.f32 %v5424_v48, %v7056_v7  ;;  %v5472_v14 = vpop.f32.mrf.mxu1 }
 0x197   : > { %v2388_v6 = vpop.f32.mrf.mxu0 }
 0x198   : > { %v7176_v52 = vadd.f32 %v2388_v6, %v7061_v57  ;;  %v7178_v31 = vadd.f32 %v5472_v14, %v2469_v18  ;;  %v7180_v21 = vpop.f32.mrf.mxu1 }
 0x199   : > { %v5425_v62 = vpop.f32.mrf.mxu0 }
 0x19a   : > { %v2470_v32 = vadd.f32 %v5425_v62, %v7063_v34  ;;  %v5473_v36 = vpop.f32.mrf.mxu1  ;;  %v5842_v34 = vld [vmem:[%s7731_s4 + $0x38] sm:$0xff]  }
 0x19b   : > { %v2391_v50 = vpop.f32.mrf.mxu0  ;;  %5631 = vmatpush3.bf16.msra.mxu1 %v5842_v34 }
 0x19c   : > { %v7184_v9 = vadd.f32 %v2391_v50, %v7067_v27  ;;  %v7186_v59 = vadd.f32 %v5473_v36, %v2470_v32  ;;  %v7188_v7 = vpop.f32.mrf.mxu1  ;;  %5632 = vmatprep.subr.bf16.mxu1 %v7794_v44 }
 0x19d   : > { %v5428_v57 = vpop.f32.mrf.mxu0 }
 0x19e   : > { %v2473_v39 = vadd.f32 %v5428_v57, %v7071_v16  ;;  %v5476_v5 = vpop.f32.mrf.mxu1 }
 0x19f   : > { %v2404_v61 = vpop.f32.mrf.mxu0 }
 0x1a0   : > { %v7197_v27 = vadd.f32 %v2404_v61, %v7076_v29  ;;  %v7199_v43 = vadd.f32 %v5476_v5, %v2473_v39  ;;  %v7201_v47 = vpop.f32.mrf.mxu1 }
 0x1a1   : > { %7877 = vst [vmem:[#allocation30_spill] sm:$0xff] %v7201_v47  ;;  %v5429_v2 = vpop.f32.mrf.mxu0 }
 0x1a2   : > { %7876 = vst [vmem:[#allocation20_spill] sm:$0xff] %v7197_v27  ;;  %v2474_v23 = vadd.f32 %v5429_v2, %v7078_v63  ;;  %v5477_v10 = vpop.f32.mrf.mxu1  ;;  %v5843_v63 = vld [vmem:[%s7731_s4 + $0x30] sm:$0xff]  }
 0x1a3   : > { %v2407_v16 = vpop.f32.mrf.mxu0  ;;  %5633 = vmatpush3.bf16.msra.mxu1 %v5843_v63 }
 0x1a4   : > { %v7206_v11 = vadd.f32 %v2407_v16, %v7082_v3  ;;  %v7208_v13 = vadd.f32 %v5477_v10, %v2474_v23  ;;  %v7210_v25 = vpop.f32.mrf.mxu1  ;;  %5634 = vmatprep.subr.bf16.mxu1 %v7794_v44 }
 0x1a5   : > { %7879 = vst [vmem:[#allocation24_spill] sm:$0xff] %v7210_v25  ;;  %v5432_v29 = vpop.f32.mrf.mxu0 }
 0x1a6   : > { %7878 = vst [vmem:[#allocation29_spill] sm:$0xff] %v7206_v11  ;;  %v2477_v48 = vadd.f32 %v5432_v29, %v7086_v12  ;;  %v5480_v18 = vpop.f32.mrf.mxu1 }
 0x1a7   : > { %v2420_v14 = vpop.f32.mrf.mxu0 }
 0x1a8   : > { %v7217_v6 = vadd.f32 %v2420_v14, %v7091_v1  ;;  %v7219_v62 = vadd.f32 %v5480_v18, %v2477_v48  ;;  %v7221_v3 = vpop.f32.mrf.mxu1 }
 0x1a9   : > { %7881 = vst [vmem:[#allocation35_spill] sm:$0xff] %v7221_v3  ;;  %v5433_v32 = vpop.f32.mrf.mxu0 }
 0x1aa   : > { %7880 = vst [vmem:[#allocation22_spill] sm:$0xff] %v7217_v6  ;;  %v2478_v36 = vadd.f32 %v5433_v32, %v7093_v28  ;;  %v5481_v50 = vpop.f32.mrf.mxu1  ;;  %v5844_v28 = vld [vmem:[%s7731_s4 + $0x28] sm:$0xff]  }
 0x1ab   : > { %v2423_v12 = vpop.f32.mrf.mxu0  ;;  %5635 = vmatpush3.bf16.msra.mxu1 %v5844_v28 }
 0x1ac   : > { %v7226_v57 = vadd.f32 %v2423_v12, %v7099_v26  ;;  %v7228_v39 = vadd.f32 %v5481_v50, %v2478_v36  ;;  %v7230_v5 = vpop.f32.mrf.mxu1  ;;  %5636 = vmatprep.subr.bf16.mxu1 %v7794_v44 }
 0x1ad   : > { %7883 = vst [vmem:[#allocation27_spill] sm:$0xff] %v7230_v5  ;;  %v5436_v1 = vpop.f32.mrf.mxu0 }
 0x1ae   : > { %7882 = vst [vmem:[#allocation33_spill] sm:$0xff] %v7226_v57  ;;  %v2481_v61 = vadd.f32 %v5436_v1, %v7102_v55  ;;  %v5484_v34 = vpop.f32.mrf.mxu1 }
 0x1af   : > { %v2436_v2 = vpop.f32.mrf.mxu0 }
 0x1b0   : > { %v7237_v23 = vadd.f32 %v2436_v2, %v7105_v30  ;;  %v7239_v10 = vadd.f32 %v5484_v34, %v2481_v61  ;;  %v7241_v26 = vpop.f32.mrf.mxu1 }
 0x1b1   : > { %7885 = vst [vmem:[#allocation36_spill] sm:$0xff] %v7241_v26  ;;  %v5437_v16 = vpop.f32.mrf.mxu0 }
 0x1b2   : > { %7884 = vst [vmem:[#allocation25_spill] sm:$0xff] %v7237_v23  ;;  %v2482_v29 = vadd.f32 %v5437_v16, %v7108_v22  ;;  %v5485_v48 = vpop.f32.mrf.mxu1  ;;  %v5845_v22 = vld [vmem:[%s7731_s4 + $0x20] sm:$0xff]  }
 0x1b3   : > { %v2439_v55 = vpop.f32.mrf.mxu0  ;;  %5637 = vmatpush3.bf16.msra.mxu1 %v5845_v22 }
 0x1b4   : > { %v7246_v18 = vadd.f32 %v2439_v55, %v7110_v58  ;;  %v7248_v14 = vadd.f32 %v5485_v48, %v2482_v29  ;;  %v7250_v63 = vpop.f32.mrf.mxu1  ;;  %5638 = vmatprep.subr.bf16.mxu1 %v7794_v44 }
 0x1b5   : > { %7887 = vst [vmem:[#allocation31_spill] sm:$0xff] %v7250_v63  ;;  %v5504_v30 = vpop.f32.mrf.mxu0 }
 0x1b6   : > { %7886 = vst [vmem:[#allocation32_spill] sm:$0xff] %v7246_v18  ;;  %v7253_v32 = vadd.f32 %v5504_v30, %v7114_v41  ;;  %v7255_v36 = vpop.f32.mrf.mxu1 }
 0x1b7   : > { %v2977_v50 = vpop.f32.mrf.mxu0 }
 0x1b8   : > { %v7261_v12 = vadd.f32 %v2977_v50, %v7117_v35  ;;  %v7263_v58 = vpop.f32.mrf.mxu1 }
 0x1b9   : > { %v5505_v1 = vpop.f32.mrf.mxu0 }
 0x1ba   : > { %v7266_v61 = vadd.f32 %v5505_v1, %v7122_v37  ;;  %v7271_v34 = vpop.f32.mrf.mxu1  ;;  %v5846_v37 = vld [vmem:[%s7731_s4 + $0x18] sm:$0xff]  }
 0x1bb   : > { %v7269_v41 = vpop.f32.mrf.mxu0  ;;  %5639 = vmatpush3.bf16.msra.mxu1 %v5846_v37 }
 0x1bc   : > { %v7276_v16 = vpop.f32.mrf.mxu1  ;;  %5640 = vmatprep.subr.bf16.mxu1 %v7794_v44 }
 0x1bd   : > { %v5508_v2 = vpop.f32.mrf.mxu0 }
 0x1be   : > { %v7274_v28 = vadd.f32 %v5508_v2, %v7130_v19  ;;  %v7286_v55 = vpop.f32.mrf.mxu1 }
 0x1bf   : > { %v7278_v35 = vpop.f32.mrf.mxu0 }
 0x1c0   : > { %v7297_v22 = vpop.f32.mrf.mxu1 }
 0x1c1   : > { %v5509_v29 = vpop.f32.mrf.mxu0 }
 0x1c2   : > { %v7281_v48 = vadd.f32 %v5509_v29, %v7138_v53  ;;  %v5847_v53 = vld [vmem:[%s7731_s4 + $0x10] sm:$0xff]   ;;  %v7308_v37 = vpop.f32.mrf.mxu1 }
 0x1c3   : > { %v7288_v30 = vpop.f32.mrf.mxu0  ;;  %5641 = vmatpush3.bf16.msra.mxu1 %v5847_v53 }
 0x1c4   : > { %5642 = vmatprep.subr.bf16.mxu1 %v7794_v44 }
 0x1c5   : > { %v5512_v50 = vpop.f32.mrf.mxu0 }
 0x1c6   : > { %v7292_v19 = vadd.f32 %v5512_v50, %v7146_v0  ;;  %v5848_v0 = vld [vmem:[%s7731_s4 + $0x8] sm:$0xff]  }
 0x1c7   : > { %v7299_v1 = vpop.f32.mrf.mxu0  ;;  %5643 = vmatpush3.bf16.msra.mxu1 %v5848_v0 }
 0x1c8   : > { %5644 = vmatprep.subr.bf16.mxu1 %v7794_v44 }
 0x1c9   : > { %v5513_v2 = vpop.f32.mrf.mxu0 }
 0x1ca   : > { %v7303_v29 = vadd.f32 %v5513_v2, %v7154_v8  ;;  %v5849_v8 = vld [vmem:[%s7731_s4] sm:$0xff]   ;;  %v7319_v2 = vpop.f32.mrf.mxu1 }
 0x1cb   : > { %v7310_v50 = vpop.f32.mrf.mxu0  ;;  %5645 = vmatpush3.bf16.msra.mxu1 %v5849_v8 }
 0x1cc   : > { %5650 = vmatprep.subr.bf16.mxu1 %v7794_v44 }
 0x1cd   : > { %v5516_v63 = vpop.f32.mrf.mxu0 }
 0x1ce   : > { %v7314_v53 = vadd.f32 %v5516_v63, %v7162_v40  ;;  %v7331_v63 = vpop.f32.mrf.mxu1 }
 0x1cf   : > { %v7321_v18 = vpop.f32.mrf.mxu0 }
 0x1d0   : > { %v7338_v5 = vpop.f32.mrf.mxu1 }
 0x1d1   : > { %v5517_v0 = vpop.f32.mrf.mxu0 }
 0x1d2   : > { %v7329_v40 = vadd.f32 %v5517_v0, %v7170_v56  ;;  %v7345_v44 = vpop.f32.mrf.mxu1 }
 0x1d3   : > { %v7333_v26 = vpop.f32.mrf.mxu0 }
 0x1d4   : > { %v7352_v11 = vpop.f32.mrf.mxu1 }
 0x1d5   : > { %v5520_v23 = vpop.f32.mrf.mxu0 }
 0x1d6   : > { %v7336_v8 = vadd.f32 %v5520_v23, %v7178_v31  ;;  %v7359_v27 = vpop.f32.mrf.mxu1 }
 0x1d7   : > { %v7340_v57 = vpop.f32.mrf.mxu0 }
 0x1d8   : > { %7888 = vst [vmem:[#allocation34_spill] sm:$0xff] %v7336_v8  ;;  %v7366_v8 = vpop.f32.mrf.mxu1 }
 0x1d9   : > { %v5521_v3 = vpop.f32.mrf.mxu0 }
 0x1da   : > { %v7343_v6 = vadd.f32 %v5521_v3, %v7186_v59 }
 0x1db   : > { %v7347_v56 = vpop.f32.mrf.mxu0 }
 0x1dc   : > { %7889 = vst [vmem:[#allocation8_spill] sm:$0xff] %v7343_v6  ;;  %7890 = vst [vmem:[#allocation9_spill] sm:$0xff] %v7347_v56 }
 0x1dd   : > { %v5524_v0 = vpop.f32.mrf.mxu0 }
 0x1de   : > { %v7350_v25 = vadd.f32 %v5524_v0, %v7199_v43 }
 0x1df   : > { %v7354_v31 = vpop.f32.mrf.mxu0 }
 0x1e0   : > { %7891 = vst [vmem:[#allocation10_spill] sm:$0xff] %v7350_v25  ;;  %7892 = vst [vmem:[#allocation11_spill] sm:$0xff] %v7354_v31  ;;  %v7373_v31 = vpop.f32.mrf.mxu1 }
 0x1e1   : > { %v5525_v23 = vpop.f32.mrf.mxu0 }
 0x1e2   : > { %v7357_v47 = vadd.f32 %v5525_v23, %v7208_v13 }
 0x1e3   : > { %v7361_v59 = vpop.f32.mrf.mxu0 }
 0x1e4   : > { %7893 = vst [vmem:[#allocation13_spill] sm:$0xff] %v7357_v47  ;;  %7894 = vst [vmem:[#allocation14_spill] sm:$0xff] %v7361_v59  ;;  %v7380_v59 = vpop.f32.mrf.mxu1 }
 0x1e5   : > { %v5528_v3 = vpop.f32.mrf.mxu0 }
 0x1e6   : > { %v7364_v6 = vadd.f32 %v5528_v3, %v7219_v62 }
 0x1e7   : > { %v7368_v43 = vpop.f32.mrf.mxu0 }
 0x1e8   : > { %7895 = vst [vmem:[#allocation16_spill] sm:$0xff] %v7364_v6  ;;  %7896 = vst [vmem:[#allocation18_spill] sm:$0xff] %v7368_v43  ;;  %v7388_v43 = vpop.f32.mrf.mxu1 }
 0x1e9   : > { %v5529_v0 = vpop.f32.mrf.mxu0  ;;  %7902 = vst [vmem:[#allocation23_spill] sm:$0xff] %v7388_v43 }
 0x1ea   : > { %v7371_v25 = vadd.f32 %v5529_v0, %v7228_v39  ;;  %v2782_v0 = vadd.f32 %v7124_v20, %v7120_v4  ;;  %v2785_v20 = vadd.f32 %v7132_v33, %v7128_v24 }
 0x1eb   : > { %v7375_v13 = vpop.f32.mrf.mxu0 }
 0x1ec   : > { %7897 = vst [vmem:[#allocation12_spill] sm:$0xff] %v7371_v25  ;;  %7898 = vst [vmem:[#allocation15_spill] sm:$0xff] %v7375_v13  ;;  %v4931_v13 = vld [vmem:[%s7397_s30 + $0x8] sm:$0xff]  }
 0x1ed   : > { %v5532_v23 = vpop.f32.mrf.mxu0  ;;  %v4874_v43 = vunpack.c.h.bf16 %v4931_v13 }
 0x1ee   : > { %v7378_v47 = vadd.f32 %v5532_v23, %v7239_v10  ;;  %v3437_v23 = vadd.f32 %v7263_v58, %v7261_v12 }
 0x1ef   : > { %v7382_v62 = vpop.f32.mrf.mxu0 }
 0x1f0   : > { %7899 = vst [vmem:[#allocation17_spill] sm:$0xff] %v7378_v47  ;;  %7900 = vst [vmem:[#allocation19_spill] sm:$0xff] %v7382_v62  ;;  %v7405_v47 = vpop.f32.mrf.mxu1 }
 0x1f1   : > { %v5533_v3 = vpop.f32.mrf.mxu0 }
 0x1f2   : > { %v7385_v6 = vadd.f32 %v5533_v3, %v7248_v14  ;;  %v3439_v14 = vadd.f32 %v7255_v36, %v7253_v32  ;;  %v3105_v3 = vadd.f32 %v7269_v41, %v2782_v0  ;;  %v7415_v32 = vld [vmem:[%s7730_s3] ss:$0 sm:$0xff]  ;;  %v3108_v41 = vadd.f32 %v7278_v35, %v2785_v20  ;;  %v7420_v0 = vpop.f32.mrf.mxu1 }
 0x1f3   : > { %v7390_v39 = vpop.f32.mrf.mxu0  ;;  %v2789_v20 = vadd.f32 %v7148_v15, %v7144_v49 }
 0x1f4   : > { %7901 = vst [vmem:[#allocation21_spill] sm:$0xff] %v7385_v6  ;;  %7903 = vst [vmem:[#allocation26_spill] sm:$0xff] %v7390_v39  ;;  %v4868_v6 = vld [vmem:[%s7397_s30] sm:$0xff]   ;;  %v3440_v39 = vadd.f32 %v7271_v34, %v7266_v61  ;;  %v3438_v58 = vadd.f32 %v7276_v16, %v3105_v3  ;;  %v4873_v34 = vunpack.c.l.bf16 %v4931_v13  ;;  %v4932_v16 = vld [vmem:[%s7397_s30 + $0x10] sm:$0xff]   ;;  %v3441_v35 = vadd.f32 %v7297_v22, %v3108_v41 }
 0x1f5   : > { %v5600_v10 = vpop.f32.mrf.mxu0  ;;  %v4869_v36 = vunpack.c.l.bf16 %v4868_v6  ;;  %v3444_v41 = vadd.f32 %v7308_v37, %v7281_v48  ;;  %v2790_v48 = vadd.f32 %v7156_v46, %v7152_v45  ;;  %v3447_v45 = vadd.f32 %v7331_v63, %v7292_v19 }
 0x1f6   : > { %v3769_v62 = vadd.f32 %v5600_v10, %v3439_v14 }
 0x1f7   : > { %v3640_v4 = vpop.f32.mrf.mxu0 }
 0x1f8   : > { %v3767_v25 = vadd.f32 %v3640_v4, %v3437_v23  ;;  %v3936_v10 = vadd.f32 %v7415_v32, %v3769_v62  ;;  %v4870_v23 = vunpack.c.h.bf16 %v4868_v6  ;;  %v2786_v4 = vadd.f32 %v7140_v60, %v7136_v42 }
 0x1f9   : > { %v5601_v12 = vpop.f32.mrf.mxu0  ;;  %v3443_v6 = vadd.f32 %v7286_v55, %v7274_v28 }
 0x1fa   : > { %v3934_v24 = vadd.f32 %v7415_v32, %v3767_v25  ;;  %v3770_v33 = vadd.f32 %v5601_v12, %v3440_v39  ;;  %v3109_v62 = vadd.f32 %v7288_v30, %v2786_v4  ;;  %v7434_v12 = vpop.f32.mrf.mxu1  ;;  %v3968_v60 = vadd.f32 %v4873_v34, %v3936_v10 }
 0x1fb   : > { %v3643_v61 = vpop.f32.mrf.mxu0 }
 0x1fc   : > { %v3768_v14 = vadd.f32 %v3643_v61, %v3438_v58  ;;  %v3966_v3 = vadd.f32 %v4869_v36, %v3934_v24  ;;  %v3937_v25 = vadd.f32 %v7415_v32, %v3770_v33  ;;  %v4933_v58 = vld [vmem:[%s7397_s30 + $0x18] sm:$0xff]   ;;  %v4877_v36 = vunpack.c.l.bf16 %v4932_v16  ;;  %v7442_v34 = vpop.f32.mrf.mxu1 }
 0x1fd   : > { %v5604_v56 = vpop.f32.mrf.mxu0  ;;  %v3112_v24 = vadd.f32 %v7299_v1, %v2789_v20  ;;  %v3442_v61 = vadd.f32 %v7319_v2, %v3109_v62  ;;  %v4881_v10 = vunpack.c.l.bf16 %v4933_v58  ;;  %v4000_v37 = vmax.f32 %v3968_v60, 0.0 }
 0x1fe   : > { %v3935_v39 = vadd.f32 %v7415_v32, %v3768_v14  ;;  %v3773_v49 = vadd.f32 %v5604_v56, %v3443_v6  ;;  %v3998_v33 = vmax.f32 %v3966_v3, 0.0  ;;  %v3969_v28 = vadd.f32 %v4874_v43, %v3937_v25  ;;  %v4934_v56 = vld [vmem:[%s7397_s30 + $0x20] sm:$0xff]   ;;  %v7452_v46 = vpop.f32.mrf.mxu1 }
 0x1ff   : > { %v3656_v42 = vpop.f32.mrf.mxu0  ;;  %v4882_v43 = vunpack.c.h.bf16 %v4933_v58  ;;  %v4878_v25 = vunpack.c.h.bf16 %v4932_v16  ;;  %v3445_v2 = vadd.f32 %v7338_v5, %v3112_v24  ;;  %v3113_v20 = vadd.f32 %v7310_v50, %v2790_v48  ;;  %v7467_v48 = vld [vmem:[%s7397_s30 + $0x30] sm:$0xff]  }
 0x200   : > { %v3967_v13 = vadd.f32 %v4870_v23, %v3935_v39  ;;  %v3771_v22 = vadd.f32 %v3656_v42, %v3441_v35  ;;  %v3940_v35 = vadd.f32 %v7415_v32, %v3773_v49  ;;  %v4001_v6 = vmax.f32 %v3969_v28, 0.0 }
 0x201   : > { %v5605_v15 = vpop.f32.mrf.mxu0  ;;  %v4885_v58 = vunpack.c.l.bf16 %v4934_v56  ;;  %v2793_v16 = vadd.f32 %v7164_v51, %v7160_v17  ;;  %v7464_v17 = vpop.f32.mrf.mxu1 }
 0x202   : > { %v3999_v55 = vmax.f32 %v3967_v13, 0.0  ;;  %v3938_v30 = vadd.f32 %v7415_v32, %v3771_v22  ;;  %v3774_v14 = vadd.f32 %v5605_v15, %v3444_v41  ;;  %v3448_v41 = vadd.f32 %v7345_v44, %v7303_v29 }
 0x203   : > { %v3659_v23 = vpop.f32.mrf.mxu0  ;;  %v3972_v19 = vadd.f32 %v4881_v10, %v3940_v35  ;;  %v3446_v15 = vadd.f32 %v7352_v11, %v3113_v20  ;;  %v2794_v44 = vadd.f32 %v7172_v54, %v7168_v38  ;;  %v4886_v11 = vunpack.c.h.bf16 %v4934_v56  ;;  %v7478_v54 = vpop.f32.mrf.mxu1 }
 0x204   : > { %v4030_v1 = vadd.f32 %v3999_v55, %v3998_v33  ;;  %v3970_v4 = vadd.f32 %v4877_v36, %v3938_v30  ;;  %v3772_v3 = vadd.f32 %v3659_v23, %v3442_v61  ;;  %v3941_v42 = vadd.f32 %v7415_v32, %v3774_v14  ;;  %v4935_v36 = vld [vmem:[%s7397_s30 + $0x28] sm:$0xff]  }
 0x205   : > { %v5608_v39 = vpop.f32.mrf.mxu0  ;;  %v3116_v33 = vadd.f32 %v7321_v18, %v2793_v16  ;;  %v4889_v61 = vunpack.c.l.bf16 %v4935_v36  ;;  %v4890_v29 = vunpack.c.h.bf16 %v4935_v36  ;;  %v3451_v38 = vadd.f32 %v7359_v27, %v7314_v53 }
 0x206   : > { %v4031_v62 = vadd.f32 %v4030_v1, %v4000_v37  ;;  %v3939_v60 = vadd.f32 %v7415_v32, %v3772_v3  ;;  %v4002_v22 = vmax.f32 %v3970_v4, 0.0  ;;  %v3777_v24 = vadd.f32 %v5608_v39, %v3447_v45  ;;  %v4937_v45 = vld [vmem:[%s7397_s30 + $0x38] sm:$0xff]  }
 0x207   : > { %v3672_v13 = vpop.f32.mrf.mxu0  ;;  %v3973_v51 = vadd.f32 %v4882_v43, %v3941_v42  ;;  %v4004_v37 = vmax.f32 %v3972_v19, 0.0  ;;  %v3449_v43 = vadd.f32 %v7366_v8, %v3116_v33  ;;  %v3117_v3 = vadd.f32 %v7333_v26, %v2794_v44  ;;  %v7492_v19 = vld [vmem:[%s7397_s30 + $0x40] sm:$0xff]  }
 0x208   : > { %v4032_v5 = vadd.f32 %v4031_v62, %v4001_v6  ;;  %v3775_v50 = vadd.f32 %v3672_v13, %v3445_v2  ;;  %v3971_v63 = vadd.f32 %v4878_v25, %v3939_v60  ;;  %v3944_v1 = vadd.f32 %v7415_v32, %v3777_v24 }
 0x209   : > { %v5609_v49 = vpop.f32.mrf.mxu0  ;;  %v4893_v39 = vunpack.c.l.bf16 %v7467_v48  ;;  %v4005_v56 = vmax.f32 %v3973_v51, 0.0  ;;  %v2797_v62 = vadd.f32 %v7180_v21, %v7176_v52  ;;  %v3452_v26 = vadd.f32 %v7373_v31, %v7329_v40  ;;  %v7489_v52 = vpop.f32.mrf.mxu1 }
 0x20a   : > { %v4033_v28 = vadd.f32 %v4032_v5, %v4002_v22  ;;  %v3942_v55 = vadd.f32 %v7415_v32, %v3775_v50  ;;  %v4003_v30 = vmax.f32 %v3971_v63, 0.0  ;;  %v3778_v14 = vadd.f32 %v5609_v49, %v3448_v41 }
 0x20b   : > { %v3675_v23 = vpop.f32.mrf.mxu0  ;;  %v3976_v60 = vadd.f32 %v4889_v61, %v3944_v1  ;;  %v3450_v16 = vadd.f32 %v7380_v59, %v3117_v3  ;;  %v3120_v22 = vadd.f32 %v7340_v57, %v2797_v62  ;;  %v4897_v31 = vunpack.c.l.bf16 %v4937_v45  ;;  %v7908_v1 = vld [vmem:[#allocation30_spill] sm:$0xff]  ;;  %v4939_v3 = vld [vmem:[%s7397_s30 + $0x48] sm:$0xff]   ;;  %v7910_v62 = vld [vmem:[#allocation11_spill] sm:$0xff] }
 0x20c   : > { %v3776_v10 = vadd.f32 %v3675_v23, %v3446_v15  ;;  %v4034_v18 = vadd.f32 %v4033_v28, %v4003_v30  ;;  %v3974_v4 = vadd.f32 %v4885_v58, %v3942_v55  ;;  %v3945_v20 = vadd.f32 %v7415_v32, %v3778_v14  ;;  %v7904_v30 = vld [vmem:[#allocation9_spill] sm:$0xff] }
 0x20d   : > { %v5612_v35 = vpop.f32.mrf.mxu0  ;;  %v2798_v63 = vadd.f32 %v7188_v7, %v7184_v9  ;;  %v4898_v24 = vunpack.c.h.bf16 %v4937_v45  ;;  %v4894_v59 = vunpack.c.h.bf16 %v7467_v48  ;;  %v4008_v57 = vmax.f32 %v3976_v60, 0.0  ;;  %v7905_v9 = vld [vmem:[#allocation34_spill] sm:$0xff]  ;;  %v7906_v7 = vld [vmem:[#allocation23_spill] sm:$0xff] }
 0x20e   : > { %v3943_v25 = vadd.f32 %v7415_v32, %v3776_v10  ;;  %v4035_v2 = vadd.f32 %v4034_v18, %v4004_v37  ;;  %v4006_v13 = vmax.f32 %v3974_v4, 0.0  ;;  %v3781_v53 = vadd.f32 %v5612_v35, %v3451_v38  ;;  %v7907_v18 = vld [vmem:[#allocation20_spill] sm:$0xff] }
 0x20f   : > { %v3688_v6 = vpop.f32.mrf.mxu0  ;;  %v3977_v40 = vadd.f32 %v4890_v29, %v3945_v20  ;;  %v3453_v51 = vadd.f32 %v7405_v47, %v3120_v22  ;;  %v3121_v61 = vadd.f32 %v7904_v30, %v2798_v63  ;;  %v4901_v23 = vunpack.c.l.bf16 %v7492_v19  ;;  %v7504_v29 = vpop.f32.mrf.mxu1  ;;  %v7909_v47 = vld [vmem:[#allocation8_spill] sm:$0xff] }
 0x210   : > { %v3975_v8 = vadd.f32 %v4886_v11, %v3943_v25  ;;  %v3779_v42 = vadd.f32 %v3688_v6, %v3449_v43  ;;  %v4036_v27 = vadd.f32 %v4035_v2, %v4005_v56  ;;  %v3948_v33 = vadd.f32 %v7415_v32, %v3781_v53  ;;  %v7912_v22 = vld [vmem:[#allocation24_spill] sm:$0xff] }
 0x211   : > { %v5613_v58 = vpop.f32.mrf.mxu0  ;;  %v3455_v44 = vadd.f32 %v7906_v7, %v7905_v9  ;;  %v4009_v48 = vmax.f32 %v3977_v40, 0.0  ;;  %v2801_v4 = vadd.f32 %v7908_v1, %v7907_v18  ;;  %v3456_v35 = vadd.f32 %v7420_v0, %v7909_v47  ;;  %v7917_v7 = vld [vmem:[#allocation13_spill] sm:$0xff]  ;;  %v7918_v47 = vld [vmem:[#allocation18_spill] sm:$0xff] }
 0x212   : > { %v4007_v5 = vmax.f32 %v3975_v8, 0.0  ;;  %v3946_v36 = vadd.f32 %v7415_v32, %v3779_v42  ;;  %v4037_v21 = vadd.f32 %v4036_v27, %v4006_v13  ;;  %v3782_v50 = vadd.f32 %v5613_v58, %v3452_v26  ;;  %v7515_v42 = vpop.f32.mrf.mxu1  ;;  %v7518_v58 = vld [vmem:[%s7397_s30 + $0x50] sm:$0xff]  }
 0x213   : > { %v3691_v41 = vpop.f32.mrf.mxu0  ;;  %v3454_v6 = vadd.f32 %v7434_v12, %v3121_v61  ;;  %v3124_v26 = vadd.f32 %v7910_v62, %v2801_v4  ;;  %v4905_v13 = vunpack.c.l.bf16 %v4939_v3  ;;  %v4902_v12 = vunpack.c.h.bf16 %v7492_v19  ;;  %v7920_v62 = vld [vmem:[#allocation27_spill] sm:$0xff] }
 0x214   : > { %v3780_v49 = vadd.f32 %v3691_v41, %v3450_v16  ;;  %v4038_v15 = vadd.f32 %v4037_v21, %v4007_v5  ;;  %v3978_v28 = vadd.f32 %v4893_v39, %v3946_v36  ;;  %v3949_v11 = vadd.f32 %v7415_v32, %v3782_v50  ;;  %v7911_v16 = vld [vmem:[#allocation29_spill] sm:$0xff] }
 0x215   : > { %v5616_v55 = vpop.f32.mrf.mxu0  ;;  %v3980_v39 = vadd.f32 %v4897_v31, %v3948_v33  ;;  %v2802_v5 = vadd.f32 %v7912_v22, %v7911_v16  ;;  %v4906_v36 = vunpack.c.h.bf16 %v4939_v3  ;;  %v7914_v33 = vld [vmem:[#allocation10_spill] sm:$0xff]  ;;  %v7921_v22 = vld [vmem:[#allocation15_spill] sm:$0xff] }
 0x216   : > { %v3947_v14 = vadd.f32 %v7415_v32, %v3780_v49  ;;  %v4039_v10 = vadd.f32 %v4038_v15, %v4008_v57  ;;  %v4010_v38 = vmax.f32 %v3978_v28, 0.0  ;;  %v3785_v2 = vadd.f32 %v5616_v55, %v3455_v44  ;;  %v7913_v49 = vld [vmem:[#allocation14_spill] sm:$0xff]  ;;  %v3409_v55 = vpop.f32.mrf.mxu1 }
 0x217   : > { %v3704_v37 = vpop.f32.mrf.mxu0  ;;  %v3981_v0 = vadd.f32 %v4898_v24, %v3949_v11  ;;  %v4012_v40 = vmax.f32 %v3980_v39, 0.0  ;;  %v3457_v24 = vadd.f32 %v7452_v46, %v3124_v26  ;;  %v4909_v15 = vunpack.c.l.bf16 %v7518_v58 }
 0x218   : > { %v3979_v43 = vadd.f32 %v4894_v59, %v3947_v14  ;;  %v3783_v25 = vadd.f32 %v3704_v37, %v3453_v51  ;;  %v4040_v56 = vadd.f32 %v4039_v10, %v4009_v48  ;;  %v3952_v50 = vadd.f32 %v7415_v32, %v3785_v2  ;;  %v7915_v14 = vld [vmem:[#allocation22_spill] sm:$0xff] }
 0x219   : > { %v5617_v20 = vpop.f32.mrf.mxu0  ;;  %v3125_v59 = vadd.f32 %v7913_v49, %v2802_v5  ;;  %v3459_v28 = vadd.f32 %v7442_v34, %v7914_v33  ;;  %v4013_v19 = vmax.f32 %v3981_v0, 0.0  ;;  %v3460_v46 = vadd.f32 %v7464_v17, %v7917_v7  ;;  %v4941_v48 = vld [vmem:[%s7397_s30 + $0x58] sm:$0xff]   ;;  %v7924_v49 = vld [vmem:[#allocation36_spill] sm:$0xff] }
 0x21a   : > { %v4011_v8 = vmax.f32 %v3979_v43, 0.0  ;;  %v3950_v45 = vadd.f32 %v7415_v32, %v3783_v25  ;;  %v4041_v60 = vadd.f32 %v4040_v56, %v4010_v38  ;;  %v3786_v27 = vadd.f32 %v5617_v20, %v3456_v35  ;;  %v5580_v25 = vpop.f32.mrf.mxu1  ;;  %v4942_v20 = vld [vmem:[%s7397_s30 + $0x60] sm:$0xff]  }
 0x21b   : > { %v3707_v53 = vpop.f32.mrf.mxu0  ;;  %v3984_v11 = vadd.f32 %v4905_v13, %v3952_v50  ;;  %v3458_v4 = vadd.f32 %v7478_v54, %v3125_v59  ;;  %v4913_v17 = vunpack.c.l.bf16 %v4941_v48 }
 0x21c   : > { %v3784_v21 = vadd.f32 %v3707_v53, %v3454_v6  ;;  %v4042_v31 = vadd.f32 %v4041_v60, %v4011_v8  ;;  %v3982_v41 = vadd.f32 %v4901_v23, %v3950_v45  ;;  %v3953_v30 = vadd.f32 %v7415_v32, %v3786_v27  ;;  %v7916_v23 = vld [vmem:[#allocation35_spill] sm:$0xff]  ;;  %v7919_v6 = vld [vmem:[#allocation33_spill] sm:$0xff] }
 0x21d   : > { %v5620_v63 = vpop.f32.mrf.mxu0  ;;  %v2805_v9 = vadd.f32 %v7916_v23, %v7915_v14  ;;  %v2806_v26 = vadd.f32 %v7920_v62, %v7919_v6  ;;  %v4914_v8 = vunpack.c.h.bf16 %v4941_v48  ;;  %v4910_v60 = vunpack.c.h.bf16 %v7518_v58  ;;  %v7926_v23 = vld [vmem:[#allocation19_spill] sm:$0xff] }
 0x21e   : > { %v3951_v57 = vadd.f32 %v7415_v32, %v3784_v21  ;;  %v4043_v51 = vadd.f32 %v4042_v31, %v4012_v40  ;;  %v4014_v37 = vmax.f32 %v3982_v41, 0.0  ;;  %v3789_v34 = vadd.f32 %v5620_v63, %v3459_v28  ;;  %v3422_v31 = vpop.f32.mrf.mxu1 }
 0x21f   : > { %v3720_v61 = vpop.f32.mrf.mxu0  ;;  %v3128_v35 = vadd.f32 %v7918_v47, %v2805_v9  ;;  %v3985_v38 = vadd.f32 %v4906_v36, %v3953_v30  ;;  %v4016_v54 = vmax.f32 %v3984_v11, 0.0  ;;  %v3129_v5 = vadd.f32 %v7921_v22, %v2806_v26  ;;  %v7930_v26 = vld [vmem:[#allocation17_spill] sm:$0xff] }
 0x220   : > { %v3983_v44 = vadd.f32 %v4902_v12, %v3951_v57  ;;  %v3787_v10 = vadd.f32 %v3720_v61, %v3457_v24  ;;  %v4044_v18 = vadd.f32 %v4043_v51, %v4013_v19  ;;  %v3956_v13 = vadd.f32 %v7415_v32, %v3789_v34  ;;  %v7922_v12 = vld [vmem:[#allocation16_spill] sm:$0xff]  ;;  %v7923_v24 = vld [vmem:[#allocation25_spill] sm:$0xff] }
 0x221   : > { %v5621_v1 = vpop.f32.mrf.mxu0  ;;  %v3461_v16 = vadd.f32 %v7504_v29, %v3128_v35  ;;  %v4917_v21 = vunpack.c.l.bf16 %v4942_v20  ;;  %v3463_v40 = vadd.f32 %v7489_v52, %v7922_v12  ;;  %v4017_v50 = vmax.f32 %v3985_v38, 0.0  ;;  %v7925_v57 = vld [vmem:[#allocation12_spill] sm:$0xff]  ;;  %v4944_v38 = vld [vmem:[%s7397_s30 + $0x70] sm:$0xff]  }
 0x222   : > { %v4015_v43 = vmax.f32 %v3983_v44, 0.0  ;;  %v3954_v3 = vadd.f32 %v7415_v32, %v3787_v10  ;;  %v4045_v39 = vadd.f32 %v4044_v18, %v4014_v37  ;;  %v3790_v56 = vadd.f32 %v5621_v1, %v3460_v46  ;;  %v4943_v61 = vld [vmem:[%s7397_s30 + $0x68] sm:$0xff]   ;;  %v5581_v44 = vpop.f32.mrf.mxu1  ;;  %v7928_v18 = vld [vmem:[#allocation31_spill] sm:$0xff] }
 0x223   : > { %v3723_v2 = vpop.f32.mrf.mxu0  ;;  %v2809_v59 = vadd.f32 %v7924_v49, %v7923_v24  ;;  %v3464_v29 = vadd.f32 %v7515_v42, %v7925_v57  ;;  %v3988_v28 = vadd.f32 %v4913_v17, %v3956_v13  ;;  %v3462_v14 = vadd.f32 %v3409_v55, %v3129_v5  ;;  %v7927_v37 = vld [vmem:[#allocation32_spill] sm:$0xff]  ;;  %v7931_v13 = vld [vmem:[#allocation21_spill] sm:$0xff] }
 0x224   : > { %v3788_v45 = vadd.f32 %v3723_v2, %v3458_v4  ;;  %v4046_v0 = vadd.f32 %v4045_v39, %v4015_v43  ;;  %v3986_v27 = vadd.f32 %v4909_v15, %v3954_v3  ;;  %v3957_v41 = vadd.f32 %v7415_v32, %v3790_v56  ;;  %v7929_v56 = vld [vmem:[#allocation26_spill] sm:$0xff] }
 0x225   : > { %v5624_v53 = vpop.f32.mrf.mxu0  ;;  %v3132_v9 = vadd.f32 %v7926_v23, %v2809_v59  ;;  %v2810_v34 = vadd.f32 %v7928_v18, %v7927_v37  ;;  %v4921_v1 = vunpack.c.l.bf16 %v4943_v61  ;;  %v4918_v47 = vunpack.c.h.bf16 %v4942_v20 }
 0x226   : > { %v3955_v36 = vadd.f32 %v7415_v32, %v3788_v45  ;;  %v4047_v58 = vadd.f32 %v4046_v0, %v4016_v54  ;;  %v4018_v19 = vmax.f32 %v3986_v27, 0.0  ;;  %v3793_v30 = vadd.f32 %v5624_v53, %v3463_v40  ;;  %v3425_v45 = vpop.f32.mrf.mxu1  ;;  %v4945_v40 = vld [vmem:[%s7397_s30 + $0x78] sm:$0xff]   ;;  %s4522_s30 = scalar_lea.sflag [#allocation4], %s419_s29 }
 0x227   : > { %v3736_v63 = vpop.f32.mrf.mxu0  ;;  %v3989_v10 = vadd.f32 %v4914_v8, %v3957_v41  ;;  %v4020_v35 = vmax.f32 %v3988_v28, 0.0  ;;  %v3465_v17 = vadd.f32 %v3422_v31, %v3132_v9  ;;  %v3133_v2 = vadd.f32 %v7929_v56, %v2810_v34  ;;  %v5852_v56 = vld [vmem:[%s7733_s6 + $0x28] sm:$0xff]  }
 0x228   : > { %v3987_v15 = vadd.f32 %v4910_v60, %v3955_v36  ;;  %v3791_v33 = vadd.f32 %v3736_v63, %v3461_v16  ;;  %v4048_v51 = vadd.f32 %v4047_v58, %v4017_v50  ;;  %v3960_v55 = vadd.f32 %v7415_v32, %v3793_v30 }
 0x229   : > { %v5625_v52 = vpop.f32.mrf.mxu0  ;;  %v4922_v6 = vunpack.c.h.bf16 %v4943_v61  ;;  %v3467_v8 = vadd.f32 %v5580_v25, %v7930_v26  ;;  %v4021_v60 = vmax.f32 %v3989_v10, 0.0  ;;  %v3468_v27 = vadd.f32 %v5581_v44, %v7931_v13  ;;  %v5856_v26 = vld [vmem:[%s7733_s6 + $0x8] sm:$0xff]   ;;  %v5863_v13 = vld [vmem:[%s7735_s8 + $0x10] sm:$0xff]  }
 0x22a   : > { %v4019_v7 = vmax.f32 %v3987_v15, 0.0  ;;  %v3958_v46 = vadd.f32 %v7415_v32, %v3791_v33  ;;  %v4049_v48 = vadd.f32 %v4048_v51, %v4018_v19  ;;  %v3794_v11 = vadd.f32 %v5625_v52, %v3464_v29 }
 0x22b   : > { %v3739_v42 = vpop.f32.mrf.mxu0  ;;  %v4925_v22 = vunpack.c.l.bf16 %v4944_v38  ;;  %v3992_v5 = vadd.f32 %v4921_v1, %v3960_v55  ;;  %v3466_v50 = vadd.f32 %v3425_v45, %v3133_v2  ;;  %v4929_v59 = vunpack.c.l.bf16 %v4945_v40  ;;  %v5853_v2 = vld [vmem:[%s7733_s6 + $0x20] sm:$0xff]   ;;  %v5858_v45 = vld [vmem:[%s7735_s8 + $0x38] sm:$0xff]  }
 0x22c   : > { %v3792_v4 = vadd.f32 %v3739_v42, %v3462_v14  ;;  %v4050_v43 = vadd.f32 %v4049_v48, %v4019_v7  ;;  %v3990_v3 = vadd.f32 %v4917_v21, %v3958_v46  ;;  %v3961_v20 = vadd.f32 %v7415_v32, %v3794_v11  ;;  %5671 = vmatpush3.bf16.msra.mxu0 %v5858_v45 }
 0x22d   : > { %v5628_v39 = vpop.f32.mrf.mxu0  ;;  %v4926_v29 = vunpack.c.h.bf16 %v4944_v38  ;;  %v4024_v15 = vmax.f32 %v3992_v5, 0.0  ;;  %v4930_v52 = vunpack.c.h.bf16 %v4945_v40  ;;  %v5851_v38 = vld [vmem:[%s7733_s6 + $0x30] sm:$0xff]  }
 0x22e   : > { %v3959_v62 = vadd.f32 %v7415_v32, %v3792_v4  ;;  %v4051_v54 = vadd.f32 %v4050_v43, %v4020_v35  ;;  %v4022_v36 = vmax.f32 %v3990_v3, 0.0  ;;  %v3797_v12 = vadd.f32 %v5628_v39, %v3467_v8  ;;  %v5857_v8 = vld [vmem:[%s7733_s6] sm:$0xff]  }
 0x22f   : > { %v3752_v0 = vpop.f32.mrf.mxu0  ;;  %v3993_v63 = vadd.f32 %v4922_v6, %v3961_v20  ;;  %v5854_v6 = vld [vmem:[%s7733_s6 + $0x18] sm:$0xff]   ;;  %v5861_v20 = vld [vmem:[%s7735_s8 + $0x20] sm:$0xff]  }
 0x230   : > { %v3991_v53 = vadd.f32 %v4918_v47, %v3959_v62  ;;  %v3795_v16 = vadd.f32 %v3752_v0, %v3465_v17  ;;  %v4052_v21 = vadd.f32 %v4051_v54, %v4021_v60  ;;  %v3964_v28 = vadd.f32 %v7415_v32, %v3797_v12  ;;  %v5855_v62 = vld [vmem:[%s7733_s6 + $0x10] sm:$0xff]   ;;  %v5860_v54 = vld [vmem:[%s7735_s8 + $0x28] sm:$0xff]   ;;  %v5862_v0 = vld [vmem:[%s7735_s8 + $0x18] sm:$0xff]  }
 0x231   : > { %v5629_v31 = vpop.f32.mrf.mxu0  ;;  %v4025_v30 = vmax.f32 %v3993_v63, 0.0  ;;  %v7932_v17 = vmov 0.0   ;;  %v5859_v60 = vld [vmem:[%s7735_s8 + $0x30] sm:$0xff]   ;;  %v5870_v63 = vld [vmem:[%s7737_s10 + $0x18] sm:$0xff]  }
 0x232   : > { %v4023_v58 = vmax.f32 %v3991_v53, 0.0  ;;  %v3962_v25 = vadd.f32 %v7415_v32, %v3795_v16  ;;  %v4053_v41 = vadd.f32 %v4052_v21, %v4022_v36  ;;  %v3798_v24 = vadd.f32 %v5629_v31, %v3468_v27  ;;  %5672 = vmatprep.subr.bf16.mxu0 %v7932_v17  ;;  %v5864_v27 = vld [vmem:[%s7735_s8 + $0x8] sm:$0xff]   ;;  %v4827_v53 = vld [vmem:[%s7732_s5] ss:$0 sm:$0xff] }
 0x233   : > { %v3755_v49 = vpop.f32.mrf.mxu0  ;;  %v3996_v9 = vadd.f32 %v4929_v59, %v3964_v28  ;;  %5673 = vmatpush3.bf16.msra.mxu0 %v5859_v60  ;;  %v5865_v31 = vld [vmem:[%s7735_s8] sm:$0xff]  }
 0x234   : > { %v3796_v57 = vadd.f32 %v3755_v49, %v3466_v50  ;;  %v4054_v33 = vadd.f32 %v4053_v41, %v4023_v58  ;;  %v3994_v19 = vadd.f32 %v4925_v22, %v3962_v25  ;;  %v3965_v14 = vadd.f32 %v7415_v32, %v3798_v24  ;;  %5674 = vmatprep.subr.bf16.mxu0 %v7932_v17  ;;  %v5866_v50 = vld [vmem:[%s7737_s10 + $0x38] sm:$0xff]   ;;  %v5867_v58 = vld [vmem:[%s7737_s10 + $0x30] sm:$0xff]   ;;  %v5868_v25 = vld [vmem:[%s7737_s10 + $0x28] sm:$0xff]  }
 0x235   : > { %v4028_v11 = vmax.f32 %v3996_v9, 0.0  ;;  %v5869_v41 = vld [vmem:[%s7737_s10 + $0x20] sm:$0xff]   ;;  %v5871_v24 = vld [vmem:[%s7737_s10 + $0x10] sm:$0xff]  }
 0x236   : > { %v3963_v51 = vadd.f32 %v7415_v32, %v3796_v57  ;;  %v4055_v61 = vadd.f32 %v4054_v33, %v4024_v15  ;;  %v4026_v7 = vmax.f32 %v3994_v19, 0.0  ;;  %v3997_v10 = vadd.f32 %v4930_v52, %v3965_v14  ;;  %v5850_v32 = vld [vmem:[%s7733_s6 + $0x38] sm:$0xff]   ;;  %v4836_v49 = vld [vmem:[%s7734_s7] ss:$0 sm:$0xff] }
 0x237   : > { %5675 = vmatpush3.bf16.msra.mxu0 %v5860_v54 }
 0x238   : > { %v3995_v23 = vadd.f32 %v4926_v29, %v3963_v51  ;;  %v4056_v46 = vadd.f32 %v4055_v61, %v4025_v30  ;;  %v4029_v37 = vmax.f32 %v3997_v10, 0.0  ;;  %5676 = vmatprep.subr.bf16.mxu0 %v7932_v17  ;;  %v5872_v51 = vld [vmem:[%s7737_s10 + $0x8] sm:$0xff]   ;;  %v5873_v30 = vld [vmem:[%s7737_s10] sm:$0xff]  }
 0x239   : > { %v4845_v61 = vld [vmem:[%s7736_s9] ss:$0 sm:$0xff] }
 0x23a   : > { %v4027_v44 = vmax.f32 %v3995_v23, 0.0  ;;  %v4057_v48 = vadd.f32 %v4056_v46, %v4026_v7 }
 0x23b   : > { %5677 = vmatpush3.bf16.msra.mxu0 %v5861_v20 }
 0x23c   : > { %v4058_v42 = vadd.f32 %v4057_v48, %v4027_v44  ;;  %5678 = vmatprep.subr.bf16.mxu0 %v7932_v17  ;;  %v4854_v48 = vld [vmem:[%s7738_s11] ss:$0 sm:$0xff] }
 0x23e   : > { %v4059_v18 = vadd.f32 %v4058_v42, %v4028_v11 }
 0x23f   : > { %5679 = vmatpush3.bf16.msra.mxu0 %v5862_v0 }
 0x240   : > { %v4060_v34 = vadd.f32 %v4059_v18, %v4029_v37  ;;  %5680 = vmatprep.subr.bf16.mxu0 %v7932_v17 }
 0x242   : > { %v4061_v1 = vrot.slane %v4060_v34, 4 }
 0x243   : > { %5681 = vmatpush3.bf16.msra.mxu0 %v5863_v13 }
 0x244   : > { %v4062_v4 = vadd.f32 %v4061_v1, %v4060_v34  ;;  %5682 = vmatprep.subr.bf16.mxu0 %v7932_v17 }
 0x246   : > { %v4063_v47 = vrot.slane %v4062_v4, 2 }
 0x247   : > { %5683 = vmatpush3.bf16.msra.mxu0 %v5864_v27 }
 0x248   : > { %v4064_v35 = vadd.f32 %v4063_v47, %v4062_v4  ;;  %5684 = vmatprep.subr.bf16.mxu0 %v7932_v17 }
 0x24a   : > { %v4065_v43 = vrot.slane %v4064_v35, 1 }
 0x24b   : > { %5685 = vmatpush3.bf16.msra.mxu0 %v5865_v31 }
 0x24c   : > { %v4066_v55 = vadd.f32 %v4065_v43, %v4064_v35 }
 0x24e   : > { %v4068_v3 = vmul.f32 0.00390625, %v4066_v55 }
 0x250   : > { %v4069_v39 = vpack.c.bf16 %v4068_v3, %v4068_v3 }
 0x252   : > { %5647 = vmatmul.mubr.bf16.vlgmr.msra.gmra.mxu1 %v4069_v39 }
 0x253   : > { %5651 = vmatpush3.bf16.msra.mxu1 %v5850_v32  ;;  %5666 = vmatprep.mubr.msk.bf16.mxu1 %vm5955_vm2, %v7932_v17 }
 0x254   : > { %5652 = vmatprep.subr.bf16.mxu1 %v7932_v17 }
 0x257   : > { %5653 = vmatpush3.bf16.msra.mxu1 %v5851_v38 }
 0x258   : > { %5654 = vmatprep.subr.bf16.mxu1 %v7932_v17 }
 0x25b   : > { %5655 = vmatpush3.bf16.msra.mxu1 %v5852_v56 }
 0x25c   : > { %5656 = vmatprep.subr.bf16.mxu1 %v7932_v17 }
 0x25f   : > { %5657 = vmatpush3.bf16.msra.mxu1 %v5853_v2 }
 0x260   : > { %5658 = vmatprep.subr.bf16.mxu1 %v7932_v17 }
 0x263   : > { %5659 = vmatpush3.bf16.msra.mxu1 %v5854_v6 }
 0x264   : > { %5660 = vmatprep.subr.bf16.mxu1 %v7932_v17 }
 0x267   : > { %5661 = vmatpush3.bf16.msra.mxu1 %v5855_v62 }
 0x268   : > { %5662 = vmatprep.subr.bf16.mxu1 %v7932_v17 }
 0x26b   : > { %5663 = vmatpush3.bf16.msra.mxu1 %v5856_v26 }
 0x26c   : > { %5664 = vmatprep.subr.bf16.mxu1 %v7932_v17 }
 0x26f   : > { %5665 = vmatpush3.bf16.msra.mxu1 %v5857_v8 }
 0x270   : > { %5690 = vmatprep.subr.bf16.mxu1 %v7932_v17 }
 0x312   : > { %v4175_v16 = vpop.f32.mrf.mxu1 }
 0x313   : > { %v4176_v22 = vadd.f32 %v4827_v53, %v4175_v16 }
 0x314   : > { %v5648_v5 = vpop.f32.mrf.mxu1 }
 0x315   : > { %v4181_v36 = vmax.f32 %v4176_v22, 0.0 }
 0x316   : > { %v4178_v21 = vpop.f32.mrf.mxu1 }
 0x317   : > { %v4182_v12 = vpack.c.bf16 %v4181_v36, %v4181_v36 }
 0x318   : > { %v5649_v40 = vpop.f32.mrf.mxu1 }
 0x319   : > { %5667 = vmatmul.mubr.bf16.vlgmr.msra.gmra.mxu1 %v4182_v12 }
 0x31a   : > { %5706 = vmatprep.mubr.msk.bf16.mxu1 %vm5955_vm2, %v7932_v17  ;;  %5691 = vmatpush3.bf16.msra.mxu1 %v5866_v50 }
 0x31b   : > { %5692 = vmatprep.subr.bf16.mxu1 %v7932_v17 }
 0x31e   : > { %5693 = vmatpush3.bf16.msra.mxu1 %v5867_v58 }
 0x31f   : > { %5694 = vmatprep.subr.bf16.mxu1 %v7932_v17 }
 0x322   : > { %5695 = vmatpush3.bf16.msra.mxu1 %v5868_v25 }
 0x323   : > { %5696 = vmatprep.subr.bf16.mxu1 %v7932_v17 }
 0x326   : > { %5697 = vmatpush3.bf16.msra.mxu1 %v5869_v41 }
 0x327   : > { %5698 = vmatprep.subr.bf16.mxu1 %v7932_v17 }
 0x32a   : > { %5699 = vmatpush3.bf16.msra.mxu1 %v5870_v63 }
 0x32b   : > { %5700 = vmatprep.subr.bf16.mxu1 %v7932_v17 }
 0x32e   : > { %5701 = vmatpush3.bf16.msra.mxu1 %v5871_v24 }
 0x32f   : > { %5702 = vmatprep.subr.bf16.mxu1 %v7932_v17 }
 0x332   : > { %5703 = vmatpush3.bf16.msra.mxu1 %v5872_v51 }
 0x333   : > { %5704 = vmatprep.subr.bf16.mxu1 %v7932_v17 }
 0x336   : > { %5705 = vmatpush3.bf16.msra.mxu1 %v5873_v30 }
 0x3d9   : > { %v4288_v59 = vpop.f32.mrf.mxu1 }
 0x3da   : > { %v4289_v57 = vadd.f32 %v4836_v49, %v4288_v59 }
 0x3db   : > { %v5668_v29 = vpop.f32.mrf.mxu1 }
 0x3dc   : > { %v4294_v15 = vmax.f32 %v4289_v57, 0.0 }
 0x3dd   : > { %v4291_v33 = vpop.f32.mrf.mxu1 }
 0x3de   : > { %v4295_v28 = vpack.c.bf16 %v4294_v15, %v4294_v15 }
 0x3df   : > { %v5669_v19 = vpop.f32.mrf.mxu1 }
 0x3e0   : > { %5687 = vmatmul.mubr.bf16.vlgmr.msra.gmra.mxu0 %v4295_v28 }
 0x4a0   : > { %v4401_v52 = vpop.f32.mrf.mxu0 }
 0x4a1   : > { %v4402_v14 = vadd.f32 %v4845_v61, %v4401_v52 }
 0x4a2   : > { %v5688_v23 = vpop.f32.mrf.mxu0 }
 0x4a3   : > { %v4407_v9 = vmax.f32 %v4402_v14, 0.0 }
 0x4a4   : > { %v4404_v7 = vpop.f32.mrf.mxu0 }
 0x4a5   : > { %v4408_v46 = vpack.c.bf16 %v4407_v9, %v4407_v9 }
 0x4a6   : > { %v5689_v44 = vpop.f32.mrf.mxu0 }
 0x4a7   : > { %5707 = vmatmul.mubr.bf16.vlgmr.msra.gmra.mxu1 %v4408_v46 }
 0x567   : > { %v4514_v10 = vpop.f32.mrf.mxu1 }
 0x568   : > { %v4515_v11 = vadd.f32 %v4854_v48, %v4514_v10 }
 0x569   : > { %v5708_v42 = vpop.f32.mrf.mxu1 }
 0x56a   : > { %4520 = vst [vmem:[%s420_s26] sm:$0x1] %v4515_v11 }
 0x56b   : > { %v4517_v37 = vpop.f32.mrf.mxu1 }
 0x56c   : > { %5905 = shalt.err (!%p5902_p3)
}
 0x56d   : > { %s5906_s20 = scalar_lea.hbm %s7686_s16, 16  ;;  %s5910_s23 = scalar_lea.hbm %s7739_s12, 32 }
 0x56e   : > { %p5907_p4 = scmp.ne.s32.totalorder %s7686_s16, %s5906_s20  ;;  %p5911_p9 = scmp.lt.s32.totalorder %s7686_s16, %s7739_s12 }
 0x56f   : > { %p5912_p10 = scmp.lt.s32.totalorder %s5910_s23, %s5906_s20 }
 0x570   : > { %p5908_p7 = pnand %p5907_p4, %p6060_p5 }
 0x571   : > { %p5913_p11 = por %p5912_p10, %p5911_p9 }
 0x572   : > { %p5909_p8 = pneg %p5908_p7 }
 0x574   : > { %p5914_p12 = pnand %p5913_p11, %p5909_p8 }
 0x576   : > { %5917 = shalt.err (!%p5914_p12)
}
 0x577   : > { %5711 = dma.vmem_to_hbm [thread:$0]  (%p6060_p5), %s7688_s28, 16, %s7686_s16, %s4522_s30   ;;  %v5709_v18 = vpop.f32.mrf.mxu1 }
 0x578 PF: > { %p5717_p13 = scmp.ge.s32.totalorder %s5952_s24, 2  ;;  %s4546_s18 = sand.u32 1, %s5940_s21  }
 0x579   : > { %s4547_s17 = scalar_lea.sflag [#allocation4], %s4546_s18 }
 0x57a   : > { %p5714_p0 = pnand %p5717_p13, %p6064_p6 }
 0x57c   : > { %p5715_p1 = pneg %p5714_p0 }
 0x57e   : > { %5935 = dma.done.wait (%p5715_p1), %s4547_s17, 16  }
 0x57f   : > { %5937 = vsyncadd (%p5715_p1), %s4547_s17, 4294967280  ;;  %s7933_s19 = sld [smem:[#allocation6_spill]]  ;;  %p22_p2 = scmp.ge.s32.totalorder %s6047_s27, 4  }
 0x580   : > { %s7934_s23 = sld [smem:[#allocation7_spill]]  ;;  %s7935_s21 = smov %s5944_s22 }
 0x581   : > { %s7937_s24 = smov %s6047_s27  ;;  %24 = sbr.rel (!%p22_p2) target bundleno = 3 (0x3), region = 114 }
 0x585   : > { %s7936_s22 = smov %s7933_s19 }
 0x586   :  { %4551 = vsyncpa [#allocation4], 1 }
 0x587   :  { %4553 = vsyncpa [#allocation4 + $0x1], 1 }

</bundles_post_ra>
